<compile_context>
chip_gen: v7x
topology: tpu7x:2x2x1
jax: 0.10.0
libtpu: 0.0.40
codegen_flags: <defaults>
</compile_context>

<pallas_src>
import math

import jax
import jax.numpy as jnp
from jax import lax
from jax.experimental import pallas as pl
from jax.experimental.pallas import tpu as pltpu

# ----------------------------- model config ---------------------------------
D_MODEL = 32
N_HEADS = 4
D_HEAD = D_MODEL // N_HEADS          # 8
N_LAYERS = 2
FF_MULT = 4
D_FF = D_MODEL * FF_MULT             # 128
VOCAB = 64
VOCAB_PAD = 128                      # lane-dense logits
SEQ = 8
BATCH = 16                           # sequences (rows batched to fill the MXU)
ROWS = BATCH * SEQ                   # 128 total rows
GRID = 2                             # row-blocks -> 2 TCs on v7x
N_BLK = ROWS // GRID                 # 64 rows / block
SEQ_PER_BLK = BATCH // GRID          # 8 sequences / block
LN_EPS = 1e-5                        # torch nn.LayerNorm default
LANES = 128

# ---- weight-matrix slab layout (bf16), shape (L, WROWS, 128), lanes 0:32 unless noted
WQ_R, WK_R, WV_R, WO_R = 0, 32, 64, 96
WQR_R, WKR_R = 128, 160              # RoPE-rotated Wq / Wk (rotation folded host-side)
W1_R = 192                           # (32, 128) uses all 128 lanes
W2_R = 224                           # (128, 32)
WROWS = W2_R + D_FF                  # 352

# ---- per-layer vector slab (f32), shape (L, VROWS, 128)
VROWS = 8                            # rows: g1, be1, bo, g2, be2, b2, b1, pad

# ---- globals slab (f32), shape (G_ROWS, 128)
EMB_R = 0                            # (VOCAB, D)
HEAD_R = 64                          # (D, 128) padded LM head
OUTG_R, OUTB_R = 96, 97              # final LayerNorm gamma / beta
COS_R = 104                          # (N_BLK, D) RoPE cos, tiled over sequences
SIN_R = COS_R + N_BLK                # 168
G_ROWS = SIN_R + N_BLK               # 232


# ------------------------------ fused kernel ---------------------------------
def _layernorm(x, gamma, beta):
    mu = jnp.mean(x, axis=-1, keepdims=True)
    var = jnp.mean(jnp.square(x - mu), axis=-1, keepdims=True)
    return (x - mu) * lax.rsqrt(var + LN_EPS) * gamma + beta


def fused_transformer_kernel(ids_ref, wmat_ref, vec_ref, glob_ref, out_ref):
    f32, bf16 = jnp.float32, jnp.bfloat16
    N, D, H, Dh = N_BLK, D_MODEL, N_HEADS, D_HEAD

    # ---------------- hoisted once, shared by every layer ----------------
    # Token-embedding gather as an exact one-hot matmul (kept in f32).
    ids = ids_ref[...]                                               # (N, 1) i32
    onehot = (ids == lax.broadcasted_iota(jnp.int32, (N, VOCAB), 1)).astype(f32)
    x = jnp.dot(onehot, glob_ref[EMB_R:EMB_R + VOCAB, 0:D],
                preferred_element_type=f32)                          # (N, D) f32

    # Block-diagonal causal mask over the folded sequences (no int division),
    # as an additive f32 bias, tiled over the sublane-stacked heads.
    row = lax.broadcasted_iota(jnp.int32, (N, N), 0)
    col = lax.broadcasted_iota(jnp.int32, (N, N), 1)
    rb = jnp.zeros((N, N), jnp.int32)
    cb = jnp.zeros((N, N), jnp.int32)
    for s in range(1, SEQ_PER_BLK):
        rb = rb + (row >= s * SEQ).astype(jnp.int32)
        cb = cb + (col >= s * SEQ).astype(jnp.int32)
    ok = jnp.logical_and(row >= col, rb == cb)
    neg = jnp.where(ok, 0.0, -1e30).astype(f32)                      # (N, N)
    neg_st = jnp.concatenate([neg] * H, axis=0)                      # (H*N, N)

    # Per-head lane masks (bf16), used both for Q_bd and head-masked V.
    lane = lax.broadcasted_iota(jnp.int32, (1, D), 1)
    hmask = [jnp.logical_and(lane >= h * Dh, lane < (h + 1) * Dh).astype(bf16)
             for h in range(H)]

    cos = glob_ref[COS_R:COS_R + N, 0:D]                             # (N, D) f32
    sin = glob_ref[SIN_R:SIN_R + N, 0:D]

    # ---------------- layer loop (statically unrolled) ----------------
    for l in range(N_LAYERS):
        # Static ref views into the packed bf16 weight slab (no per-weight DMA).
        wq   = wmat_ref[l, WQ_R:WQ_R + D,   0:D]
        wk   = wmat_ref[l, WK_R:WK_R + D,   0:D]
        wv   = wmat_ref[l, WV_R:WV_R + D,   0:D]
        wo   = wmat_ref[l, WO_R:WO_R + D,   0:D]
        wq_r = wmat_ref[l, WQR_R:WQR_R + D, 0:D]
        wk_r = wmat_ref[l, WKR_R:WKR_R + D, 0:D]
        w1   = wmat_ref[l, W1_R:W1_R + D,   0:D_FF]
        w2   = wmat_ref[l, W2_R:W2_R + D_FF, 0:D]

        g1  = vec_ref[l, 0:1, 0:D]
        be1 = vec_ref[l, 1:2, 0:D]
        bo  = vec_ref[l, 2:3, 0:D]
        g2  = vec_ref[l, 3:4, 0:D]
        be2 = vec_ref[l, 4:5, 0:D]
        b2  = vec_ref[l, 5:6, 0:D]
        b1  = vec_ref[l, 6:7, 0:D_FF]

        # ---- attention block (pre-LN) ----
        h1 = _layernorm(x, g1, be1).astype(bf16)
        q   = jnp.dot(h1, wq,   preferred_element_type=f32)   # 1/sqrt(Dh) folded in
        q_r = jnp.dot(h1, wq_r, preferred_element_type=f32)   # (h1 @ (Wq @ Rot))
        k   = jnp.dot(h1, wk,   preferred_element_type=f32)
        k_r = jnp.dot(h1, wk_r, preferred_element_type=f32)
        v   = jnp.dot(h1, wv,   preferred_element_type=f32).astype(bf16)

        # RoPE (interleaved / view_as_complex semantics), rotation folded into
        # Wq_rot / Wk_rot host-side; rope done in f32, operands cast to bf16.
        qe = (q * cos + q_r * sin).astype(bf16)                      # (N, D)
        ke = (k * cos + k_r * sin).astype(bf16)

        # Heads stacked on the SUBLANE axis: Q_bd[h*N+i, :] = qe[i, :] masked to
        # head h lanes, so one matmul gives all per-head scores and the softmax
        # is a plain row softmax (no lane segmentation, no 8-lane slices).
        q_bd = jnp.concatenate([qe * hmask[h] for h in range(H)], axis=0)  # (H*N, D)
        s = jnp.einsum('id,jd->ij', q_bd, ke,
                       preferred_element_type=f32)                  # (H*N, N) f32
        s = s + neg_st
        s = s - jnp.max(s, axis=-1, keepdims=True)
        p = jnp.exp(s)
        p = p * pl.reciprocal(jnp.sum(p, axis=-1, keepdims=True), approx=True)
        p = p.astype(bf16)

        # Context = concat over heads, computed as an accumulating matmul chain
        # (maps to MRB accumulation on v7x); clean sublane slices only.
        ctx = jnp.zeros((N, D), f32)
        for h in range(H):
            ctx = ctx + jnp.dot(p[h * N:(h + 1) * N, :], v * hmask[h],
                                preferred_element_type=f32)
        att = jnp.dot(ctx.astype(bf16), wo, preferred_element_type=f32) + bo
        x = x + att                                  # resid_dropout: identity (eval)

        # ---- feed-forward block (pre-LN) ----
        h2 = _layernorm(x, g2, be2).astype(bf16)
        f = jnp.dot(h2, w1, preferred_element_type=f32) + b1
        f = 0.5 * f * (1.0 + lax.erf(f * (1.0 / math.sqrt(2.0))))   # exact GELU (f32)
        f = jnp.dot(f.astype(bf16), w2, preferred_element_type=f32) + b2
        x = x + f                                    # ff_dropout: identity (eval)

    # ---------------- final LayerNorm + LM head (lane-dense, padded vocab) ----
    hfin = _layernorm(x, glob_ref[OUTG_R:OUTG_R + 1, 0:D],
                      glob_ref[OUTB_R:OUTB_R + 1, 0:D]).astype(bf16)
    hw = glob_ref[HEAD_R:HEAD_R + D, :].astype(bf16)                 # (D, 128)
    out_ref[...] = jnp.dot(hfin, hw, preferred_element_type=f32)


# ------------------------------ wrapper ---------------------------------------
@jax.jit
def transformer_lm(src, wmat, vec, glob):
    ids = src.reshape(ROWS, 1).astype(jnp.int32)
    out = pl.pallas_call(
        fused_transformer_kernel,
        out_shape=jax.ShapeDtypeStruct((ROWS, VOCAB_PAD), jnp.float32),
        grid_spec=pltpu.PrefetchScalarGridSpec(
            num_scalar_prefetch=0,
            grid=(GRID,),
            in_specs=[
                pl.BlockSpec((N_BLK, 1), lambda i: (i, 0)),                    # ids
                pl.BlockSpec((N_LAYERS, WROWS, LANES), lambda i: (0, 0, 0)),   # bf16 matrices
                pl.BlockSpec((N_LAYERS, VROWS, LANES), lambda i: (0, 0, 0)),   # f32 vectors
                pl.BlockSpec((G_ROWS, LANES), lambda i: (0, 0)),               # globals
            ],
            out_specs=pl.BlockSpec((N_BLK, VOCAB_PAD), lambda i: (i, 0)),
        ),
        compiler_params=pltpu.CompilerParams(
            dimension_semantics=("parallel",)),      # 2x on v7x (2 TCs), no-op v5e/v6e
    )(ids, wmat, vec, glob)
    return out[:, :VOCAB].reshape(BATCH, SEQ, VOCAB)


# ------------------------------ host-side packing -----------------------------
def build_rotm():
    """(t @ rotm)[2i] = -t[2i+1], (t @ rotm)[2i+1] = t[2i]  (interleaved RoPE swap)."""
    rot = jnp.zeros((D_MODEL, D_MODEL), jnp.float32)
    even = jnp.arange(0, D_MODEL, 2)
    odd = even + 1
    rot = rot.at[even, odd].set(1.0)
    rot = rot.at[odd, even].set(-1.0)
    return rot


def precompute_rope_block(theta=10000.0):
    half = D_HEAD // 2
    freqs = 1.0 / theta ** (jnp.arange(0, D_HEAD, 2)[:half].astype(jnp.float32) / D_HEAD)
    t = jnp.arange(SEQ, dtype=jnp.float32)
    ang = jnp.outer(t, freqs)                               # (SEQ, Dh/2)
    cos_i = jnp.repeat(jnp.cos(ang), 2, axis=-1)            # interleaved (SEQ, Dh)
    sin_i = jnp.repeat(jnp.sin(ang), 2, axis=-1)
    cos_d = jnp.tile(cos_i, (1, N_HEADS))                   # (SEQ, D) per-head tiled
    sin_d = jnp.tile(sin_i, (1, N_HEADS))
    cos_blk = jnp.tile(cos_d, (SEQ_PER_BLK, 1))             # (N_BLK, D)
    sin_blk = jnp.tile(sin_d, (SEQ_PER_BLK, 1))
    return cos_blk.astype(jnp.float32), sin_blk.astype(jnp.float32)


def init_params(key):
    ks = jax.random.split(key, 8)

    def nrm(k, shape, scale=0.02):
        return (scale * jax.random.normal(k, shape)).astype(jnp.float32)

    L, D = N_LAYERS, D_MODEL
    return {
        "emb": nrm(ks[0], (VOCAB, D)),
        "wq": nrm(ks[1], (L, D, D)),      # (in, out) layout = torch weight transposed
        "wk": nrm(ks[2], (L, D, D)),
        "wv": nrm(ks[3], (L, D, D)),
        "wo": nrm(ks[4], (L, D, D)),
        "bo": jnp.zeros((L, D), jnp.float32),
        "w1": nrm(ks[5], (L, D, D_FF)),
        "b1": jnp.zeros((L, D_FF), jnp.float32),
        "w2": nrm(ks[6], (L, D_FF, D)),
        "b2": jnp.zeros((L, D), jnp.float32),
        "g1": jnp.ones((L, D), jnp.float32),
        "be1": jnp.zeros((L, D), jnp.float32),
        "g2": jnp.ones((L, D), jnp.float32),
        "be2": jnp.zeros((L, D), jnp.float32),
        "out_g": jnp.ones((D,), jnp.float32),
        "out_b": jnp.zeros((D,), jnp.float32),
        "head_w": nrm(ks[7], (D, VOCAB)),
    }


def pack_params(p):
    """Pack all parameters into 3 DMA slabs (matrices bf16, vectors/globals f32)."""
    L = N_LAYERS
    rotm = build_rotm()
    scale = 1.0 / math.sqrt(D_HEAD)                 # folded into Wq (exact, RoPE is linear)
    wq_s = p["wq"] * scale
    wq_rot = jnp.einsum("lij,jk->lik", wq_s, rotm)
    wk_rot = jnp.einsum("lij,jk->lik", p["wk"], rotm)

    wmat = jnp.zeros((L, WROWS, LANES), jnp.float32)
    wmat = wmat.at[:, WQ_R:WQ_R + D_MODEL, :D_MODEL].set(wq_s)
    wmat = wmat.at[:, WK_R:WK_R + D_MODEL, :D_MODEL].set(p["wk"])
    wmat = wmat.at[:, WV_R:WV_R + D_MODEL, :D_MODEL].set(p["wv"])
    wmat = wmat.at[:, WO_R:WO_R + D_MODEL, :D_MODEL].set(p["wo"])
    wmat = wmat.at[:, WQR_R:WQR_R + D_MODEL, :D_MODEL].set(wq_rot)
    wmat = wmat.at[:, WKR_R:WKR_R + D_MODEL, :D_MODEL].set(wk_rot)
    wmat = wmat.at[:, W1_R:W1_R + D_MODEL, :D_FF].set(p["w1"])
    wmat = wmat.at[:, W2_R:W2_R + D_FF, :D_MODEL].set(p["w2"])
    wmat = wmat.astype(jnp.bfloat16)

    vec = jnp.zeros((L, VROWS, LANES), jnp.float32)
    vec = vec.at[:, 0, :D_MODEL].set(p["g1"])
    vec = vec.at[:, 1, :D_MODEL].set(p["be1"])
    vec = vec.at[:, 2, :D_MODEL].set(p["bo"])
    vec = vec.at[:, 3, :D_MODEL].set(p["g2"])
    vec = vec.at[:, 4, :D_MODEL].set(p["be2"])
    vec = vec.at[:, 5, :D_MODEL].set(p["b2"])
    vec = vec.at[:, 6, :D_FF].set(p["b1"])

    cos_blk, sin_blk = precompute_rope_block()
    glob = jnp.zeros((G_ROWS, LANES), jnp.float32)
    glob = glob.at[EMB_R:EMB_R + VOCAB, :D_MODEL].set(p["emb"])
    glob = glob.at[HEAD_R:HEAD_R + D_MODEL, :VOCAB].set(p["head_w"])   # lane-padded head
    glob = glob.at[OUTG_R, :D_MODEL].set(p["out_g"])
    glob = glob.at[OUTB_R, :D_MODEL].set(p["out_b"])
    glob = glob.at[COS_R:COS_R + N_BLK, :D_MODEL].set(cos_blk)
    glob = glob.at[SIN_R:SIN_R + N_BLK, :D_MODEL].set(sin_blk)
    return wmat, vec, glob


# --------------------------------- main ---------------------------------------
if __name__ == "__main__":
    key = jax.random.PRNGKey(0)
    pkey, dkey = jax.random.split(key)
    raw = init_params(pkey)
    wmat, vec, glob = pack_params(raw)
    src = jax.random.randint(dkey, (BATCH, SEQ), 0, VOCAB, dtype=jnp.int32)

    logits = transformer_lm(src, wmat, vec, glob)
    jax.block_until_ready(logits)
    assert logits.shape == (BATCH, SEQ, VOCAB)
    assert logits.dtype == jnp.float32
    assert bool(jnp.all(jnp.isfinite(logits)))
    print("KERNEL_OK")
</pallas_src>

<mosaic_0001>
module attributes {stable_mosaic.version = 11 : i64} {
  func.func @fused_transformer_kernel(%arg0: i32, %arg1: memref<64x1xi32, #tpu.memory_space<vmem>>, %arg2: memref<2x352x128xbf16, #tpu.memory_space<vmem>>, %arg3: memref<2x8x128xf32, #tpu.memory_space<vmem>>, %arg4: memref<232x128xf32, #tpu.memory_space<vmem>>, %arg5: memref<64x128xf32, #tpu.memory_space<vmem>>) attributes {dimension_semantics = [#tpu.dimension_semantics<parallel>], iteration_bounds = array<i64: 2>, scalar_prefetch = 0 : i64, scratch_operands = 0 : i64, tpu.core_type = #tpu.core_type<tc>, window_params = [{transform_indices = @transform_0, window_bounds = array<i64: 64, 1>}, {pipeline_mode = #tpu.pipeline_mode<synchronous>, transform_indices = @transform_1, window_bounds = array<i64: 2, 352, 128>}, {pipeline_mode = #tpu.pipeline_mode<synchronous>, transform_indices = @transform_2, window_bounds = array<i64: 2, 8, 128>}, {pipeline_mode = #tpu.pipeline_mode<synchronous>, transform_indices = @transform_3, window_bounds = array<i64: 232, 128>}, {transform_indices = @transform_4, window_bounds = array<i64: 64, 128>}]} {
    %c0 = arith.constant 0 : index
    %c0_0 = arith.constant 0 : index
    %0 = vector.load %arg1[%c0, %c0_0] : memref<64x1xi32, #tpu.memory_space<vmem>>, vector<64x1xi32>
    %1 = tpu.iota {dimensions = array<i32: 1>} : vector<64x64xi32>
    %2 = vector.broadcast %0 : vector<64x1xi32> to vector<64x64xi32>
    %3 = arith.cmpi eq, %2, %1 : vector<64x64xi32>
    %4 = arith.extui %3 : vector<64x64xi1> to vector<64x64xi32>
    %5 = arith.sitofp %4 : vector<64x64xi32> to vector<64x64xf32>
    %c0_1 = arith.constant 0 : index
    %c0_2 = arith.constant 0 : index
    %6 = vector.load %arg4[%c0_1, %c0_2] : memref<232x128xf32, #tpu.memory_space<vmem>>, vector<64x32xf32>
    %cst = arith.constant dense<0.000000e+00> : vector<64x32xf32>
    %7 = tpu.matmul %5, %6, %cst {dimension_numbers = #tpu.dot_dimension_numbers<[1], [0], [0], [1], [0, 0, 1, 1], [], []>} : vector<64x64xf32>, vector<64x32xf32>, vector<64x32xf32> -> vector<64x32xf32>
    %8 = tpu.iota {dimensions = array<i32: 0>} : vector<64x64xi32>
    %9 = tpu.iota {dimensions = array<i32: 1>} : vector<64x64xi32>
    %c0_i32 = arith.constant 0 : i32
    %10 = vector.broadcast %c0_i32 : i32 to vector<64x64xi32>
    %c0_i32_3 = arith.constant 0 : i32
    %11 = vector.broadcast %c0_i32_3 : i32 to vector<64x64xi32>
    %c8_i32 = arith.constant 8 : i32
    %12 = vector.broadcast %c8_i32 : i32 to vector<64x64xi32>
    %13 = arith.cmpi sge, %8, %12 : vector<64x64xi32>
    %14 = arith.extui %13 : vector<64x64xi1> to vector<64x64xi32>
    %15 = arith.addi %10, %14 : vector<64x64xi32>
    %c8_i32_4 = arith.constant 8 : i32
    %16 = vector.broadcast %c8_i32_4 : i32 to vector<64x64xi32>
    %17 = arith.cmpi sge, %9, %16 : vector<64x64xi32>
    %18 = arith.extui %17 : vector<64x64xi1> to vector<64x64xi32>
    %19 = arith.addi %11, %18 : vector<64x64xi32>
    %c16_i32 = arith.constant 16 : i32
    %20 = vector.broadcast %c16_i32 : i32 to vector<64x64xi32>
    %21 = arith.cmpi sge, %8, %20 : vector<64x64xi32>
    %22 = arith.extui %21 : vector<64x64xi1> to vector<64x64xi32>
    %23 = arith.addi %15, %22 : vector<64x64xi32>
    %c16_i32_5 = arith.constant 16 : i32
    %24 = vector.broadcast %c16_i32_5 : i32 to vector<64x64xi32>
    %25 = arith.cmpi sge, %9, %24 : vector<64x64xi32>
    %26 = arith.extui %25 : vector<64x64xi1> to vector<64x64xi32>
    %27 = arith.addi %19, %26 : vector<64x64xi32>
    %c24_i32 = arith.constant 24 : i32
    %28 = vector.broadcast %c24_i32 : i32 to vector<64x64xi32>
    %29 = arith.cmpi sge, %8, %28 : vector<64x64xi32>
    %30 = arith.extui %29 : vector<64x64xi1> to vector<64x64xi32>
    %31 = arith.addi %23, %30 : vector<64x64xi32>
    %c24_i32_6 = arith.constant 24 : i32
    %32 = vector.broadcast %c24_i32_6 : i32 to vector<64x64xi32>
    %33 = arith.cmpi sge, %9, %32 : vector<64x64xi32>
    %34 = arith.extui %33 : vector<64x64xi1> to vector<64x64xi32>
    %35 = arith.addi %27, %34 : vector<64x64xi32>
    %c32_i32 = arith.constant 32 : i32
    %36 = vector.broadcast %c32_i32 : i32 to vector<64x64xi32>
    %37 = arith.cmpi sge, %8, %36 : vector<64x64xi32>
    %38 = arith.extui %37 : vector<64x64xi1> to vector<64x64xi32>
    %39 = arith.addi %31, %38 : vector<64x64xi32>
    %c32_i32_7 = arith.constant 32 : i32
    %40 = vector.broadcast %c32_i32_7 : i32 to vector<64x64xi32>
    %41 = arith.cmpi sge, %9, %40 : vector<64x64xi32>
    %42 = arith.extui %41 : vector<64x64xi1> to vector<64x64xi32>
    %43 = arith.addi %35, %42 : vector<64x64xi32>
    %c40_i32 = arith.constant 40 : i32
    %44 = vector.broadcast %c40_i32 : i32 to vector<64x64xi32>
    %45 = arith.cmpi sge, %8, %44 : vector<64x64xi32>
    %46 = arith.extui %45 : vector<64x64xi1> to vector<64x64xi32>
    %47 = arith.addi %39, %46 : vector<64x64xi32>
    %c40_i32_8 = arith.constant 40 : i32
    %48 = vector.broadcast %c40_i32_8 : i32 to vector<64x64xi32>
    %49 = arith.cmpi sge, %9, %48 : vector<64x64xi32>
    %50 = arith.extui %49 : vector<64x64xi1> to vector<64x64xi32>
    %51 = arith.addi %43, %50 : vector<64x64xi32>
    %c48_i32 = arith.constant 48 : i32
    %52 = vector.broadcast %c48_i32 : i32 to vector<64x64xi32>
    %53 = arith.cmpi sge, %8, %52 : vector<64x64xi32>
    %54 = arith.extui %53 : vector<64x64xi1> to vector<64x64xi32>
    %55 = arith.addi %47, %54 : vector<64x64xi32>
    %c48_i32_9 = arith.constant 48 : i32
    %56 = vector.broadcast %c48_i32_9 : i32 to vector<64x64xi32>
    %57 = arith.cmpi sge, %9, %56 : vector<64x64xi32>
    %58 = arith.extui %57 : vector<64x64xi1> to vector<64x64xi32>
    %59 = arith.addi %51, %58 : vector<64x64xi32>
    %c56_i32 = arith.constant 56 : i32
    %60 = vector.broadcast %c56_i32 : i32 to vector<64x64xi32>
    %61 = arith.cmpi sge, %8, %60 : vector<64x64xi32>
    %62 = arith.extui %61 : vector<64x64xi1> to vector<64x64xi32>
    %63 = arith.addi %55, %62 : vector<64x64xi32>
    %c56_i32_10 = arith.constant 56 : i32
    %64 = vector.broadcast %c56_i32_10 : i32 to vector<64x64xi32>
    %65 = arith.cmpi sge, %9, %64 : vector<64x64xi32>
    %66 = arith.extui %65 : vector<64x64xi1> to vector<64x64xi32>
    %67 = arith.addi %59, %66 : vector<64x64xi32>
    %68 = arith.cmpi sge, %8, %9 : vector<64x64xi32>
    %69 = arith.cmpi eq, %63, %67 : vector<64x64xi32>
    %70 = arith.andi %68, %69 : vector<64x64xi1>
    %cst_11 = arith.constant 0.000000e+00 : f32
    %cst_12 = arith.constant -1.000000e+30 : f32
    %71 = vector.broadcast %cst_11 : f32 to vector<64x64xf32>
    %72 = vector.broadcast %cst_12 : f32 to vector<64x64xf32>
    %73 = arith.select %70, %71, %72 : vector<64x64xi1>, vector<64x64xf32>
    %74 = tpu.concatenate %73, %73, %73, %73 in 0 : vector<64x64xf32>, vector<64x64xf32>, vector<64x64xf32>, vector<64x64xf32> -> vector<256x64xf32>
    %75 = tpu.iota {dimensions = array<i32: 1>} : vector<1x32xi32>
    %c0_i32_13 = arith.constant 0 : i32
    %76 = vector.broadcast %c0_i32_13 : i32 to vector<1x32xi32>
    %77 = arith.cmpi sge, %75, %76 : vector<1x32xi32>
    %c8_i32_14 = arith.constant 8 : i32
    %78 = vector.broadcast %c8_i32_14 : i32 to vector<1x32xi32>
    %79 = arith.cmpi slt, %75, %78 : vector<1x32xi32>
    %80 = arith.andi %77, %79 : vector<1x32xi1>
    %81 = arith.extui %80 : vector<1x32xi1> to vector<1x32xi32>
    %82 = arith.sitofp %81 : vector<1x32xi32> to vector<1x32xf32>
    %83 = arith.truncf %82 : vector<1x32xf32> to vector<1x32xbf16>
    %c8_i32_15 = arith.constant 8 : i32
    %84 = vector.broadcast %c8_i32_15 : i32 to vector<1x32xi32>
    %85 = arith.cmpi sge, %75, %84 : vector<1x32xi32>
    %c16_i32_16 = arith.constant 16 : i32
    %86 = vector.broadcast %c16_i32_16 : i32 to vector<1x32xi32>
    %87 = arith.cmpi slt, %75, %86 : vector<1x32xi32>
    %88 = arith.andi %85, %87 : vector<1x32xi1>
    %89 = arith.extui %88 : vector<1x32xi1> to vector<1x32xi32>
    %90 = arith.sitofp %89 : vector<1x32xi32> to vector<1x32xf32>
    %91 = arith.truncf %90 : vector<1x32xf32> to vector<1x32xbf16>
    %c16_i32_17 = arith.constant 16 : i32
    %92 = vector.broadcast %c16_i32_17 : i32 to vector<1x32xi32>
    %93 = arith.cmpi sge, %75, %92 : vector<1x32xi32>
    %c24_i32_18 = arith.constant 24 : i32
    %94 = vector.broadcast %c24_i32_18 : i32 to vector<1x32xi32>
    %95 = arith.cmpi slt, %75, %94 : vector<1x32xi32>
    %96 = arith.andi %93, %95 : vector<1x32xi1>
    %97 = arith.extui %96 : vector<1x32xi1> to vector<1x32xi32>
    %98 = arith.sitofp %97 : vector<1x32xi32> to vector<1x32xf32>
    %99 = arith.truncf %98 : vector<1x32xf32> to vector<1x32xbf16>
    %c24_i32_19 = arith.constant 24 : i32
    %100 = vector.broadcast %c24_i32_19 : i32 to vector<1x32xi32>
    %101 = arith.cmpi sge, %75, %100 : vector<1x32xi32>
    %c32_i32_20 = arith.constant 32 : i32
    %102 = vector.broadcast %c32_i32_20 : i32 to vector<1x32xi32>
    %103 = arith.cmpi slt, %75, %102 : vector<1x32xi32>
    %104 = arith.andi %101, %103 : vector<1x32xi1>
    %105 = arith.extui %104 : vector<1x32xi1> to vector<1x32xi32>
    %106 = arith.sitofp %105 : vector<1x32xi32> to vector<1x32xf32>
    %107 = arith.truncf %106 : vector<1x32xf32> to vector<1x32xbf16>
    %c104 = arith.constant 104 : index
    %c0_21 = arith.constant 0 : index
    %108 = vector.load %arg4[%c104, %c0_21] : memref<232x128xf32, #tpu.memory_space<vmem>>, vector<64x32xf32>
    %c168 = arith.constant 168 : index
    %c0_22 = arith.constant 0 : index
    %109 = vector.load %arg4[%c168, %c0_22] : memref<232x128xf32, #tpu.memory_space<vmem>>, vector<64x32xf32>
    %c0_23 = arith.constant 0 : index
    %c0_24 = arith.constant 0 : index
    %c0_25 = arith.constant 0 : index
    %110 = vector.load %arg2[%c0_23, %c0_24, %c0_25] : memref<2x352x128xbf16, #tpu.memory_space<vmem>>, vector<1x32x32xbf16>
    %111 = vector.shape_cast %110 : vector<1x32x32xbf16> to vector<32x32xbf16>
    %c0_26 = arith.constant 0 : index
    %c32 = arith.constant 32 : index
    %c0_27 = arith.constant 0 : index
    %112 = vector.load %arg2[%c0_26, %c32, %c0_27] : memref<2x352x128xbf16, #tpu.memory_space<vmem>>, vector<1x32x32xbf16>
    %113 = vector.shape_cast %112 : vector<1x32x32xbf16> to vector<32x32xbf16>
    %c0_28 = arith.constant 0 : index
    %c64 = arith.constant 64 : index
    %c0_29 = arith.constant 0 : index
    %114 = vector.load %arg2[%c0_28, %c64, %c0_29] : memref<2x352x128xbf16, #tpu.memory_space<vmem>>, vector<1x32x32xbf16>
    %115 = vector.shape_cast %114 : vector<1x32x32xbf16> to vector<32x32xbf16>
    %c0_30 = arith.constant 0 : index
    %c96 = arith.constant 96 : index
    %c0_31 = arith.constant 0 : index
    %116 = vector.load %arg2[%c0_30, %c96, %c0_31] : memref<2x352x128xbf16, #tpu.memory_space<vmem>>, vector<1x32x32xbf16>
    %117 = vector.shape_cast %116 : vector<1x32x32xbf16> to vector<32x32xbf16>
    %c0_32 = arith.constant 0 : index
    %c128 = arith.constant 128 : index
    %c0_33 = arith.constant 0 : index
    %118 = vector.load %arg2[%c0_32, %c128, %c0_33] : memref<2x352x128xbf16, #tpu.memory_space<vmem>>, vector<1x32x32xbf16>
    %119 = vector.shape_cast %118 : vector<1x32x32xbf16> to vector<32x32xbf16>
    %c0_34 = arith.constant 0 : index
    %c160 = arith.constant 160 : index
    %c0_35 = arith.constant 0 : index
    %120 = vector.load %arg2[%c0_34, %c160, %c0_35] : memref<2x352x128xbf16, #tpu.memory_space<vmem>>, vector<1x32x32xbf16>
    %121 = vector.shape_cast %120 : vector<1x32x32xbf16> to vector<32x32xbf16>
    %c0_36 = arith.constant 0 : index
    %c192 = arith.constant 192 : index
    %c0_37 = arith.constant 0 : index
    %122 = vector.load %arg2[%c0_36, %c192, %c0_37] : memref<2x352x128xbf16, #tpu.memory_space<vmem>>, vector<1x32x128xbf16>
    %123 = vector.shape_cast %122 : vector<1x32x128xbf16> to vector<32x128xbf16>
    %c0_38 = arith.constant 0 : index
    %c224 = arith.constant 224 : index
    %c0_39 = arith.constant 0 : index
    %124 = vector.load %arg2[%c0_38, %c224, %c0_39] : memref<2x352x128xbf16, #tpu.memory_space<vmem>>, vector<1x128x32xbf16>
    %125 = vector.shape_cast %124 : vector<1x128x32xbf16> to vector<128x32xbf16>
    %c0_40 = arith.constant 0 : index
    %c0_41 = arith.constant 0 : index
    %c0_42 = arith.constant 0 : index
    %126 = vector.load %arg3[%c0_40, %c0_41, %c0_42] : memref<2x8x128xf32, #tpu.memory_space<vmem>>, vector<1x1x32xf32>
    %127 = vector.shape_cast %126 : vector<1x1x32xf32> to vector<1x32xf32>
    %c0_43 = arith.constant 0 : index
    %c1 = arith.constant 1 : index
    %c0_44 = arith.constant 0 : index
    %128 = vector.load %arg3[%c0_43, %c1, %c0_44] : memref<2x8x128xf32, #tpu.memory_space<vmem>>, vector<1x1x32xf32>
    %129 = vector.shape_cast %128 : vector<1x1x32xf32> to vector<1x32xf32>
    %c0_45 = arith.constant 0 : index
    %c2 = arith.constant 2 : index
    %c0_46 = arith.constant 0 : index
    %130 = vector.load %arg3[%c0_45, %c2, %c0_46] : memref<2x8x128xf32, #tpu.memory_space<vmem>>, vector<1x1x32xf32>
    %131 = vector.shape_cast %130 : vector<1x1x32xf32> to vector<1x32xf32>
    %c0_47 = arith.constant 0 : index
    %c3 = arith.constant 3 : index
    %c0_48 = arith.constant 0 : index
    %132 = vector.load %arg3[%c0_47, %c3, %c0_48] : memref<2x8x128xf32, #tpu.memory_space<vmem>>, vector<1x1x32xf32>
    %133 = vector.shape_cast %132 : vector<1x1x32xf32> to vector<1x32xf32>
    %c0_49 = arith.constant 0 : index
    %c4 = arith.constant 4 : index
    %c0_50 = arith.constant 0 : index
    %134 = vector.load %arg3[%c0_49, %c4, %c0_50] : memref<2x8x128xf32, #tpu.memory_space<vmem>>, vector<1x1x32xf32>
    %135 = vector.shape_cast %134 : vector<1x1x32xf32> to vector<1x32xf32>
    %c0_51 = arith.constant 0 : index
    %c5 = arith.constant 5 : index
    %c0_52 = arith.constant 0 : index
    %136 = vector.load %arg3[%c0_51, %c5, %c0_52] : memref<2x8x128xf32, #tpu.memory_space<vmem>>, vector<1x1x32xf32>
    %137 = vector.shape_cast %136 : vector<1x1x32xf32> to vector<1x32xf32>
    %c0_53 = arith.constant 0 : index
    %c6 = arith.constant 6 : index
    %c0_54 = arith.constant 0 : index
    %138 = vector.load %arg3[%c0_53, %c6, %c0_54] : memref<2x8x128xf32, #tpu.memory_space<vmem>>, vector<1x1x128xf32>
    %139 = vector.shape_cast %138 : vector<1x1x128xf32> to vector<1x128xf32>
    %cst_55 = arith.constant dense<0.000000e+00> : vector<64xf32>
    %140 = vector.multi_reduction <add>, %7, %cst_55 [1] : vector<64x32xf32> to vector<64xf32>
    %141 = vector.shape_cast %140 : vector<64xf32> to vector<64x1xf32>
    %cst_56 = arith.constant 3.200000e+01 : f32
    %142 = vector.broadcast %cst_56 : f32 to vector<64x1xf32>
    %143 = arith.divf %141, %142 : vector<64x1xf32>
    %144 = vector.broadcast %143 : vector<64x1xf32> to vector<64x32xf32>
    %145 = arith.subf %7, %144 : vector<64x32xf32>
    %146 = arith.mulf %145, %145 : vector<64x32xf32>
    %cst_57 = arith.constant dense<0.000000e+00> : vector<64xf32>
    %147 = vector.multi_reduction <add>, %146, %cst_57 [1] : vector<64x32xf32> to vector<64xf32>
    %148 = vector.shape_cast %147 : vector<64xf32> to vector<64x1xf32>
    %cst_58 = arith.constant 3.200000e+01 : f32
    %149 = vector.broadcast %cst_58 : f32 to vector<64x1xf32>
    %150 = arith.divf %148, %149 : vector<64x1xf32>
    %151 = vector.broadcast %143 : vector<64x1xf32> to vector<64x32xf32>
    %152 = arith.subf %7, %151 : vector<64x32xf32>
    %cst_59 = arith.constant 9.99999974E-6 : f32
    %153 = vector.broadcast %cst_59 : f32 to vector<64x1xf32>
    %154 = arith.addf %150, %153 : vector<64x1xf32>
    %155 = math.rsqrt %154 : vector<64x1xf32>
    %156 = vector.broadcast %155 : vector<64x1xf32> to vector<64x32xf32>
    %157 = arith.mulf %152, %156 : vector<64x32xf32>
    %158 = vector.broadcast %127 : vector<1x32xf32> to vector<64x32xf32>
    %159 = arith.mulf %157, %158 : vector<64x32xf32>
    %160 = vector.broadcast %129 : vector<1x32xf32> to vector<64x32xf32>
    %161 = arith.addf %159, %160 : vector<64x32xf32>
    %162 = arith.truncf %161 : vector<64x32xf32> to vector<64x32xbf16>
    %cst_60 = arith.constant dense<0.000000e+00> : vector<64x32xf32>
    %163 = tpu.matmul %162, %111, %cst_60 {dimension_numbers = #tpu.dot_dimension_numbers<[1], [0], [0], [1], [0, 0, 1, 1], [], []>} : vector<64x32xbf16>, vector<32x32xbf16>, vector<64x32xf32> -> vector<64x32xf32>
    %cst_61 = arith.constant dense<0.000000e+00> : vector<64x32xf32>
    %164 = tpu.matmul %162, %119, %cst_61 {dimension_numbers = #tpu.dot_dimension_numbers<[1], [0], [0], [1], [0, 0, 1, 1], [], []>} : vector<64x32xbf16>, vector<32x32xbf16>, vector<64x32xf32> -> vector<64x32xf32>
    %cst_62 = arith.constant dense<0.000000e+00> : vector<64x32xf32>
    %165 = tpu.matmul %162, %113, %cst_62 {dimension_numbers = #tpu.dot_dimension_numbers<[1], [0], [0], [1], [0, 0, 1, 1], [], []>} : vector<64x32xbf16>, vector<32x32xbf16>, vector<64x32xf32> -> vector<64x32xf32>
    %cst_63 = arith.constant dense<0.000000e+00> : vector<64x32xf32>
    %166 = tpu.matmul %162, %121, %cst_63 {dimension_numbers = #tpu.dot_dimension_numbers<[1], [0], [0], [1], [0, 0, 1, 1], [], []>} : vector<64x32xbf16>, vector<32x32xbf16>, vector<64x32xf32> -> vector<64x32xf32>
    %cst_64 = arith.constant dense<0.000000e+00> : vector<64x32xf32>
    %167 = tpu.matmul %162, %115, %cst_64 {dimension_numbers = #tpu.dot_dimension_numbers<[1], [0], [0], [1], [0, 0, 1, 1], [], []>} : vector<64x32xbf16>, vector<32x32xbf16>, vector<64x32xf32> -> vector<64x32xf32>
    %168 = arith.truncf %167 : vector<64x32xf32> to vector<64x32xbf16>
    %169 = arith.mulf %163, %108 : vector<64x32xf32>
    %170 = arith.mulf %164, %109 : vector<64x32xf32>
    %171 = arith.addf %169, %170 : vector<64x32xf32>
    %172 = arith.truncf %171 : vector<64x32xf32> to vector<64x32xbf16>
    %173 = arith.mulf %165, %108 : vector<64x32xf32>
    %174 = arith.mulf %166, %109 : vector<64x32xf32>
    %175 = arith.addf %173, %174 : vector<64x32xf32>
    %176 = arith.truncf %175 : vector<64x32xf32> to vector<64x32xbf16>
    %177 = vector.broadcast %83 : vector<1x32xbf16> to vector<64x32xbf16>
    %178 = arith.mulf %172, %177 : vector<64x32xbf16>
    %179 = vector.broadcast %91 : vector<1x32xbf16> to vector<64x32xbf16>
    %180 = arith.mulf %172, %179 : vector<64x32xbf16>
    %181 = vector.broadcast %99 : vector<1x32xbf16> to vector<64x32xbf16>
    %182 = arith.mulf %172, %181 : vector<64x32xbf16>
    %183 = vector.broadcast %107 : vector<1x32xbf16> to vector<64x32xbf16>
    %184 = arith.mulf %172, %183 : vector<64x32xbf16>
    %185 = tpu.concatenate %178, %180, %182, %184 in 0 : vector<64x32xbf16>, vector<64x32xbf16>, vector<64x32xbf16>, vector<64x32xbf16> -> vector<256x32xbf16>
    "tpu.trace_start"() <{level = 10 : i32, message = "id,jd->ij"}> : () -> ()
    %cst_65 = arith.constant dense<0.000000e+00> : vector<256x64xf32>
    %186 = tpu.matmul %185, %176, %cst_65 {dimension_numbers = #tpu.dot_dimension_numbers<[1], [1], [0], [0], [0, 0, 1, 0], [], []>} : vector<256x32xbf16>, vector<64x32xbf16>, vector<256x64xf32> -> vector<256x64xf32>
    "tpu.trace_stop"() : () -> ()
    %187 = arith.addf %186, %74 : vector<256x64xf32>
    %cst_66 = arith.constant dense<0xFF800000> : vector<256xf32>
    %188 = vector.multi_reduction <maximumf>, %187, %cst_66 [1] : vector<256x64xf32> to vector<256xf32>
    %189 = vector.shape_cast %188 : vector<256xf32> to vector<256x1xf32>
    %190 = vector.broadcast %189 : vector<256x1xf32> to vector<256x64xf32>
    %191 = arith.subf %187, %190 : vector<256x64xf32>
    %192 = math.exp %191 : vector<256x64xf32>
    %cst_67 = arith.constant dense<0.000000e+00> : vector<256xf32>
    %193 = vector.multi_reduction <add>, %192, %cst_67 [1] : vector<256x64xf32> to vector<256xf32>
    %194 = vector.shape_cast %193 : vector<256xf32> to vector<256x1xf32>
    %195 = tpu.reciprocal %194 {approx = true} : vector<256x1xf32> -> vector<256x1xf32>
    %196 = vector.broadcast %195 : vector<256x1xf32> to vector<256x64xf32>
    %197 = arith.mulf %192, %196 : vector<256x64xf32>
    %198 = arith.truncf %197 : vector<256x64xf32> to vector<256x64xbf16>
    %cst_68 = arith.constant 0.000000e+00 : f32
    %199 = vector.broadcast %cst_68 : f32 to vector<64x32xf32>
    %200 = vector.extract_strided_slice %198 {offsets = [0, 0], sizes = [64, 64], strides = [1, 1]} : vector<256x64xbf16> to vector<64x64xbf16>
    %201 = vector.broadcast %83 : vector<1x32xbf16> to vector<64x32xbf16>
    %202 = arith.mulf %168, %201 : vector<64x32xbf16>
    %cst_69 = arith.constant dense<0.000000e+00> : vector<64x32xf32>
    %203 = tpu.matmul %200, %202, %cst_69 {dimension_numbers = #tpu.dot_dimension_numbers<[1], [0], [0], [1], [0, 0, 1, 1], [], []>} : vector<64x64xbf16>, vector<64x32xbf16>, vector<64x32xf32> -> vector<64x32xf32>
    %204 = arith.addf %199, %203 : vector<64x32xf32>
    %205 = vector.extract_strided_slice %198 {offsets = [64, 0], sizes = [64, 64], strides = [1, 1]} : vector<256x64xbf16> to vector<64x64xbf16>
    %206 = vector.broadcast %91 : vector<1x32xbf16> to vector<64x32xbf16>
    %207 = arith.mulf %168, %206 : vector<64x32xbf16>
    %cst_70 = arith.constant dense<0.000000e+00> : vector<64x32xf32>
    %208 = tpu.matmul %205, %207, %cst_70 {dimension_numbers = #tpu.dot_dimension_numbers<[1], [0], [0], [1], [0, 0, 1, 1], [], []>} : vector<64x64xbf16>, vector<64x32xbf16>, vector<64x32xf32> -> vector<64x32xf32>
    %209 = arith.addf %204, %208 : vector<64x32xf32>
    %210 = vector.extract_strided_slice %198 {offsets = [128, 0], sizes = [64, 64], strides = [1, 1]} : vector<256x64xbf16> to vector<64x64xbf16>
    %211 = vector.broadcast %99 : vector<1x32xbf16> to vector<64x32xbf16>
    %212 = arith.mulf %168, %211 : vector<64x32xbf16>
    %cst_71 = arith.constant dense<0.000000e+00> : vector<64x32xf32>
    %213 = tpu.matmul %210, %212, %cst_71 {dimension_numbers = #tpu.dot_dimension_numbers<[1], [0], [0], [1], [0, 0, 1, 1], [], []>} : vector<64x64xbf16>, vector<64x32xbf16>, vector<64x32xf32> -> vector<64x32xf32>
    %214 = arith.addf %209, %213 : vector<64x32xf32>
    %215 = vector.extract_strided_slice %198 {offsets = [192, 0], sizes = [64, 64], strides = [1, 1]} : vector<256x64xbf16> to vector<64x64xbf16>
    %216 = vector.broadcast %107 : vector<1x32xbf16> to vector<64x32xbf16>
    %217 = arith.mulf %168, %216 : vector<64x32xbf16>
    %cst_72 = arith.constant dense<0.000000e+00> : vector<64x32xf32>
    %218 = tpu.matmul %215, %217, %cst_72 {dimension_numbers = #tpu.dot_dimension_numbers<[1], [0], [0], [1], [0, 0, 1, 1], [], []>} : vector<64x64xbf16>, vector<64x32xbf16>, vector<64x32xf32> -> vector<64x32xf32>
    %219 = arith.addf %214, %218 : vector<64x32xf32>
    %220 = arith.truncf %219 : vector<64x32xf32> to vector<64x32xbf16>
    %cst_73 = arith.constant dense<0.000000e+00> : vector<64x32xf32>
    %221 = tpu.matmul %220, %117, %cst_73 {dimension_numbers = #tpu.dot_dimension_numbers<[1], [0], [0], [1], [0, 0, 1, 1], [], []>} : vector<64x32xbf16>, vector<32x32xbf16>, vector<64x32xf32> -> vector<64x32xf32>
    %222 = vector.broadcast %131 : vector<1x32xf32> to vector<64x32xf32>
    %223 = arith.addf %221, %222 : vector<64x32xf32>
    %224 = arith.addf %7, %223 : vector<64x32xf32>
    %cst_74 = arith.constant dense<0.000000e+00> : vector<64xf32>
    %225 = vector.multi_reduction <add>, %224, %cst_74 [1] : vector<64x32xf32> to vector<64xf32>
    %226 = vector.shape_cast %225 : vector<64xf32> to vector<64x1xf32>
    %cst_75 = arith.constant 3.200000e+01 : f32
    %227 = vector.broadcast %cst_75 : f32 to vector<64x1xf32>
    %228 = arith.divf %226, %227 : vector<64x1xf32>
    %229 = vector.broadcast %228 : vector<64x1xf32> to vector<64x32xf32>
    %230 = arith.subf %224, %229 : vector<64x32xf32>
    %231 = arith.mulf %230, %230 : vector<64x32xf32>
    %cst_76 = arith.constant dense<0.000000e+00> : vector<64xf32>
    %232 = vector.multi_reduction <add>, %231, %cst_76 [1] : vector<64x32xf32> to vector<64xf32>
    %233 = vector.shape_cast %232 : vector<64xf32> to vector<64x1xf32>
    %cst_77 = arith.constant 3.200000e+01 : f32
    %234 = vector.broadcast %cst_77 : f32 to vector<64x1xf32>
    %235 = arith.divf %233, %234 : vector<64x1xf32>
    %236 = vector.broadcast %228 : vector<64x1xf32> to vector<64x32xf32>
    %237 = arith.subf %224, %236 : vector<64x32xf32>
    %cst_78 = arith.constant 9.99999974E-6 : f32
    %238 = vector.broadcast %cst_78 : f32 to vector<64x1xf32>
    %239 = arith.addf %235, %238 : vector<64x1xf32>
    %240 = math.rsqrt %239 : vector<64x1xf32>
    %241 = vector.broadcast %240 : vector<64x1xf32> to vector<64x32xf32>
    %242 = arith.mulf %237, %241 : vector<64x32xf32>
    %243 = vector.broadcast %133 : vector<1x32xf32> to vector<64x32xf32>
    %244 = arith.mulf %242, %243 : vector<64x32xf32>
    %245 = vector.broadcast %135 : vector<1x32xf32> to vector<64x32xf32>
    %246 = arith.addf %244, %245 : vector<64x32xf32>
    %247 = arith.truncf %246 : vector<64x32xf32> to vector<64x32xbf16>
    %cst_79 = arith.constant dense<0.000000e+00> : vector<64x128xf32>
    %248 = tpu.matmul %247, %123, %cst_79 {dimension_numbers = #tpu.dot_dimension_numbers<[1], [0], [0], [1], [0, 0, 1, 1], [], []>} : vector<64x32xbf16>, vector<32x128xbf16>, vector<64x128xf32> -> vector<64x128xf32>
    %249 = vector.broadcast %139 : vector<1x128xf32> to vector<64x128xf32>
    %250 = arith.addf %248, %249 : vector<64x128xf32>
    %cst_80 = arith.constant 5.000000e-01 : f32
    %251 = vector.broadcast %cst_80 : f32 to vector<64x128xf32>
    %252 = arith.mulf %251, %250 : vector<64x128xf32>
    %cst_81 = arith.constant 0.707106769 : f32
    %253 = vector.broadcast %cst_81 : f32 to vector<64x128xf32>
    %254 = arith.mulf %250, %253 : vector<64x128xf32>
    %255 = math.erf %254 : vector<64x128xf32>
    %cst_82 = arith.constant 1.000000e+00 : f32
    %256 = vector.broadcast %cst_82 : f32 to vector<64x128xf32>
    %257 = arith.addf %256, %255 : vector<64x128xf32>
    %258 = arith.mulf %252, %257 : vector<64x128xf32>
    %259 = arith.truncf %258 : vector<64x128xf32> to vector<64x128xbf16>
    %cst_83 = arith.constant dense<0.000000e+00> : vector<64x32xf32>
    %260 = tpu.matmul %259, %125, %cst_83 {dimension_numbers = #tpu.dot_dimension_numbers<[1], [0], [0], [1], [0, 0, 1, 1], [], []>} : vector<64x128xbf16>, vector<128x32xbf16>, vector<64x32xf32> -> vector<64x32xf32>
    %261 = vector.broadcast %137 : vector<1x32xf32> to vector<64x32xf32>
    %262 = arith.addf %260, %261 : vector<64x32xf32>
    %263 = arith.addf %224, %262 : vector<64x32xf32>
    %c1_84 = arith.constant 1 : index
    %c0_85 = arith.constant 0 : index
    %c0_86 = arith.constant 0 : index
    %264 = vector.load %arg2[%c1_84, %c0_85, %c0_86] : memref<2x352x128xbf16, #tpu.memory_space<vmem>>, vector<1x32x32xbf16>
    %265 = vector.shape_cast %264 : vector<1x32x32xbf16> to vector<32x32xbf16>
    %c1_87 = arith.constant 1 : index
    %c32_88 = arith.constant 32 : index
    %c0_89 = arith.constant 0 : index
    %266 = vector.load %arg2[%c1_87, %c32_88, %c0_89] : memref<2x352x128xbf16, #tpu.memory_space<vmem>>, vector<1x32x32xbf16>
    %267 = vector.shape_cast %266 : vector<1x32x32xbf16> to vector<32x32xbf16>
    %c1_90 = arith.constant 1 : index
    %c64_91 = arith.constant 64 : index
    %c0_92 = arith.constant 0 : index
    %268 = vector.load %arg2[%c1_90, %c64_91, %c0_92] : memref<2x352x128xbf16, #tpu.memory_space<vmem>>, vector<1x32x32xbf16>
    %269 = vector.shape_cast %268 : vector<1x32x32xbf16> to vector<32x32xbf16>
    %c1_93 = arith.constant 1 : index
    %c96_94 = arith.constant 96 : index
    %c0_95 = arith.constant 0 : index
    %270 = vector.load %arg2[%c1_93, %c96_94, %c0_95] : memref<2x352x128xbf16, #tpu.memory_space<vmem>>, vector<1x32x32xbf16>
    %271 = vector.shape_cast %270 : vector<1x32x32xbf16> to vector<32x32xbf16>
    %c1_96 = arith.constant 1 : index
    %c128_97 = arith.constant 128 : index
    %c0_98 = arith.constant 0 : index
    %272 = vector.load %arg2[%c1_96, %c128_97, %c0_98] : memref<2x352x128xbf16, #tpu.memory_space<vmem>>, vector<1x32x32xbf16>
    %273 = vector.shape_cast %272 : vector<1x32x32xbf16> to vector<32x32xbf16>
    %c1_99 = arith.constant 1 : index
    %c160_100 = arith.constant 160 : index
    %c0_101 = arith.constant 0 : index
    %274 = vector.load %arg2[%c1_99, %c160_100, %c0_101] : memref<2x352x128xbf16, #tpu.memory_space<vmem>>, vector<1x32x32xbf16>
    %275 = vector.shape_cast %274 : vector<1x32x32xbf16> to vector<32x32xbf16>
    %c1_102 = arith.constant 1 : index
    %c192_103 = arith.constant 192 : index
    %c0_104 = arith.constant 0 : index
    %276 = vector.load %arg2[%c1_102, %c192_103, %c0_104] : memref<2x352x128xbf16, #tpu.memory_space<vmem>>, vector<1x32x128xbf16>
    %277 = vector.shape_cast %276 : vector<1x32x128xbf16> to vector<32x128xbf16>
    %c1_105 = arith.constant 1 : index
    %c224_106 = arith.constant 224 : index
    %c0_107 = arith.constant 0 : index
    %278 = vector.load %arg2[%c1_105, %c224_106, %c0_107] : memref<2x352x128xbf16, #tpu.memory_space<vmem>>, vector<1x128x32xbf16>
    %279 = vector.shape_cast %278 : vector<1x128x32xbf16> to vector<128x32xbf16>
    %c1_108 = arith.constant 1 : index
    %c0_109 = arith.constant 0 : index
    %c0_110 = arith.constant 0 : index
    %280 = vector.load %arg3[%c1_108, %c0_109, %c0_110] : memref<2x8x128xf32, #tpu.memory_space<vmem>>, vector<1x1x32xf32>
    %281 = vector.shape_cast %280 : vector<1x1x32xf32> to vector<1x32xf32>
    %c1_111 = arith.constant 1 : index
    %c1_112 = arith.constant 1 : index
    %c0_113 = arith.constant 0 : index
    %282 = vector.load %arg3[%c1_111, %c1_112, %c0_113] : memref<2x8x128xf32, #tpu.memory_space<vmem>>, vector<1x1x32xf32>
    %283 = vector.shape_cast %282 : vector<1x1x32xf32> to vector<1x32xf32>
    %c1_114 = arith.constant 1 : index
    %c2_115 = arith.constant 2 : index
    %c0_116 = arith.constant 0 : index
    %284 = vector.load %arg3[%c1_114, %c2_115, %c0_116] : memref<2x8x128xf32, #tpu.memory_space<vmem>>, vector<1x1x32xf32>
    %285 = vector.shape_cast %284 : vector<1x1x32xf32> to vector<1x32xf32>
    %c1_117 = arith.constant 1 : index
    %c3_118 = arith.constant 3 : index
    %c0_119 = arith.constant 0 : index
    %286 = vector.load %arg3[%c1_117, %c3_118, %c0_119] : memref<2x8x128xf32, #tpu.memory_space<vmem>>, vector<1x1x32xf32>
    %287 = vector.shape_cast %286 : vector<1x1x32xf32> to vector<1x32xf32>
    %c1_120 = arith.constant 1 : index
    %c4_121 = arith.constant 4 : index
    %c0_122 = arith.constant 0 : index
    %288 = vector.load %arg3[%c1_120, %c4_121, %c0_122] : memref<2x8x128xf32, #tpu.memory_space<vmem>>, vector<1x1x32xf32>
    %289 = vector.shape_cast %288 : vector<1x1x32xf32> to vector<1x32xf32>
    %c1_123 = arith.constant 1 : index
    %c5_124 = arith.constant 5 : index
    %c0_125 = arith.constant 0 : index
    %290 = vector.load %arg3[%c1_123, %c5_124, %c0_125] : memref<2x8x128xf32, #tpu.memory_space<vmem>>, vector<1x1x32xf32>
    %291 = vector.shape_cast %290 : vector<1x1x32xf32> to vector<1x32xf32>
    %c1_126 = arith.constant 1 : index
    %c6_127 = arith.constant 6 : index
    %c0_128 = arith.constant 0 : index
    %292 = vector.load %arg3[%c1_126, %c6_127, %c0_128] : memref<2x8x128xf32, #tpu.memory_space<vmem>>, vector<1x1x128xf32>
    %293 = vector.shape_cast %292 : vector<1x1x128xf32> to vector<1x128xf32>
    %cst_129 = arith.constant dense<0.000000e+00> : vector<64xf32>
    %294 = vector.multi_reduction <add>, %263, %cst_129 [1] : vector<64x32xf32> to vector<64xf32>
    %295 = vector.shape_cast %294 : vector<64xf32> to vector<64x1xf32>
    %cst_130 = arith.constant 3.200000e+01 : f32
    %296 = vector.broadcast %cst_130 : f32 to vector<64x1xf32>
    %297 = arith.divf %295, %296 : vector<64x1xf32>
    %298 = vector.broadcast %297 : vector<64x1xf32> to vector<64x32xf32>
    %299 = arith.subf %263, %298 : vector<64x32xf32>
    %300 = arith.mulf %299, %299 : vector<64x32xf32>
    %cst_131 = arith.constant dense<0.000000e+00> : vector<64xf32>
    %301 = vector.multi_reduction <add>, %300, %cst_131 [1] : vector<64x32xf32> to vector<64xf32>
    %302 = vector.shape_cast %301 : vector<64xf32> to vector<64x1xf32>
    %cst_132 = arith.constant 3.200000e+01 : f32
    %303 = vector.broadcast %cst_132 : f32 to vector<64x1xf32>
    %304 = arith.divf %302, %303 : vector<64x1xf32>
    %305 = vector.broadcast %297 : vector<64x1xf32> to vector<64x32xf32>
    %306 = arith.subf %263, %305 : vector<64x32xf32>
    %cst_133 = arith.constant 9.99999974E-6 : f32
    %307 = vector.broadcast %cst_133 : f32 to vector<64x1xf32>
    %308 = arith.addf %304, %307 : vector<64x1xf32>
    %309 = math.rsqrt %308 : vector<64x1xf32>
    %310 = vector.broadcast %309 : vector<64x1xf32> to vector<64x32xf32>
    %311 = arith.mulf %306, %310 : vector<64x32xf32>
    %312 = vector.broadcast %281 : vector<1x32xf32> to vector<64x32xf32>
    %313 = arith.mulf %311, %312 : vector<64x32xf32>
    %314 = vector.broadcast %283 : vector<1x32xf32> to vector<64x32xf32>
    %315 = arith.addf %313, %314 : vector<64x32xf32>
    %316 = arith.truncf %315 : vector<64x32xf32> to vector<64x32xbf16>
    %cst_134 = arith.constant dense<0.000000e+00> : vector<64x32xf32>
    %317 = tpu.matmul %316, %265, %cst_134 {dimension_numbers = #tpu.dot_dimension_numbers<[1], [0], [0], [1], [0, 0, 1, 1], [], []>} : vector<64x32xbf16>, vector<32x32xbf16>, vector<64x32xf32> -> vector<64x32xf32>
    %cst_135 = arith.constant dense<0.000000e+00> : vector<64x32xf32>
    %318 = tpu.matmul %316, %273, %cst_135 {dimension_numbers = #tpu.dot_dimension_numbers<[1], [0], [0], [1], [0, 0, 1, 1], [], []>} : vector<64x32xbf16>, vector<32x32xbf16>, vector<64x32xf32> -> vector<64x32xf32>
    %cst_136 = arith.constant dense<0.000000e+00> : vector<64x32xf32>
    %319 = tpu.matmul %316, %267, %cst_136 {dimension_numbers = #tpu.dot_dimension_numbers<[1], [0], [0], [1], [0, 0, 1, 1], [], []>} : vector<64x32xbf16>, vector<32x32xbf16>, vector<64x32xf32> -> vector<64x32xf32>
    %cst_137 = arith.constant dense<0.000000e+00> : vector<64x32xf32>
    %320 = tpu.matmul %316, %275, %cst_137 {dimension_numbers = #tpu.dot_dimension_numbers<[1], [0], [0], [1], [0, 0, 1, 1], [], []>} : vector<64x32xbf16>, vector<32x32xbf16>, vector<64x32xf32> -> vector<64x32xf32>
    %cst_138 = arith.constant dense<0.000000e+00> : vector<64x32xf32>
    %321 = tpu.matmul %316, %269, %cst_138 {dimension_numbers = #tpu.dot_dimension_numbers<[1], [0], [0], [1], [0, 0, 1, 1], [], []>} : vector<64x32xbf16>, vector<32x32xbf16>, vector<64x32xf32> -> vector<64x32xf32>
    %322 = arith.truncf %321 : vector<64x32xf32> to vector<64x32xbf16>
    %323 = arith.mulf %317, %108 : vector<64x32xf32>
    %324 = arith.mulf %318, %109 : vector<64x32xf32>
    %325 = arith.addf %323, %324 : vector<64x32xf32>
    %326 = arith.truncf %325 : vector<64x32xf32> to vector<64x32xbf16>
    %327 = arith.mulf %319, %108 : vector<64x32xf32>
    %328 = arith.mulf %320, %109 : vector<64x32xf32>
    %329 = arith.addf %327, %328 : vector<64x32xf32>
    %330 = arith.truncf %329 : vector<64x32xf32> to vector<64x32xbf16>
    %331 = vector.broadcast %83 : vector<1x32xbf16> to vector<64x32xbf16>
    %332 = arith.mulf %326, %331 : vector<64x32xbf16>
    %333 = vector.broadcast %91 : vector<1x32xbf16> to vector<64x32xbf16>
    %334 = arith.mulf %326, %333 : vector<64x32xbf16>
    %335 = vector.broadcast %99 : vector<1x32xbf16> to vector<64x32xbf16>
    %336 = arith.mulf %326, %335 : vector<64x32xbf16>
    %337 = vector.broadcast %107 : vector<1x32xbf16> to vector<64x32xbf16>
    %338 = arith.mulf %326, %337 : vector<64x32xbf16>
    %339 = tpu.concatenate %332, %334, %336, %338 in 0 : vector<64x32xbf16>, vector<64x32xbf16>, vector<64x32xbf16>, vector<64x32xbf16> -> vector<256x32xbf16>
    "tpu.trace_start"() <{level = 10 : i32, message = "id,jd->ij"}> : () -> ()
    %cst_139 = arith.constant dense<0.000000e+00> : vector<256x64xf32>
    %340 = tpu.matmul %339, %330, %cst_139 {dimension_numbers = #tpu.dot_dimension_numbers<[1], [1], [0], [0], [0, 0, 1, 0], [], []>} : vector<256x32xbf16>, vector<64x32xbf16>, vector<256x64xf32> -> vector<256x64xf32>
    "tpu.trace_stop"() : () -> ()
    %341 = arith.addf %340, %74 : vector<256x64xf32>
    %cst_140 = arith.constant dense<0xFF800000> : vector<256xf32>
    %342 = vector.multi_reduction <maximumf>, %341, %cst_140 [1] : vector<256x64xf32> to vector<256xf32>
    %343 = vector.shape_cast %342 : vector<256xf32> to vector<256x1xf32>
    %344 = vector.broadcast %343 : vector<256x1xf32> to vector<256x64xf32>
    %345 = arith.subf %341, %344 : vector<256x64xf32>
    %346 = math.exp %345 : vector<256x64xf32>
    %cst_141 = arith.constant dense<0.000000e+00> : vector<256xf32>
    %347 = vector.multi_reduction <add>, %346, %cst_141 [1] : vector<256x64xf32> to vector<256xf32>
    %348 = vector.shape_cast %347 : vector<256xf32> to vector<256x1xf32>
    %349 = tpu.reciprocal %348 {approx = true} : vector<256x1xf32> -> vector<256x1xf32>
    %350 = vector.broadcast %349 : vector<256x1xf32> to vector<256x64xf32>
    %351 = arith.mulf %346, %350 : vector<256x64xf32>
    %352 = arith.truncf %351 : vector<256x64xf32> to vector<256x64xbf16>
    %cst_142 = arith.constant 0.000000e+00 : f32
    %353 = vector.broadcast %cst_142 : f32 to vector<64x32xf32>
    %354 = vector.extract_strided_slice %352 {offsets = [0, 0], sizes = [64, 64], strides = [1, 1]} : vector<256x64xbf16> to vector<64x64xbf16>
    %355 = vector.broadcast %83 : vector<1x32xbf16> to vector<64x32xbf16>
    %356 = arith.mulf %322, %355 : vector<64x32xbf16>
    %cst_143 = arith.constant dense<0.000000e+00> : vector<64x32xf32>
    %357 = tpu.matmul %354, %356, %cst_143 {dimension_numbers = #tpu.dot_dimension_numbers<[1], [0], [0], [1], [0, 0, 1, 1], [], []>} : vector<64x64xbf16>, vector<64x32xbf16>, vector<64x32xf32> -> vector<64x32xf32>
    %358 = arith.addf %353, %357 : vector<64x32xf32>
    %359 = vector.extract_strided_slice %352 {offsets = [64, 0], sizes = [64, 64], strides = [1, 1]} : vector<256x64xbf16> to vector<64x64xbf16>
    %360 = vector.broadcast %91 : vector<1x32xbf16> to vector<64x32xbf16>
    %361 = arith.mulf %322, %360 : vector<64x32xbf16>
    %cst_144 = arith.constant dense<0.000000e+00> : vector<64x32xf32>
    %362 = tpu.matmul %359, %361, %cst_144 {dimension_numbers = #tpu.dot_dimension_numbers<[1], [0], [0], [1], [0, 0, 1, 1], [], []>} : vector<64x64xbf16>, vector<64x32xbf16>, vector<64x32xf32> -> vector<64x32xf32>
    %363 = arith.addf %358, %362 : vector<64x32xf32>
    %364 = vector.extract_strided_slice %352 {offsets = [128, 0], sizes = [64, 64], strides = [1, 1]} : vector<256x64xbf16> to vector<64x64xbf16>
    %365 = vector.broadcast %99 : vector<1x32xbf16> to vector<64x32xbf16>
    %366 = arith.mulf %322, %365 : vector<64x32xbf16>
    %cst_145 = arith.constant dense<0.000000e+00> : vector<64x32xf32>
    %367 = tpu.matmul %364, %366, %cst_145 {dimension_numbers = #tpu.dot_dimension_numbers<[1], [0], [0], [1], [0, 0, 1, 1], [], []>} : vector<64x64xbf16>, vector<64x32xbf16>, vector<64x32xf32> -> vector<64x32xf32>
    %368 = arith.addf %363, %367 : vector<64x32xf32>
    %369 = vector.extract_strided_slice %352 {offsets = [192, 0], sizes = [64, 64], strides = [1, 1]} : vector<256x64xbf16> to vector<64x64xbf16>
    %370 = vector.broadcast %107 : vector<1x32xbf16> to vector<64x32xbf16>
    %371 = arith.mulf %322, %370 : vector<64x32xbf16>
    %cst_146 = arith.constant dense<0.000000e+00> : vector<64x32xf32>
    %372 = tpu.matmul %369, %371, %cst_146 {dimension_numbers = #tpu.dot_dimension_numbers<[1], [0], [0], [1], [0, 0, 1, 1], [], []>} : vector<64x64xbf16>, vector<64x32xbf16>, vector<64x32xf32> -> vector<64x32xf32>
    %373 = arith.addf %368, %372 : vector<64x32xf32>
    %374 = arith.truncf %373 : vector<64x32xf32> to vector<64x32xbf16>
    %cst_147 = arith.constant dense<0.000000e+00> : vector<64x32xf32>
    %375 = tpu.matmul %374, %271, %cst_147 {dimension_numbers = #tpu.dot_dimension_numbers<[1], [0], [0], [1], [0, 0, 1, 1], [], []>} : vector<64x32xbf16>, vector<32x32xbf16>, vector<64x32xf32> -> vector<64x32xf32>
    %376 = vector.broadcast %285 : vector<1x32xf32> to vector<64x32xf32>
    %377 = arith.addf %375, %376 : vector<64x32xf32>
    %378 = arith.addf %263, %377 : vector<64x32xf32>
    %cst_148 = arith.constant dense<0.000000e+00> : vector<64xf32>
    %379 = vector.multi_reduction <add>, %378, %cst_148 [1] : vector<64x32xf32> to vector<64xf32>
    %380 = vector.shape_cast %379 : vector<64xf32> to vector<64x1xf32>
    %cst_149 = arith.constant 3.200000e+01 : f32
    %381 = vector.broadcast %cst_149 : f32 to vector<64x1xf32>
    %382 = arith.divf %380, %381 : vector<64x1xf32>
    %383 = vector.broadcast %382 : vector<64x1xf32> to vector<64x32xf32>
    %384 = arith.subf %378, %383 : vector<64x32xf32>
    %385 = arith.mulf %384, %384 : vector<64x32xf32>
    %cst_150 = arith.constant dense<0.000000e+00> : vector<64xf32>
    %386 = vector.multi_reduction <add>, %385, %cst_150 [1] : vector<64x32xf32> to vector<64xf32>
    %387 = vector.shape_cast %386 : vector<64xf32> to vector<64x1xf32>
    %cst_151 = arith.constant 3.200000e+01 : f32
    %388 = vector.broadcast %cst_151 : f32 to vector<64x1xf32>
    %389 = arith.divf %387, %388 : vector<64x1xf32>
    %390 = vector.broadcast %382 : vector<64x1xf32> to vector<64x32xf32>
    %391 = arith.subf %378, %390 : vector<64x32xf32>
    %cst_152 = arith.constant 9.99999974E-6 : f32
    %392 = vector.broadcast %cst_152 : f32 to vector<64x1xf32>
    %393 = arith.addf %389, %392 : vector<64x1xf32>
    %394 = math.rsqrt %393 : vector<64x1xf32>
    %395 = vector.broadcast %394 : vector<64x1xf32> to vector<64x32xf32>
    %396 = arith.mulf %391, %395 : vector<64x32xf32>
    %397 = vector.broadcast %287 : vector<1x32xf32> to vector<64x32xf32>
    %398 = arith.mulf %396, %397 : vector<64x32xf32>
    %399 = vector.broadcast %289 : vector<1x32xf32> to vector<64x32xf32>
    %400 = arith.addf %398, %399 : vector<64x32xf32>
    %401 = arith.truncf %400 : vector<64x32xf32> to vector<64x32xbf16>
    %cst_153 = arith.constant dense<0.000000e+00> : vector<64x128xf32>
    %402 = tpu.matmul %401, %277, %cst_153 {dimension_numbers = #tpu.dot_dimension_numbers<[1], [0], [0], [1], [0, 0, 1, 1], [], []>} : vector<64x32xbf16>, vector<32x128xbf16>, vector<64x128xf32> -> vector<64x128xf32>
    %403 = vector.broadcast %293 : vector<1x128xf32> to vector<64x128xf32>
    %404 = arith.addf %402, %403 : vector<64x128xf32>
    %cst_154 = arith.constant 5.000000e-01 : f32
    %405 = vector.broadcast %cst_154 : f32 to vector<64x128xf32>
    %406 = arith.mulf %405, %404 : vector<64x128xf32>
    %cst_155 = arith.constant 0.707106769 : f32
    %407 = vector.broadcast %cst_155 : f32 to vector<64x128xf32>
    %408 = arith.mulf %404, %407 : vector<64x128xf32>
    %409 = math.erf %408 : vector<64x128xf32>
    %cst_156 = arith.constant 1.000000e+00 : f32
    %410 = vector.broadcast %cst_156 : f32 to vector<64x128xf32>
    %411 = arith.addf %410, %409 : vector<64x128xf32>
    %412 = arith.mulf %406, %411 : vector<64x128xf32>
    %413 = arith.truncf %412 : vector<64x128xf32> to vector<64x128xbf16>
    %cst_157 = arith.constant dense<0.000000e+00> : vector<64x32xf32>
    %414 = tpu.matmul %413, %279, %cst_157 {dimension_numbers = #tpu.dot_dimension_numbers<[1], [0], [0], [1], [0, 0, 1, 1], [], []>} : vector<64x128xbf16>, vector<128x32xbf16>, vector<64x32xf32> -> vector<64x32xf32>
    %415 = vector.broadcast %291 : vector<1x32xf32> to vector<64x32xf32>
    %416 = arith.addf %414, %415 : vector<64x32xf32>
    %417 = arith.addf %378, %416 : vector<64x32xf32>
    %c96_158 = arith.constant 96 : index
    %c0_159 = arith.constant 0 : index
    %418 = vector.load %arg4[%c96_158, %c0_159] : memref<232x128xf32, #tpu.memory_space<vmem>>, vector<1x32xf32>
    %c97 = arith.constant 97 : index
    %c0_160 = arith.constant 0 : index
    %419 = vector.load %arg4[%c97, %c0_160] : memref<232x128xf32, #tpu.memory_space<vmem>>, vector<1x32xf32>
    %cst_161 = arith.constant dense<0.000000e+00> : vector<64xf32>
    %420 = vector.multi_reduction <add>, %417, %cst_161 [1] : vector<64x32xf32> to vector<64xf32>
    %421 = vector.shape_cast %420 : vector<64xf32> to vector<64x1xf32>
    %cst_162 = arith.constant 3.200000e+01 : f32
    %422 = vector.broadcast %cst_162 : f32 to vector<64x1xf32>
    %423 = arith.divf %421, %422 : vector<64x1xf32>
    %424 = vector.broadcast %423 : vector<64x1xf32> to vector<64x32xf32>
    %425 = arith.subf %417, %424 : vector<64x32xf32>
    %426 = arith.mulf %425, %425 : vector<64x32xf32>
    %cst_163 = arith.constant dense<0.000000e+00> : vector<64xf32>
    %427 = vector.multi_reduction <add>, %426, %cst_163 [1] : vector<64x32xf32> to vector<64xf32>
    %428 = vector.shape_cast %427 : vector<64xf32> to vector<64x1xf32>
    %cst_164 = arith.constant 3.200000e+01 : f32
    %429 = vector.broadcast %cst_164 : f32 to vector<64x1xf32>
    %430 = arith.divf %428, %429 : vector<64x1xf32>
    %431 = vector.broadcast %423 : vector<64x1xf32> to vector<64x32xf32>
    %432 = arith.subf %417, %431 : vector<64x32xf32>
    %cst_165 = arith.constant 9.99999974E-6 : f32
    %433 = vector.broadcast %cst_165 : f32 to vector<64x1xf32>
    %434 = arith.addf %430, %433 : vector<64x1xf32>
    %435 = math.rsqrt %434 : vector<64x1xf32>
    %436 = vector.broadcast %435 : vector<64x1xf32> to vector<64x32xf32>
    %437 = arith.mulf %432, %436 : vector<64x32xf32>
    %438 = vector.broadcast %418 : vector<1x32xf32> to vector<64x32xf32>
    %439 = arith.mulf %437, %438 : vector<64x32xf32>
    %440 = vector.broadcast %419 : vector<1x32xf32> to vector<64x32xf32>
    %441 = arith.addf %439, %440 : vector<64x32xf32>
    %442 = arith.truncf %441 : vector<64x32xf32> to vector<64x32xbf16>
    %c64_166 = arith.constant 64 : index
    %c0_167 = arith.constant 0 : index
    %443 = vector.load %arg4[%c64_166, %c0_167] : memref<232x128xf32, #tpu.memory_space<vmem>>, vector<32x128xf32>
    %444 = arith.truncf %443 : vector<32x128xf32> to vector<32x128xbf16>
    %cst_168 = arith.constant dense<0.000000e+00> : vector<64x128xf32>
    %445 = tpu.matmul %442, %444, %cst_168 {dimension_numbers = #tpu.dot_dimension_numbers<[1], [0], [0], [1], [0, 0, 1, 1], [], []>} : vector<64x32xbf16>, vector<32x128xbf16>, vector<64x128xf32> -> vector<64x128xf32>
    %c0_169 = arith.constant 0 : index
    %c0_170 = arith.constant 0 : index
    %446 = vector.load %arg5[%c0_169, %c0_170] : memref<64x128xf32, #tpu.memory_space<vmem>>, vector<64x128xf32>
    tpu.vector_store %arg5[%c0_169, %c0_170], %445 {strides = array<i32>} : memref<64x128xf32, #tpu.memory_space<vmem>>, vector<64x128xf32>,
    return
  }
  func.func @transform_0(%arg0: i32) -> (i32, i32) {
    %c0_i32 = arith.constant 0 : i32
    %c0_i32_0 = arith.constant 0 : i32
    return %arg0, %c0_i32 : i32, i32
  }
  func.func @transform_1(%arg0: i32) -> (i32, i32, i32) {
    %c0_i32 = arith.constant 0 : i32
    %c0_i32_0 = arith.constant 0 : i32
    %c0_i32_1 = arith.constant 0 : i32
    %c0_i32_2 = arith.constant 0 : i32
    return %c0_i32, %c0_i32_0, %c0_i32_1 : i32, i32, i32
  }
  func.func @transform_2(%arg0: i32) -> (i32, i32, i32) {
    %c0_i32 = arith.constant 0 : i32
    %c0_i32_0 = arith.constant 0 : i32
    %c0_i32_1 = arith.constant 0 : i32
    %c0_i32_2 = arith.constant 0 : i32
    return %c0_i32, %c0_i32_0, %c0_i32_1 : i32, i32, i32
  }
  func.func @transform_3(%arg0: i32) -> (i32, i32) {
    %c0_i32 = arith.constant 0 : i32
    %c0_i32_0 = arith.constant 0 : i32
    %c0_i32_1 = arith.constant 0 : i32
    return %c0_i32, %c0_i32_0 : i32, i32
  }
  func.func @transform_4(%arg0: i32) -> (i32, i32) {
    %c0_i32 = arith.constant 0 : i32
    %c0_i32_0 = arith.constant 0 : i32
    return %arg0, %c0_i32 : i32, i32
  }
}

</mosaic_0001>

<bundles_post_ra>
// kernel: transformer_lm.1
= control target key start
LH: loop header
LB: loop body
LE: loop exit
PB: predicated region body
PF: predicated region fallthrough
CT: control target
= control target key end

     0   :  { %9 = vsyncpa [#allocation3], 0  ;;  %s8626_s0 = inlined_call_operand.vmem [shape: s32[128,1], index: 0, kind: input, shape index: {}]   ;;  %s8627_s1 = inlined_call_operand.hbm [shape: bf16[2,352,128], index: 1, kind: input, shape index: {}]   ;;  %s8628_s2 = inlined_call_operand.vmem [shape: f32[2,8,128], index: 2, kind: input, shape index: {}]   ;;  %s8629_s3 = inlined_call_operand.hbm [shape: f32[232,128], index: 3, kind: input, shape index: {}]   ;;  %s8630_s4 = inlined_call_operand.vmem [shape: f32[128,128], index: 4, kind: output, shape index: {}]  }
   0x1   :  { %10 = vsyncpa [#allocation5], 0  ;;  %s6737_s15 = smov 0  }
   0x2 LB: > { %s6703_s16 = smov [#allocation2]   ;;  %s5161_s18 = sadd.s32 4294967295, %s6701_s15   ;;  %s6701_s15 = sphi %s6737_s15, %s16_s15  }
   0x3   : > { %s148_s17 = sshll.u32 %s6703_s16, 4  ;;  %p5163_p0 = scmp.ge.s32.totalorder %s6701_s15, 1  ;;  %s149_s17 = int_to_ptr.vmem [resolvable:$true] %s148_s17 }
   0x4   : > { %p136_p1 = scmp.lt.s32.totalorder %s6701_s15, 3  ;;  %p6751_p3 = scmp.eq.s32.totalorder %s5161_s18, 0 }
   0x5   : > { %s6704_s21 = smov [#allocation4]   ;;  %s6631_s26 = scalar_lea.hbm %s8627_s1, 5632 }
   0x6   : > { %p6745_p2 = pnand %p5163_p0, %p136_p1  ;;  %s164_s22 = sshll.u32 %s6704_s21, 4  ;;  %s6763_s22 = int_to_ptr.vmem [resolvable:$true] %s164_s22 }
   0x7   : > { %s8652_s20 = scalar_select %p6751_p3, 1, 0 }
   0x8   : > { %s8651_s19 = scalar_select %p6745_p2, 1, 0 }
   0x9   : > { %p6173_p4 = pneg %p6745_p2  ;;  %p6632_p6 = scmp.ne.s32.totalorder %s8627_s1, %s6631_s26 }
   0xa   : > { %p6638_p10 = scmp.lt.u32.totalorder %s6631_s26, %s8627_s1 }
   0xb   : > { %p6759_p5 = pnand %p6751_p3, %p6173_p4 }
   0xd   : > { %p6633_p7 = pneg %p6759_p5 }
   0xf   : > { %p6634_p8 = pnand %p6633_p7, %p6632_p6 }
  0x11   : > { %p6635_p9 = pneg %p6634_p8 }
  0x13   : > { %p6640_p11 = pnand %p6638_p10, %p6635_p9 }
  0x15   : > { %6643 = shalt.err (!%p6640_p11)
}
  0x16   : > { %s6644_s5 = scalar_lea.vmem %s149_s17, 5632  ;;  %p6652_p1 = scmp.lt.s32.totalorder %s149_s17, %s149_s17 }
  0x17   : > { %p6645_p12 = scmp.ne.s32.totalorder %s149_s17, %s6644_s5  ;;  %p6653_p4 = scmp.lt.s32.totalorder %s6644_s5, %s6644_s5 }
  0x19   : > { %p6647_p13 = pnand %p6645_p12, %p6633_p7  ;;  %p6654_p3 = por %p6653_p4, %p6652_p1 }
  0x1b   : > { %p6648_p0 = pneg %p6647_p13 }
  0x1d   : > { %p6655_p2 = pnand %p6654_p3, %p6648_p0 }
  0x1f   : > { %6658 = shalt.err (!%p6655_p2)
}
  0x20   : > { %s6705_s6 = smov 64   ;;  %s6706_s7 = smov 4  }
  0x21   : > { %6176 = dma.hbm_to_vmem [thread:$0]  (!%p6759_p5), %s8627_s1, 5632, %s149_s17, [#allocation3], %s6705_s6, %s6705_s6, %s6706_s7  }
  0x22   : > { %s6659_s12 = scalar_lea.hbm %s8629_s3, 3712 }
  0x23   : > { %p6660_p6 = scmp.ne.s32.totalorder %s8629_s3, %s6659_s12  ;;  %p6666_p8 = scmp.lt.u32.totalorder %s6659_s12, %s8629_s3 }
  0x25   : > { %p6662_p2 = pnand %p6660_p6, %p6633_p7 }
  0x27   : > { %p6663_p3 = pneg %p6662_p2 }
  0x29   : > { %p6668_p9 = pnand %p6666_p8, %p6663_p3 }
  0x2b   : > { %6671 = shalt.err (!%p6668_p9)
}
  0x2c   : > { %s6672_s17 = scalar_lea.vmem %s6763_s22, 3712  ;;  %p6680_p13 = scmp.lt.s32.totalorder %s6763_s22, %s6763_s22 }
  0x2d   : > { %p6673_p10 = scmp.ne.s32.totalorder %s6763_s22, %s6672_s17  ;;  %p6681_p0 = scmp.lt.s32.totalorder %s6672_s17, %s6672_s17 }
  0x2f   : > { %p6675_p11 = pnand %p6673_p10, %p6633_p7  ;;  %p6682_p1 = por %p6681_p0, %p6680_p13 }
  0x31   : > { %p6676_p12 = pneg %p6675_p11 }
  0x33   : > { %p6683_p4 = pnand %p6682_p1, %p6676_p12 }
  0x35   : > { %6686 = shalt.err (!%p6683_p4)
}
  0x36   : > { %s6707_s24 = smov 128   ;;  %s6708_s25 = smov 8  }
  0x37   : > { %6179 = dma.hbm_to_vmem [thread:$0]  (!%p6759_p5), %s8629_s3, 3712, %s6763_s22, [#allocation5], %s6707_s24, %s6707_s24, %s6708_s25  }
  0x38   : > { %p8654_p6 = scmp.ne.s32.totalorder %s8651_s19, 0 }
  0x3a   : > { %189 = sbr.rel (%p8654_p6) target bundleno = 5806 (0x16ae), region = 36 }
  0x41   : > { %p8655_p7 = scmp.ne.s32.totalorder %s8652_s20, 0 }
  0x43   : > { %6692 = dma.done.wait (%p8655_p7), [#allocation3], 5632  }
  0x44   : > { %6694 = vsyncadd (%p8655_p7), [#allocation3], 4294961664 }
  0x45   : > { %6696 = dma.done.wait (%p8655_p7), [#allocation5], 3712  }
  0x46   : > { %6698 = vsyncadd (%p8655_p7), [#allocation5], 4294963584  ;;  %s5170_s23 = sshll.u32 %s5161_s18, 3  ;;  %v6709_v0 = vmov 0   ;;  %v290_v5 = vld [vmem:[#allocation4] sm:$0xff]  ;;  %v291_v6 = vld [vmem:[#allocation4 + $0x8] sm:$0xff]  ;;  %v8634_v21 = vlaneseq }
  0x47   : > { %6202 = vset.pattern.permute.xlu1 %v6709_v0  ;;  %6201 = vset.pattern.permute.xlu0 %v6709_v0  ;;  %p220_p5 = scmp.lt.s32.totalorder %s5170_s23, 15  ;;  %v292_v7 = vld [vmem:[#allocation4 + $0x10] sm:$0xff]  ;;  %v293_v8 = vld [vmem:[#allocation4 + $0x18] sm:$0xff]  ;;  %v6093_v9 = vpack.c.bf16 %v291_v6, %v290_v5  ;;  %v294_v12 = vld [vmem:[#allocation4 + $0x20] sm:$0xff]  ;;  %vm298_vm0 = vcmask 523264   ;;  %v6710_v25 = vmov 0.0  }
  0x48   : > { %v6097_v10 = vpack.c.bf16 %v293_v8, %v292_v7  ;;  %v295_v13 = vld [vmem:[#allocation4 + $0x28] sm:$0xff]  ;;  %v296_v15 = vld [vmem:[#allocation4 + $0x30] sm:$0xff]  ;;  %v297_v16 = vld [vmem:[#allocation4 + $0x38] sm:$0xff]  ;;  %v6835_v22 = vand.u32 127, %v8634_v21  ;;  %vm737_vm9 = vcmask 261120  }
  0x49   : > { %s8674_s23 = smov (!%p220_p5, %s5170_s23), 15  ;;  %6094 = vmatprep.subr.bf16.mxu0 %v6093_v9  ;;  %v6101_v19 = vpack.c.bf16 %v295_v13, %v294_v12  ;;  %v6105_v20 = vpack.c.bf16 %v297_v16, %v296_v15 }
  0x4a   : > { %s5171_s19 = sshll.u32 %s8674_s23, 3  ;;  %6096 = vmatpush3.bf16.msra.mxu0 %v6093_v9  ;;  %vm453_vm10 = vcmp.ge.s32.totalorder %v6835_v22, 8  ;;  %vm655_vm11 = vcmp.lt.s32.totalorder %v6835_v22, 16  ;;  %vm650_vm13 = vcmp.lt.s32.totalorder %v6835_v22, 8  ;;  %vm479_vm14 = vcmp.ge.s32.totalorder %v6835_v22, 16 }
  0x4b   : > { %s223_s20 = scalar_lea.vmem %s8626_s0, %s5171_s19  ;;  %6098 = vmatprep.subr.bf16.mxu0 %v6097_v10  ;;  %vm656_vm12 = vmand %vm453_vm10, %vm655_vm11  ;;  %vm660_vm15 = vcmp.lt.s32.totalorder %v6835_v22, 24  ;;  %s229_s9 = scalar_lea.vmem %s8630_s4, %s5171_s19 }
  0x4c   : > { %v234_v1 = vld [vmem:[%s223_s20 + $0x10] sm:$0xff]  ;;  %v232_v2 = vld [vmem:[%s223_s20] sm:$0xff]  ;;  %v235_v3 = vld [vmem:[%s223_s20 + $0x18] sm:$0xff] }
  0x4d   : > { %249 = vperm.xlu1 %6202, %v234_v1   ;;  %243 = vperm.xlu0 %6201, %v232_v2   ;;  %v233_v4 = vld [vmem:[%s223_s20 + $0x8] sm:$0xff]  ;;  %v236_v14 = vld [vmem:[%s223_s20 + $0x20] sm:$0xff]  ;;  %v239_v17 = vld [vmem:[%s223_s20 + $0x38] sm:$0xff] }
  0x4e   : > { %v237_v11 = vld [vmem:[%s223_s20 + $0x28] sm:$0xff]  ;;  %v238_v18 = vld [vmem:[%s223_s20 + $0x30] sm:$0xff]  ;;  %6100 = vmatpush3.bf16.msra.mxu0 %v6097_v10 }
  0x4f   : > { %6102 = vmatprep.subr.bf16.mxu0 %v6101_v19 }
  0x51   : > { %252 = vperm.xlu1 %6202, %v235_v3   ;;  %246 = vperm.xlu0 %6201, %v233_v4  }
  0x52   : > { %6104 = vmatpush3.bf16.msra.mxu0 %v6101_v19 }
  0x53   : > { %6106 = vmatprep.subr.bf16.mxu0 %v6105_v20 }
  0x55   : > { %258 = vperm.xlu1 %6202, %v237_v11   ;;  %255 = vperm.xlu0 %6201, %v236_v14  }
  0x56   : > { %6108 = vmatpush3.bf16.msra.mxu0 %v6105_v20 }
  0x59   : > { %264 = vperm.xlu1 %6202, %v239_v17   ;;  %261 = vperm.xlu0 %6201, %v238_v18  }
  0xcc   : > { %v250_v23 = vpop.permute.xlu1 %249  ;;  %v244_v24 = vpop.permute.xlu0 %243 }
  0xcd   : > { %vm266_vm1 = vcmp.eq.s32.totalorder %v244_v24, %v6835_v22  ;;  %vm268_vm2 = vcmp.eq.s32.totalorder %v250_v23, %v6835_v22 }
  0xce   : > { %v5174_v26 = vsel %vm266_vm1, 1.0, %v6710_v25  ;;  %v5176_v29 = vsel %vm268_vm2, 1.0, %v6710_v25  ;;  %vm661_vm1 = vmand %vm479_vm14, %vm660_vm15  ;;  %vm506_vm2 = vcmp.ge.s32.totalorder %v6835_v22, 24 }
  0xcf   : > { %5645 = vmatprep.mubr.msk.f32.mxu0 %vm298_vm0, %v5174_v26 }
  0xd0   : > { %v253_v27 = vpop.permute.xlu1 %252  ;;  %v247_v28 = vpop.permute.xlu0 %246 }
  0xd1   : > { %vm267_vm3 = vcmp.eq.s32.totalorder %v247_v28, %v6835_v22  ;;  %vm269_vm4 = vcmp.eq.s32.totalorder %v253_v27, %v6835_v22 }
  0xd2   : > { %v5175_v30 = vsel %vm267_vm3, 1.0, %v6710_v25  ;;  %v5177_v33 = vsel %vm269_vm4, 1.0, %v6710_v25  ;;  %vm665_vm3 = vcmp.lt.s32.totalorder %v6835_v22, 32 }
  0xd3   : > { %5646 = vmatmul.mubr.msk.f32.vlgmr.msra.gmra.mrb[0].mxu0 %vm298_vm0, %v5175_v30  ;;  %vm666_vm4 = vmand %vm506_vm2, %vm665_vm3 }
  0xd4   : > { %v259_v31 = vpop.permute.xlu1 %258  ;;  %5648 = vmatprep.mubr.msk.f32.mxu0 %vm298_vm0, %v5176_v29  ;;  %v256_v32 = vpop.permute.xlu0 %255 }
  0xd5   : > { %vm270_vm5 = vcmp.eq.s32.totalorder %v256_v32, %v6835_v22  ;;  %vm271_vm6 = vcmp.eq.s32.totalorder %v259_v31, %v6835_v22 }
  0xd6   : > { %v5178_v34 = vsel %vm270_vm5, 1.0, %v6710_v25  ;;  %v5179_v37 = vsel %vm271_vm6, 1.0, %v6710_v25  ;;  %vm533_vm5 = vcmp.ge.s32.totalorder %v6835_v22, 32  ;;  %vm560_vm6 = vcmp.ge.s32.totalorder %v6835_v22, 40 }
  0xd7   : > { %5649 = vmatmul.mubr.msk.f32.gmra.mrb[2].mxu0 %vm298_vm0, %v5177_v33 }
  0xd8   : > { %v265_v35 = vpop.permute.xlu1 %264  ;;  %5651 = vmatprep.mubr.msk.f32.mxu0 %vm298_vm0, %v5178_v34  ;;  %v262_v36 = vpop.permute.xlu0 %261 }
  0xd9   : > { %vm272_vm7 = vcmp.eq.s32.totalorder %v262_v36, %v6835_v22  ;;  %vm273_vm8 = vcmp.eq.s32.totalorder %v265_v35, %v6835_v22  ;;  %v6203_v36 = vld [vmem:[#allocation2] sm:$0xff]  }
  0xda   : > { %v5180_v38 = vsel %vm272_vm7, 1.0, %v6710_v25  ;;  %v5181_v39 = vsel %vm273_vm8, 1.0, %v6710_v25  ;;  %5657 = vmatprep.subr.bf16.mxu1 %v6203_v36  ;;  %vm587_vm7 = vcmp.ge.s32.totalorder %v6835_v22, 48  ;;  %vm614_vm8 = vcmp.ge.s32.totalorder %v6835_v22, 56 }
  0xdb   : > { %5652 = vmatmul.mubr.msk.f32.gmra.mrb[4].mxu0 %vm298_vm0, %v5179_v37  ;;  %v6204_v37 = vld [vmem:[#allocation2 + $0x10] sm:$0xff]   ;;  %5658 = vmatpush3.bf16.msra.mxu1 %v6203_v36 }
  0xdc   : > { %5654 = vmatprep.mubr.msk.f32.mxu0 %vm298_vm0, %v5180_v38  ;;  %5681 = vmatprep.subr.bf16.mxu0 %v6204_v37  ;;  %v6205_v38 = vld [vmem:[#allocation2 + $0x8] sm:$0xff]  }
  0xdd   : > { %5682 = vmatpush3.bf16.msra.mxu0 %v6204_v37  ;;  %5659 = vmatprep.subr.bf16.mxu1 %v6205_v38 }
  0xdf   : > { %5655 = vmatmul.mubr.msk.f32.gmra.mrb[6].mxu0 %vm298_vm0, %v5181_v39  ;;  %v6206_v39 = vld [vmem:[#allocation2 + $0x18] sm:$0xff]   ;;  %5660 = vmatpush3.bf16.msra.mxu1 %v6205_v38 }
  0xe0   : > { %5683 = vmatprep.subr.bf16.mxu0 %v6206_v39 }
  0xe1   : > { %5684 = vmatpush3.bf16.msra.mxu0 %v6206_v39 }
 0x1a6   : > { %v6861_v40 = vpop.f32.mrb[0].mxu0 }
 0x1a7   : > { %v6863_v41 = vpop.f32.mrb[1].mxu0  ;;  %v741_v42 = vsel %vm737_vm9, %v6861_v40, 0.0 }
 0x1a8   : > { %742 = vadd.xlane.f32.xlu1 %v741_v42  ;;  %v738_v43 = vsel %vm737_vm9, %v6863_v41, 0.0  ;;  %v6941_v42 = vld [vmem:[#allocation2 + $0x40] sm:$0xff]  }
 0x1a9   : > { %739 = vadd.xlane.f32.xlu0 %v738_v43  ;;  %5669 = vmatprep.subr.bf16.mxu1 %v6941_v42  ;;  %v6944_v43 = vld [vmem:[#allocation2 + $0x20] sm:$0xff]  }
 0x1aa   : > { %v6869_v44 = vpop.f32.mrb[2].mxu0  ;;  %5705 = vmatprep.subr.bf16.mxu0 %v6944_v43 }
 0x1ab   : > { %v6871_v45 = vpop.f32.mrb[3].mxu0  ;;  %v747_v46 = vsel %vm737_vm9, %v6869_v44, 0.0 }
 0x1ac   : > { %v744_v49 = vsel %vm737_vm9, %v6871_v45, 0.0 }
 0x1ad   : > { %748 = vadd.xlane.f32.xlu0 %v747_v46 }
 0x1ae   : > { %v6875_v47 = vpop.f32.mrb[4].mxu0 }
 0x1af   : > { %v6877_v48 = vpop.f32.mrb[5].mxu0  ;;  %v753_v53 = vsel %vm737_vm9, %v6875_v47, 0.0 }
 0x1b0   : > { %v750_v50 = vsel %vm737_vm9, %v6877_v48, 0.0 }
 0x1b1   : > { %745 = vadd.xlane.f32.xlu0 %v744_v49  ;;  %751 = vadd.xlane.f32.xlu1 %v750_v50 }
 0x1b2   : > { %v6883_v51 = vpop.f32.mrb[6].mxu0 }
 0x1b3   : > { %v6885_v52 = vpop.f32.mrb[7].mxu0  ;;  %v759_v55 = vsel %vm737_vm9, %v6883_v51, 0.0 }
 0x1b4   : > { %v756_v54 = vsel %vm737_vm9, %v6885_v52, 0.0 }
 0x1b5   : > { %754 = vadd.xlane.f32.xlu0 %v753_v53  ;;  %757 = vadd.xlane.f32.xlu1 %v756_v54 }
 0x1b9   : > { %760 = vadd.xlane.f32.xlu0 %v759_v55 }
 0x235   : > { %v743_v56 = vpop.xlane.xlu1 %742 }
 0x236   : > { %v764_v57 = vmul.f32 0.03125, %v743_v56  ;;  %v740_v58 = vpop.xlane.xlu0 %739 }
 0x237   : > { %v763_v59 = vmul.f32 0.03125, %v740_v58 }
 0x238   : > { %v6894_v60 = vsub.f32 %v6861_v40, %v764_v57 }
 0x239   : > { %v6897_v61 = vsub.f32 %v6863_v41, %v763_v59 }
 0x23a   : > { %v749_v62 = vpop.xlane.xlu0 %748  ;;  %v780_v63 = vmul.f32 %v6894_v60, %v6894_v60 }
 0x23b   : > { %v766_v1 = vmul.f32 0.03125, %v749_v62  ;;  %v779_v2 = vmul.f32 %v6897_v61, %v6897_v61 }
 0x23c   : > { %v790_v3 = vsel %vm737_vm9, %v780_v63, 0.0 }
 0x23d   : > { %v6905_v4 = vsub.f32 %v6869_v44, %v766_v1  ;;  %791 = vadd.xlane.f32.xlu0 %v790_v3  ;;  %v787_v5 = vsel %vm737_vm9, %v779_v2, 0.0 }
 0x23e   : > { %v752_v6 = vpop.xlane.xlu1 %751  ;;  %788 = vadd.xlane.f32.xlu1 %v787_v5  ;;  %v746_v7 = vpop.xlane.xlu0 %745 }
 0x23f   : > { %v767_v8 = vmul.f32 0.03125, %v752_v6  ;;  %v765_v9 = vmul.f32 0.03125, %v746_v7  ;;  %v782_v10 = vmul.f32 %v6905_v4, %v6905_v4  ;;  %v5202_v7 = vld [vmem:[%s8628_s2] ss:$0 sm:$0xff] }
 0x241   : > { %v6911_v11 = vsub.f32 %v6877_v48, %v767_v8  ;;  %v6914_v12 = vsub.f32 %v6871_v45, %v765_v9  ;;  %v796_v13 = vsel %vm737_vm9, %v782_v10, 0.0 }
 0x242   : > { %v758_v14 = vpop.xlane.xlu1 %757  ;;  %797 = vadd.xlane.f32.xlu0 %v796_v13  ;;  %v755_v15 = vpop.xlane.xlu0 %754 }
 0x243   : > { %v769_v16 = vmul.f32 0.03125, %v758_v14  ;;  %v768_v17 = vmul.f32 0.03125, %v755_v15  ;;  %v781_v18 = vmul.f32 %v6914_v12, %v6914_v12  ;;  %v783_v24 = vmul.f32 %v6911_v11, %v6911_v11 }
 0x245   : > { %v6920_v19 = vsub.f32 %v6885_v52, %v769_v16  ;;  %v6923_v20 = vsub.f32 %v6875_v47, %v768_v17  ;;  %v793_v23 = vsel %vm737_vm9, %v781_v18, 0.0  ;;  %v799_v30 = vsel %vm737_vm9, %v783_v24, 0.0  ;;  %v5203_v17 = vld [vmem:[%s8628_s2 + $0x1] ss:$0 sm:$0xff] }
 0x246   : > { %794 = vadd.xlane.f32.xlu1 %v793_v23  ;;  %v761_v26 = vpop.xlane.xlu0 %760 }
 0x247   : > { %v770_v27 = vmul.f32 0.03125, %v761_v26  ;;  %v784_v28 = vmul.f32 %v6923_v20, %v6923_v20  ;;  %v785_v32 = vmul.f32 %v6920_v19, %v6920_v19 }
 0x249   : > { %v6931_v29 = vsub.f32 %v6883_v51, %v770_v27  ;;  %v802_v31 = vsel %vm737_vm9, %v784_v28, 0.0  ;;  %v805_v34 = vsel %vm737_vm9, %v785_v32, 0.0 }
 0x24a   : > { %800 = vadd.xlane.f32.xlu1 %v799_v30  ;;  %803 = vadd.xlane.f32.xlu0 %v802_v31 }
 0x24b   : > { %v786_v33 = vmul.f32 %v6931_v29, %v6931_v29 }
 0x24d   : > { %v808_v35 = vsel %vm737_vm9, %v786_v33, 0.0 }
 0x24e   : > { %806 = vadd.xlane.f32.xlu1 %v805_v34  ;;  %809 = vadd.xlane.f32.xlu0 %v808_v35 }
 0x2ca   : > { %v792_v46 = vpop.xlane.xlu0 %791 }
 0x2cb   : > { %v812_v49 = vmul.f32 0.03125, %v792_v46  ;;  %v789_v50 = vpop.xlane.xlu1 %788 }
 0x2cc   : > { %v811_v53 = vmul.f32 0.03125, %v789_v50 }
 0x2cd   : > { %v820_v54 = vadd.f32 1e-05, %v812_v49 }
 0x2ce   : > { %v819_v55 = vadd.f32 1e-05, %v811_v53 }
 0x2cf   : > { %6247 = vrsqrt.f32 %v820_v54  ;;  %v798_v56 = vpop.xlane.xlu0 %797  ;;  %v6208_v54 = vld [vmem:[#allocation2 + $0x48] sm:$0xff]  }
 0x2d0   : > { %6249 = vrsqrt.f32 %v819_v55  ;;  %v814_v57 = vmul.f32 0.03125, %v798_v56  ;;  %v6210_v55 = vld [vmem:[#allocation2 + $0x28] sm:$0xff]  }
 0x2d2   : > { %v822_v58 = vadd.f32 1e-05, %v814_v57 }
 0x2d3   : > { %v795_v59 = vpop.xlane.xlu1 %794 }
 0x2d4   : > { %6251 = vrsqrt.f32 %v822_v58  ;;  %v813_v62 = vmul.f32 0.03125, %v795_v59 }
 0x2d6   : > { %v821_v63 = vadd.f32 1e-05, %v813_v62 }
 0x2d7   : > { %v801_v1 = vpop.xlane.xlu1 %800  ;;  %v804_v2 = vpop.xlane.xlu0 %803 }
 0x2d8   : > { %6253 = vrsqrt.f32 %v821_v63  ;;  %v815_v3 = vmul.f32 0.03125, %v801_v1  ;;  %v816_v5 = vmul.f32 0.03125, %v804_v2  ;;  %v6211_v2 = vld [vmem:[#allocation2 + $0x50] sm:$0xff]  }
 0x2d9   : > { %v6248_v6 = vpop.eup %6247 }
 0x2da   : > { %v6250_v8 = vpop.eup %6249  ;;  %v836_v9 = vmul.f32 %v6248_v6, %v6894_v60  ;;  %v823_v10 = vadd.f32 1e-05, %v815_v3  ;;  %v824_v13 = vadd.f32 1e-05, %v816_v5 }
 0x2db   : > { %v835_v14 = vmul.f32 %v6250_v8, %v6897_v61  ;;  %v807_v15 = vpop.xlane.xlu1 %806  ;;  %v810_v16 = vpop.xlane.xlu0 %809 }
 0x2dc   : > { %v848_v18 = vmul.f32 %v5202_v7, %v836_v9  ;;  %6255 = vrsqrt.f32 %v823_v10  ;;  %v817_v23 = vmul.f32 0.03125, %v807_v15  ;;  %v818_v24 = vmul.f32 0.03125, %v810_v16 }
 0x2dd   : > { %v847_v26 = vmul.f32 %v5202_v7, %v835_v14  ;;  %6257 = vrsqrt.f32 %v824_v13 }
 0x2de   : > { %v6252_v27 = vpop.eup %6251  ;;  %v825_v28 = vadd.f32 1e-05, %v817_v23  ;;  %v826_v30 = vadd.f32 1e-05, %v818_v24  ;;  %v860_v60 = vadd.f32 %v5203_v17, %v848_v18 }
 0x2df   : > { %v838_v31 = vmul.f32 %v6252_v27, %v6905_v4  ;;  %v859_v32 = vadd.f32 %v5203_v17, %v847_v26  ;;  %v7007_v27 = vld [vmem:[#allocation4 + $0x78] sm:$0xff] }
 0x2e0   : > { %6259 = vrsqrt.f32 %v825_v28  ;;  %v7009_v28 = vld [vmem:[#allocation4 + $0xb8] sm:$0xff] }
 0x2e1   : > { %6261 = vrsqrt.f32 %v826_v30  ;;  %v867_v61 = vpack.c.bf16 %v860_v60, %v859_v32  ;;  %v850_v34 = vmul.f32 %v5202_v7, %v838_v31  ;;  %v5199_v30 = vsel %vm656_vm12, 1.0, %v6710_v25  ;;  %v7012_v60 = vld [vmem:[#allocation4 + $0x68] sm:$0xff]  ;;  %v7016_v32 = vld [vmem:[#allocation4 + $0x80] sm:$0xff] }
 0x2e2   : > { %v6254_v33 = vpop.eup %6253  ;;  %v7014_v31 = vld [vmem:[#allocation4 + $0xa8] sm:$0xff] }
 0x2e3   : > { %v837_v35 = vmul.f32 %v6254_v33, %v6914_v12  ;;  %5661 = vmatprep.mubr.msk.bf16.mxu1 %vm737_vm9, %v867_v61  ;;  %5685 = vmatprep.mubr.msk.bf16.mxu0 %vm737_vm9, %v867_v61  ;;  %v862_v49 = vadd.f32 %v5203_v17, %v850_v34  ;;  %v7018_v34 = vld [vmem:[#allocation4 + $0xc0] sm:$0xff] }
 0x2e5   : > { %v849_v36 = vmul.f32 %v5202_v7, %v837_v35 }
 0x2e6   : > { %v6256_v37 = vpop.eup %6255 }
 0x2e7   : > { %v6258_v38 = vpop.eup %6257  ;;  %v839_v39 = vmul.f32 %v6256_v37, %v6911_v11  ;;  %v861_v46 = vadd.f32 %v5203_v17, %v849_v36  ;;  %v7021_v36 = vld [vmem:[#allocation4 + $0x70] sm:$0xff] }
 0x2e8   : > { %v840_v4 = vmul.f32 %v6258_v38, %v6923_v20 }
 0x2e9   : > { %v851_v50 = vmul.f32 %v5202_v7, %v839_v39  ;;  %v868_v53 = vpack.c.bf16 %v862_v49, %v861_v46  ;;  %v7024_v46 = vld [vmem:[#allocation4 + $0xb0] sm:$0xff]  ;;  %v7027_v49 = vpack.c.bf16 %v5199_v30, %v5199_v30  ;;  %v7056_v30 = vld [vmem:[#allocation4 + $0xa0] sm:$0xff] }
 0x2ea   : > { %v6260_v56 = vpop.eup %6259  ;;  %v852_v57 = vmul.f32 %v5202_v7, %v840_v4 }
 0x2eb   : > { %v6262_v12 = vpop.eup %6261  ;;  %v841_v58 = vmul.f32 %v6260_v56, %v6920_v19  ;;  %5662 = vmatmul.mubr.msk.bf16.vlgmr.msra.gmra.mrb[0].mxu1 %vm737_vm9, %v868_v53  ;;  %5686 = vmatmul.mubr.msk.bf16.vlgmr.msra.gmra.mrb[8].mxu0 %vm737_vm9, %v868_v53  ;;  %v863_v59 = vadd.f32 %v5203_v17, %v851_v50 }
 0x2ec   : > { %v842_v11 = vmul.f32 %v6262_v12, %v6931_v29  ;;  %5670 = vmatpush3.bf16.msra.mxu1 %v6941_v42  ;;  %v864_v62 = vadd.f32 %v5203_v17, %v852_v57  ;;  %5706 = vmatpush3.bf16.msra.mxu0 %v6944_v43  ;;  %v6212_v42 = vld [vmem:[#allocation2 + $0x58] sm:$0xff]  }
 0x2ed   : > { %v853_v20 = vmul.f32 %v5202_v7, %v841_v58  ;;  %5671 = vmatprep.subr.bf16.mxu1 %v6208_v54  ;;  %5707 = vmatprep.subr.bf16.mxu0 %v6210_v55 }
 0x2ee   : > { %v854_v63 = vmul.f32 %v5202_v7, %v842_v11  ;;  %v869_v1 = vpack.c.bf16 %v864_v62, %v863_v59 }
 0x2ef   : > { %v865_v3 = vadd.f32 %v5203_v17, %v853_v20 }
 0x2f0   : > { %5665 = vmatprep.mubr.msk.bf16.mxu1 %vm737_vm9, %v869_v1  ;;  %5689 = vmatprep.mubr.msk.bf16.mxu0 %vm737_vm9, %v869_v1  ;;  %v866_v19 = vadd.f32 %v5203_v17, %v854_v63 }
 0x2f1   : > { %5672 = vmatpush3.bf16.msra.mxu1 %v6208_v54  ;;  %5708 = vmatpush3.bf16.msra.mxu0 %v6210_v55 }
 0x2f2   : > { %v870_v29 = vpack.c.bf16 %v866_v19, %v865_v3  ;;  %5693 = vmatprep.subr.bf16.mxu1 %v6211_v2  ;;  %v7042_v3 = vld [vmem:[#allocation4 + $0x98] sm:$0xff] }
 0x2f4   : > { %5666 = vmatmul.mubr.msk.bf16.gmra.mrb[4].mxu1 %vm737_vm9, %v870_v29  ;;  %5690 = vmatmul.mubr.msk.bf16.gmra.mrb[12].mxu0 %vm737_vm9, %v870_v29 }
 0x2f5   : > { %5673 = vmatprep.mubr.msk.bf16.mxu1 %vm737_vm9, %v867_v61  ;;  %5709 = vmatprep.mubr.msk.bf16.mxu0 %vm737_vm9, %v867_v61 }
 0x2fc   : > { %5674 = vmatmul.mubr.msk.bf16.vlgmr.msra.gmra.mrb[8].mxu1 %vm737_vm9, %v868_v53  ;;  %5710 = vmatmul.mubr.msk.bf16.vlgmr.msra.gmra.mrb[16].mxu0 %vm737_vm9, %v868_v53 }
 0x2fd   : > { %5694 = vmatpush3.bf16.msra.mxu1 %v6211_v2  ;;  %5677 = vmatprep.mubr.msk.bf16.mxu1 %vm737_vm9, %v869_v1 }
 0x2fe   : > { %5713 = vmatprep.mubr.msk.bf16.mxu0 %vm737_vm9, %v869_v1  ;;  %5695 = vmatprep.subr.bf16.mxu1 %v6212_v42 }
 0x301   : > { %5696 = vmatpush3.bf16.msra.mxu1 %v6212_v42 }
 0x304   : > { %5678 = vmatmul.mubr.msk.bf16.gmra.mrb[12].mxu1 %vm737_vm9, %v870_v29  ;;  %5714 = vmatmul.mubr.msk.bf16.gmra.mrb[20].mxu0 %vm737_vm9, %v870_v29 }
 0x305   : > { %5697 = vmatprep.mubr.msk.bf16.mxu1 %vm737_vm9, %v867_v61 }
 0x30c   : > { %5698 = vmatmul.mubr.msk.bf16.vlgmr.msra.gmra.mrb[16].mxu1 %vm737_vm9, %v868_v53 }
 0x30d   : > { %5701 = vmatprep.mubr.msk.bf16.mxu1 %vm737_vm9, %v869_v1  ;;  %v5198_v1 = vsel %vm650_vm13, 1.0, %v6710_v25 }
 0x314   : > { %5702 = vmatmul.mubr.msk.bf16.gmra.mrb[20].mxu1 %vm737_vm9, %v870_v29  ;;  %v7044_v29 = vld [vmem:[#allocation4 + $0xd8] sm:$0xff] }
 0x3be   : > { %v5663_v43 = vpop.f32.mrb[0].mxu1  ;;  %v6983_v5 = vpop.f32.mrb[8].mxu0 }
 0x3bf   : > { %v929_v6 = vpop.f32.mrb[1].mxu1  ;;  %v6985_v7 = vpop.f32.mrb[9].mxu0  ;;  %v1274_v35 = vmul.f32 %v5663_v43, %v7007_v27  ;;  %v7048_v43 = vld [vmem:[#allocation4 + $0x88] sm:$0xff] }
 0x3c0   : > { %v5664_v8 = vpop.f32.mrb[2].mxu1  ;;  %v6987_v9 = vpop.f32.mrb[10].mxu0  ;;  %v1272_v4 = vmul.f32 %v929_v6, %v7012_v60 }
 0x3c1   : > { %v932_v10 = vpop.f32.mrb[3].mxu1  ;;  %v6989_v13 = vpop.f32.mrb[11].mxu0  ;;  %v1275_v55 = vmul.f32 %v5664_v8, %v7016_v32  ;;  %v7052_v8 = vld [vmem:[#allocation4 + $0xc8] sm:$0xff] }
 0x3c2   : > { %v1273_v11 = vmul.f32 %v932_v10, %v7021_v36  ;;  %v7054_v10 = vpack.c.bf16 %v5198_v1, %v5198_v1 }
 0x3c7   : > { %v5667_v14 = vpop.f32.mrb[4].mxu1  ;;  %v6991_v15 = vpop.f32.mrb[12].mxu0 }
 0x3c8   : > { %v945_v16 = vpop.f32.mrb[5].mxu1  ;;  %v6995_v17 = vpop.f32.mrb[13].mxu0 }
 0x3c9   : > { %v6997_v18 = vpop.f32.mrb[6].mxu1  ;;  %v6999_v23 = vpop.f32.mrb[14].mxu0 }
 0x3ca   : > { %v7001_v24 = vpop.f32.mrb[7].mxu1  ;;  %v7003_v26 = vpop.f32.mrb[15].mxu0 }
 0x3cf   : > { %v5675_v61 = vpop.f32.mrb[8].mxu1  ;;  %v5711_v33 = vpop.f32.mrb[16].mxu0 }
 0x3d0   : > { %v1282_v37 = vmul.f32 %v5675_v61, %v7009_v28  ;;  %v1006_v38 = vpop.f32.mrb[9].mxu1  ;;  %v1237_v39 = vpop.f32.mrb[17].mxu0 }
 0x3d1   : > { %v1280_v50 = vmul.f32 %v1006_v38, %v7014_v31  ;;  %v5676_v53 = vpop.f32.mrb[10].mxu1  ;;  %v5712_v54 = vpop.f32.mrb[18].mxu0 }
 0x3d2   : > { %v1290_v56 = vadd.f32 %v1282_v37, %v1274_v35  ;;  %v1283_v57 = vmul.f32 %v5676_v53, %v7018_v34  ;;  %v7033_v12 = vpack.c.bf16 %v5712_v54, %v5711_v33  ;;  %v1009_v58 = vpop.f32.mrb[11].mxu1  ;;  %v1240_v59 = vpop.f32.mrb[19].mxu0  ;;  %v7060_v37 = vld [vmem:[#allocation4 + $0xe0] sm:$0xff] }
 0x3d3   : > { %v1288_v62 = vadd.f32 %v1280_v50, %v1272_v4  ;;  %v1281_v20 = vmul.f32 %v1009_v58, %v7024_v46  ;;  %v7037_v63 = vpack.c.bf16 %v1240_v59, %v1237_v39  ;;  %v1278_v39 = vmul.f32 %v5667_v14, %v7042_v3  ;;  %v7065_v4 = vld [vmem:[#allocation4 + $0x90] sm:$0xff] }
 0x3d4   : > { %v1291_v2 = vadd.f32 %v1283_v57, %v1275_v55  ;;  %v1938_v38 = vmul.bf16 %v7033_v12, %v7027_v49  ;;  %v7068_v55 = vld [vmem:[#allocation4 + $0xd0] sm:$0xff]  ;;  %v1279_v14 = vmul.f32 %v6997_v18, %v7056_v30 }
 0x3d5   : > { %v1289_v19 = vadd.f32 %v1281_v20, %v1273_v11  ;;  %v1937_v42 = vmul.bf16 %v7037_v63, %v7027_v49 }
 0x3d6   : > { %v7050_v6 = vpack.c.bf16 %v1291_v2, %v1290_v56  ;;  %v1276_v56 = vmul.f32 %v945_v16, %v7048_v43  ;;  %v1277_v16 = vmul.f32 %v7001_v24, %v7065_v4 }
 0x3d7   : > { %v7058_v61 = vpack.c.bf16 %v1289_v19, %v1288_v62  ;;  %v5679_v33 = vpop.f32.mrb[12].mxu1  ;;  %v5715_v35 = vpop.f32.mrb[20].mxu0  ;;  %5757 = vmatprep.subr.bf16.mxu0 %v1937_v42 }
 0x3d8   : > { %v1286_v50 = vmul.f32 %v5679_v33, %v7044_v29  ;;  %v1022_v53 = vpop.f32.mrb[13].mxu1  ;;  %v1253_v54 = vpop.f32.mrb[21].mxu0  ;;  %5758 = vmatpush3.bf16.msra.mxu0 %v1937_v42 }
 0x3d9   : > { %v1284_v57 = vmul.f32 %v1022_v53, %v7052_v8  ;;  %v5680_v58 = vpop.f32.mrb[14].mxu1  ;;  %v5716_v59 = vpop.f32.mrb[22].mxu0  ;;  %5759 = vmatprep.subr.bf16.mxu0 %v1938_v38  ;;  %v1328_v11 = vmul.bf16 %v7058_v61, %v7054_v10 }
 0x3da   : > { %v1294_v62 = vadd.f32 %v1286_v50, %v1278_v39  ;;  %v1287_v20 = vmul.f32 %v5680_v58, %v7060_v37  ;;  %v7077_v1 = vpack.c.bf16 %v5716_v59, %v5715_v35  ;;  %v1025_v2 = vpop.f32.mrb[15].mxu1  ;;  %v1256_v19 = vpop.f32.mrb[23].mxu0 }
 0x3db   : > { %v1292_v42 = vadd.f32 %v1284_v57, %v1276_v56  ;;  %v1285_v33 = vmul.f32 %v1025_v2, %v7068_v55  ;;  %v7082_v53 = vpack.c.bf16 %v1256_v19, %v1253_v54  ;;  %5725 = vmatprep.mubr.msk.bf16.mxu1 %vm737_vm9, %v1328_v11  ;;  %v1302_v54 = vmul.f32 %v6983_v5, %v7007_v27 }
 0x3dc   : > { %v1295_v21 = vadd.f32 %v1287_v20, %v1279_v14  ;;  %5760 = vmatpush3.bf16.msra.mxu0 %v1938_v38  ;;  %v1940_v24 = vmul.bf16 %v7077_v1, %v7027_v49  ;;  %v1300_v38 = vmul.f32 %v6985_v7, %v7012_v60  ;;  %v1303_v11 = vmul.f32 %v6987_v9, %v7016_v32 }
 0x3dd   : > { %v1293_v18 = vadd.f32 %v1285_v33, %v1277_v16  ;;  %v1939_v39 = vmul.bf16 %v7082_v53, %v7027_v49  ;;  %v1301_v5 = vmul.f32 %v6989_v13, %v7021_v36  ;;  %v7107_v7 = vmul.bf16 %v7037_v63, %v7054_v10 }
 0x3de   : > { %v7087_v35 = vpack.c.bf16 %v1295_v21, %v1294_v62  ;;  %v1307_v33 = vmul.f32 %v6999_v23, %v7056_v30  ;;  %v1329_v30 = vmul.bf16 %v7050_v6, %v7054_v10 }
 0x3df   : > { %v7089_v50 = vpack.c.bf16 %v1293_v18, %v1292_v42  ;;  %v5699_v58 = vpop.f32.mrb[16].mxu1  ;;  %5761 = vmatprep.subr.bf16.mxu0 %v1939_v39 }
 0x3e0   : > { %v1310_v56 = vmul.f32 %v5699_v58, %v7009_v28  ;;  %v1160_v57 = vpop.f32.mrb[17].mxu1  ;;  %5762 = vmatpush3.bf16.msra.mxu0 %v1939_v39 }
 0x3e1   : > { %v1308_v21 = vmul.f32 %v1160_v57, %v7014_v31  ;;  %v5700_v59 = vpop.f32.mrb[18].mxu1  ;;  %5763 = vmatprep.subr.bf16.mxu0 %v1940_v24  ;;  %v1334_v57 = vmul.bf16 %v7089_v50, %v7027_v49 }
 0x3e2   : > { %v1318_v14 = vadd.f32 %v1310_v56, %v1302_v54  ;;  %v1311_v62 = vmul.f32 %v5700_v59, %v7018_v34  ;;  %v1163_v20 = vpop.f32.mrb[19].mxu1  ;;  %v1306_v34 = vmul.f32 %v6991_v15, %v7042_v3  ;;  %v1305_v3 = vmul.f32 %v7003_v26, %v7065_v4 }
 0x3e3   : > { %v1316_v27 = vadd.f32 %v1308_v21, %v1300_v38  ;;  %v1309_v28 = vmul.f32 %v1163_v20, %v7024_v46  ;;  %v1304_v46 = vmul.f32 %v6995_v17, %v7048_v43  ;;  %v1331_v4 = vmul.bf16 %v7087_v35, %v7054_v10 }
 0x3e4   : > { %v1319_v60 = vadd.f32 %v1311_v62, %v1303_v11  ;;  %5764 = vmatpush3.bf16.msra.mxu0 %v1940_v24  ;;  %v1333_v56 = vmul.bf16 %v7050_v6, %v7027_v49  ;;  %v5200_v38 = vsel %vm661_vm1, 1.0, %v6710_v25  ;;  %v1335_v59 = vmul.bf16 %v7087_v35, %v7027_v49 }
 0x3e5   : > { %v1317_v31 = vadd.f32 %v1309_v28, %v1301_v5  ;;  %5773 = vmatprep.subr.bf16.mxu0 %v7107_v7  ;;  %v7153_v21 = vpack.c.bf16 %v5200_v38, %v5200_v38  ;;  %v5201_v20 = vsel %vm666_vm4, 1.0, %v6710_v25 }
 0x3e6   : > { %v1325_v9 = vpack.c.bf16 %v1319_v60, %v1318_v14  ;;  %v7172_v5 = vpack.c.bf16 %v5201_v20, %v5201_v20 }
 0x3e7   : > { %v1324_v32 = vpack.c.bf16 %v1317_v31, %v1316_v27  ;;  %v5703_v2 = vpop.f32.mrb[20].mxu1  ;;  %v1336_v11 = vmul.bf16 %v7058_v61, %v7153_v21  ;;  %v1337_v14 = vmul.bf16 %v7050_v6, %v7153_v21  ;;  %v1338_v62 = vmul.bf16 %v7089_v50, %v7153_v21 }
 0x3e8   : > { %v1314_v13 = vmul.f32 %v5703_v2, %v7044_v29  ;;  %v1176_v36 = vpop.f32.mrb[21].mxu1  ;;  %v1396_v54 = vsel %vm737_vm9, %v1325_v9, 0  ;;  %v1339_v27 = vmul.bf16 %v7087_v35, %v7153_v21  ;;  %v1340_v28 = vmul.bf16 %v7058_v61, %v7172_v5 }
 0x3e9   : > { %v1312_v19 = vmul.f32 %v1176_v36, %v7052_v8  ;;  %v5704_v16 = vpop.f32.mrb[22].mxu1  ;;  %6157 = vmatprep.subr.msk.bf16.mxu1 %vm737_vm9, %v1324_v32  ;;  %v1393_v42 = vsel %vm737_vm9, %v1324_v32, 0  ;;  %v1341_v60 = vmul.bf16 %v7050_v6, %v7172_v5  ;;  %v1342_v31 = vmul.bf16 %v7089_v50, %v7172_v5 }
 0x3ea   : > { %v1322_v18 = vadd.f32 %v1314_v13, %v1306_v34  ;;  %v1315_v39 = vmul.f32 %v5704_v16, %v7060_v37  ;;  %v1179_v15 = vpop.f32.mrb[23].mxu1  ;;  %5718 = vmatpush3.bf16.xpose.msra.mxu1 %v1393_v42  ;;  %v1330_v37 = vmul.bf16 %v7089_v50, %v7054_v10  ;;  %v1343_v25 = vmul.bf16 %v7087_v35, %v7172_v5 }
 0x3eb   : > { %v1320_v29 = vadd.f32 %v1312_v19, %v1304_v46  ;;  %v1313_v17 = vmul.f32 %v1179_v15, %v7068_v55  ;;  %6158 = vmatprep.subr.msk.bf16.mxu1 %vm737_vm9, %v1325_v9  ;;  %v1332_v55 = vmul.bf16 %v7058_v61, %v7027_v49  ;;  %v454_v61 = vsel %vm453_vm10, 1, %v6709_v0 }
 0x3ec   : > { %v1323_v43 = vadd.f32 %v1315_v39, %v1307_v33  ;;  %v480_v6 = vsel %vm479_vm14, 1, %v6709_v0  ;;  %v507_v50 = vsel %vm506_vm2, 1, %v6709_v0  ;;  %v534_v35 = vsel %vm533_vm5, 1, %v6709_v0 }
 0x3ed   : > { %v1321_v8 = vadd.f32 %v1313_v17, %v1305_v3  ;;  %v481_v9 = vadd.s32 %v480_v6, %v454_v61  ;;  %v561_v34 = vsel %vm560_vm6, 1, %v6709_v0  ;;  %v588_v36 = vsel %vm587_vm7, 1, %v6709_v0 }
 0x3ee   : > { %v1327_v58 = vpack.c.bf16 %v1323_v43, %v1322_v18  ;;  %v8656_v18 = vlaneseq  ;;  %v615_v15 = vsel %vm614_vm8, 1, %v6709_v0 }
 0x3ef   : > { %v1326_v24 = vpack.c.bf16 %v1321_v8, %v1320_v29  ;;  %v508_v32 = vadd.s32 %v507_v50, %v481_v9 }
 0x3f0   : > { %v1402_v26 = vsel %vm737_vm9, %v1327_v58, 0  ;;  %v429_v39 = vshrl.u32 %v8656_v18, 7 }
 0x3f1   : > { %v1399_v23 = vsel %vm737_vm9, %v1326_v24, 0  ;;  %v535_v2 = vadd.s32 %v534_v35, %v508_v32 }
 0x3f2   : > { %5720 = vmatpush3.bf16.xpose.msra.mxu1 %v1396_v54  ;;  %v431_v29 = vadd.s32 16, %v429_v39  ;;  %v430_v43 = vadd.s32 8, %v429_v39  ;;  %vm617_vm10 = vcmp.ge.s32.totalorder %v429_v39, %v6835_v22  ;;  %v433_v0 = vadd.s32 32, %v429_v39 }
 0x3f3   : > { %6159 = vmatprep.subr.msk.bf16.mxu1 %vm737_vm9, %v1326_v24  ;;  %v562_v13 = vadd.s32 %v561_v34, %v535_v2  ;;  %v432_v24 = vadd.s32 24, %v429_v39 }
 0x3f4   : > { %vm619_vm12 = vcmp.ge.s32.totalorder %v431_v29, %v6835_v22  ;;  %vm618_vm14 = vcmp.ge.s32.totalorder %v430_v43, %v6835_v22  ;;  %vm621_vm8 = vcmp.ge.s32.totalorder %v433_v0, %v6835_v22 }
 0x3f5   : > { %v589_v42 = vadd.s32 %v588_v36, %v562_v13  ;;  %vm620_vm3 = vcmp.ge.s32.totalorder %v432_v24, %v6835_v22 }
 0x3f7   : > { %v616_v3 = vadd.s32 %v615_v15, %v589_v42 }
 0x3f9   : > { %vm5190_vm11 = vcmp.eq.s32.totalorder %v616_v3, 0  ;;  %vm5192_vm13 = vcmp.eq.s32.totalorder %v616_v3, 2  ;;  %vm5191_vm15 = vcmp.eq.s32.totalorder %v616_v3, 1  ;;  %vm5193_vm4 = vcmp.eq.s32.totalorder %v616_v3, 3 }
 0x3fa   : > { %5722 = vmatpush3.bf16.xpose.msra.mxu1 %v1399_v23  ;;  %vm633_vm1 = vmand %vm617_vm10, %vm5190_vm11  ;;  %v435_v23 = vadd.s32 48, %v429_v39  ;;  %vm5196_vm7 = vcmp.eq.s32.totalorder %v616_v3, 6  ;;  %vm5194_vm10 = vcmp.eq.s32.totalorder %v616_v3, 4 }
 0x3fb   : > { %6160 = vmatprep.subr.msk.bf16.mxu1 %vm737_vm9, %v1327_v58  ;;  %vm635_vm2 = vmand %vm619_vm12, %vm5192_vm13  ;;  %vm5195_vm13 = vcmp.eq.s32.totalorder %v616_v3, 5 }
 0x3fc   : > { %vm634_vm5 = vmand %vm618_vm14, %vm5191_vm15  ;;  %vm623_vm11 = vcmp.ge.s32.totalorder %v435_v23, %v6835_v22 }
 0x3fd   : > { %vm636_vm6 = vmand %vm620_vm3, %vm5193_vm4 }
 0x3fe   : > { %vm637_vm14 = vmand %vm621_vm8, %vm5194_vm10 }
 0x3ff   : > { %vm639_vm15 = vmand %vm623_vm11, %vm5196_vm7 }
 0x402   : > { %5724 = vmatpush3.bf16.xpose.msra.mxu1 %v1402_v26 }
 0x409   : > { %5726 = vmatmul.mubr.msk.bf16.vlgmr.msra.gmra.mrb[24].mxu1 %vm737_vm9, %v1329_v30  ;;  %v6711_v30 = vmov -1e+30  }
 0x40a   : > { %5729 = vmatprep.mubr.msk.bf16.mxu1 %vm737_vm9, %v1330_v37  ;;  %v7227_v37 = vsel %vm633_vm1, 0.0, %v6711_v30  ;;  %v7258_v6 = vsel %vm637_vm14, 0.0, %v6711_v30 }
 0x40b   : > { %8657 = vst [vmem:[#allocation8_spill] sm:$0xff] %v7227_v37  ;;  %8661 = vst [vmem:[#allocation12_spill] sm:$0xff] %v7258_v6 }
 0x411   : > { %5730 = vmatmul.mubr.msk.bf16.gmra.mrb[28].mxu1 %vm737_vm9, %v1331_v4  ;;  %v434_v4 = vadd.s32 40, %v429_v39 }
 0x412   : > { %5733 = vmatprep.mubr.msk.bf16.mxu1 %vm737_vm9, %v1332_v55 }
 0x413   : > { %vm622_vm12 = vcmp.ge.s32.totalorder %v434_v4, %v6835_v22 }
 0x414   : > { %vm638_vm3 = vmand %vm622_vm12, %vm5195_vm13 }
 0x415   : > { %v7267_v2 = vsel %vm638_vm3, 0.0, %v6711_v30 }
 0x416   : > { %8663 = vst [vmem:[#allocation14_spill] sm:$0xff] %v7267_v2 }
 0x419   : > { %5734 = vmatmul.mubr.msk.bf16.gmra.mrb[32].mxu1 %vm737_vm9, %v1333_v56  ;;  %v7229_v56 = vsel %vm635_vm2, 0.0, %v6711_v30  ;;  %vm5197_vm2 = vcmp.eq.s32.totalorder %v616_v3, 7 }
 0x41a   : > { %5737 = vmatprep.mubr.msk.bf16.mxu1 %vm737_vm9, %v1334_v57  ;;  %8658 = vst [vmem:[#allocation9_spill] sm:$0xff] %v7229_v56 }
 0x421   : > { %5738 = vmatmul.mubr.msk.bf16.gmra.mrb[36].mxu1 %vm737_vm9, %v1335_v59  ;;  %v7234_v59 = vsel %vm634_vm5, 0.0, %v6711_v30 }
 0x422   : > { %5741 = vmatprep.mubr.msk.bf16.mxu1 %vm737_vm9, %v1336_v11  ;;  %8659 = vst [vmem:[#allocation10_spill] sm:$0xff] %v7234_v59  ;;  %v436_v11 = vadd.s32 56, %v429_v39 }
 0x424   : > { %vm624_vm1 = vcmp.ge.s32.totalorder %v436_v11, %v6835_v22  ;;  %v7265_v22 = vsel %vm639_vm15, 0.0, %v6711_v30 }
 0x425   : > { %vm640_vm4 = vmand %vm624_vm1, %vm5197_vm2  ;;  %8662 = vst [vmem:[#allocation13_spill] sm:$0xff] %v7265_v22 }
 0x426   : > { %v7277_v18 = vsel %vm640_vm4, 0.0, %v6711_v30 }
 0x427   : > { %8664 = vst [vmem:[#allocation15_spill] sm:$0xff] %v7277_v18 }
 0x429   : > { %5742 = vmatmul.mubr.msk.bf16.gmra.mrb[40].mxu1 %vm737_vm9, %v1337_v14 }
 0x42a   : > { %5745 = vmatprep.mubr.msk.bf16.mxu1 %vm737_vm9, %v1338_v62 }
 0x431   : > { %5746 = vmatmul.mubr.msk.bf16.gmra.mrb[44].mxu1 %vm737_vm9, %v1339_v27 }
 0x432   : > { %5749 = vmatprep.mubr.msk.bf16.mxu1 %vm737_vm9, %v1340_v28  ;;  %v7246_v28 = vsel %vm636_vm6, 0.0, %v6711_v30 }
 0x433   : > { %8660 = vst [vmem:[#allocation11_spill] sm:$0xff] %v7246_v28 }
 0x439   : > { %5750 = vmatmul.mubr.msk.bf16.gmra.mrb[48].mxu1 %vm737_vm9, %v1341_v60 }
 0x43a   : > { %5753 = vmatprep.mubr.msk.bf16.mxu1 %vm737_vm9, %v1342_v31 }
 0x441   : > { %5754 = vmatmul.mubr.msk.bf16.gmra.mrb[52].mxu1 %vm737_vm9, %v1343_v25 }
 0x4dc   : > { %v7204_v46 = vpop.f32.mrb[24].mxu1 }
 0x4dd   : > { %v7207_v19 = vpop.f32.mrb[25].mxu1 }
 0x4de   : > { %v7209_v16 = vpop.f32.mrb[26].mxu1  ;;  %v7286_v3 = vadd.f32 %v7207_v19, %v7227_v37  ;;  %v7298_v19 = vadd.f32 %v7204_v46, %v7229_v56 }
 0x4df   : > { %v7211_v33 = vpop.f32.mrb[27].mxu1 }
 0x4e0   : > { %v7292_v0 = vadd.f32 %v7211_v33, %v7234_v59  ;;  %v1565_v4 = vsel %vm298_vm0, %v7286_v3, -inf  ;;  %v1571_v46 = vsel %vm298_vm0, %v7298_v19, -inf }
 0x4e2   : > { %v1568_v33 = vsel %vm298_vm0, %v7292_v0, -inf }
 0x4e4   : > { %v7215_v17 = vpop.f32.mrb[28].mxu1 }
 0x4e5   : > { %v7217_v8 = vpop.f32.mrb[29].mxu1 }
 0x4e6   : > { %v7219_v58 = vpop.f32.mrb[30].mxu1 }
 0x4e7   : > { %v7222_v54 = vpop.f32.mrb[31].mxu1 }
 0x4ec   : > { %v5735_v26 = vpop.f32.mrb[32].mxu1 }
 0x4ed   : > { %v1470_v55 = vpop.f32.mrb[33].mxu1  ;;  %v7239_v62 = vadd.f32 %v5735_v26, %v7229_v56 }
 0x4ee   : > { %v7232_v57 = vadd.f32 %v1470_v55, %v7227_v37  ;;  %v5736_v38 = vpop.f32.mrb[34].mxu1  ;;  %v7304_v55 = vadd.f32 %v7209_v16, %v7246_v28 }
 0x4ef   : > { %v1473_v14 = vpop.f32.mrb[35].mxu1  ;;  %v7250_v60 = vadd.f32 %v5736_v38, %v7246_v28  ;;  %v1595_v61 = vsel %vm298_vm0, %v7239_v62, -inf  ;;  %v7310_v38 = vadd.f32 %v7217_v8, %v7258_v6  ;;  %v7322_v8 = vadd.f32 %v7215_v17, %v7265_v22 }
 0x4f0   : > { %v7242_v20 = vadd.f32 %v1473_v14, %v7234_v59  ;;  %v1589_v27 = vsel %vm298_vm0, %v7232_v57, -inf }
 0x4f1   : > { %1590 = vmax.xlane.f32.xlu1 %v1589_v27  ;;  %v1598_v35 = vsel %vm298_vm0, %v7250_v60, -inf  ;;  %v7316_v27 = vadd.f32 %v7222_v54, %v7267_v2  ;;  %v1583_v17 = vsel %vm298_vm0, %v7322_v8, -inf }
 0x4f2   : > { %v1592_v31 = vsel %vm298_vm0, %v7242_v20, -inf }
 0x4f3   : > { %1593 = vmax.xlane.f32.xlu0 %v1592_v31  ;;  %v1574_v31 = vsel %vm298_vm0, %v7304_v55, -inf  ;;  %v1580_v54 = vsel %vm298_vm0, %v7316_v27, -inf }
 0x4f4   : > { %v5739_v25 = vpop.f32.mrb[36].mxu1 }
 0x4f5   : > { %v1486_v9 = vpop.f32.mrb[37].mxu1  ;;  %1596 = vmax.xlane.f32.xlu1 %v1595_v61  ;;  %v7270_v13 = vadd.f32 %v5739_v25, %v7265_v22  ;;  %v1577_v61 = vsel %vm298_vm0, %v7310_v38, -inf }
 0x4f6   : > { %v7261_v50 = vadd.f32 %v1486_v9, %v7258_v6  ;;  %v5740_v32 = vpop.f32.mrb[38].mxu1  ;;  %v7328_v9 = vadd.f32 %v7219_v58, %v7277_v18 }
 0x4f7   : > { %v1489_v34 = vpop.f32.mrb[39].mxu1  ;;  %1599 = vmax.xlane.f32.xlu0 %v1598_v35  ;;  %v7280_v39 = vadd.f32 %v5740_v32, %v7277_v18  ;;  %v1607_v43 = vsel %vm298_vm0, %v7270_v13, -inf }
 0x4f8   : > { %v7273_v36 = vadd.f32 %v1489_v34, %v7267_v2  ;;  %v1601_v42 = vsel %vm298_vm0, %v7261_v50, -inf  ;;  %v1586_v58 = vsel %vm298_vm0, %v7328_v9, -inf }
 0x4f9   : > { %1602 = vmax.xlane.f32.xlu1 %v1601_v42  ;;  %v1610_v26 = vsel %vm298_vm0, %v7280_v39, -inf }
 0x4fa   : > { %v1604_v15 = vsel %vm298_vm0, %v7273_v36, -inf }
 0x4fb   : > { %1605 = vmax.xlane.f32.xlu0 %v1604_v15 }
 0x4fc   : > { %v5743_v29 = vpop.f32.mrb[40].mxu1 }
 0x4fd   : > { %v1502_v24 = vpop.f32.mrb[41].mxu1  ;;  %1608 = vmax.xlane.f32.xlu1 %v1607_v43 }
 0x4fe   : > { %v5744_v23 = vpop.f32.mrb[42].mxu1  ;;  %v7333_v32 = vadd.f32 %v1502_v24, %v7227_v37 }
 0x4ff   : > { %v1505_v30 = vpop.f32.mrb[43].mxu1  ;;  %1611 = vmax.xlane.f32.xlu0 %v1610_v26  ;;  %v7343_v26 = vadd.f32 %v5743_v29, %v7229_v56 }
 0x500   : > { %v7338_v42 = vadd.f32 %v1505_v30, %v7234_v59  ;;  %v1613_v24 = vsel %vm298_vm0, %v7333_v32, -inf }
 0x501   : > { %1566 = vmax.xlane.f32.xlu1 %v1565_v4  ;;  %v7348_v4 = vadd.f32 %v5744_v23, %v7246_v28 }
 0x502   : > { %v1616_v30 = vsel %vm298_vm0, %v7338_v42, -inf }
 0x503   : > { %1569 = vmax.xlane.f32.xlu0 %v1568_v33  ;;  %v1622_v23 = vsel %vm298_vm0, %v7348_v4, -inf }
 0x504   : > { %v5747_v11 = vpop.f32.mrb[44].mxu1 }
 0x505   : > { %v1518_v14 = vpop.f32.mrb[45].mxu1  ;;  %1572 = vmax.xlane.f32.xlu1 %v1571_v46 }
 0x506   : > { %v5748_v16 = vpop.f32.mrb[46].mxu1  ;;  %v7353_v33 = vadd.f32 %v1518_v14, %v7258_v6 }
 0x507   : > { %v1521_v25 = vpop.f32.mrb[47].mxu1  ;;  %1575 = vmax.xlane.f32.xlu0 %v1574_v31  ;;  %v1619_v31 = vsel %vm298_vm0, %v7343_v26, -inf }
 0x508   : > { %v1625_v14 = vsel %vm298_vm0, %v7353_v33, -inf }
 0x509   : > { %1578 = vmax.xlane.f32.xlu1 %v1577_v61  ;;  %v7358_v61 = vadd.f32 %v1521_v25, %v7267_v2 }
 0x50b   : > { %1581 = vmax.xlane.f32.xlu0 %v1580_v54  ;;  %v1628_v25 = vsel %vm298_vm0, %v7358_v61, -inf }
 0x50c   : > { %v5751_v35 = vpop.f32.mrb[48].mxu1 }
 0x50d   : > { %v1534_v34 = vpop.f32.mrb[49].mxu1  ;;  %1584 = vmax.xlane.f32.xlu1 %v1583_v17 }
 0x50e   : > { %v5752_v15 = vpop.f32.mrb[50].mxu1 }
 0x50f   : > { %v1537_v43 = vpop.f32.mrb[51].mxu1  ;;  %1587 = vmax.xlane.f32.xlu0 %v1586_v58  ;;  %v7363_v58 = vadd.f32 %v5747_v11, %v7265_v22 }
 0x510   : > { %v7378_v11 = vadd.f32 %v1537_v43, %v7234_v59 }
 0x511   : > { %1614 = vmax.xlane.f32.xlu1 %v1613_v24  ;;  %v7368_v24 = vadd.f32 %v5748_v16, %v7277_v18  ;;  %v7383_v16 = vadd.f32 %v5751_v35, %v7229_v56 }
 0x513   : > { %1617 = vmax.xlane.f32.xlu0 %v1616_v30  ;;  %v7373_v30 = vadd.f32 %v1534_v34, %v7227_v37  ;;  %v7388_v34 = vadd.f32 %v5752_v15, %v7246_v28 }
 0x514   : > { %v5755_v46 = vpop.f32.mrb[52].mxu1 }
 0x515   : > { %v1550_v29 = vpop.f32.mrb[53].mxu1  ;;  %1620 = vmax.xlane.f32.xlu1 %v1619_v31  ;;  %v1631_v31 = vsel %vm298_vm0, %v7363_v58, -inf  ;;  %v7403_v15 = vadd.f32 %v5755_v46, %v7265_v22 }
 0x516   : > { %v5756_v54 = vpop.f32.mrb[54].mxu1  ;;  %v7393_v43 = vadd.f32 %v1550_v29, %v7258_v6 }
 0x517   : > { %v1553_v17 = vpop.f32.mrb[55].mxu1  ;;  %1623 = vmax.xlane.f32.xlu0 %v1622_v23  ;;  %v1634_v23 = vsel %vm298_vm0, %v7368_v24, -inf  ;;  %v7408_v29 = vadd.f32 %v5756_v54, %v7277_v18 }
 0x518   : > { %v7398_v35 = vadd.f32 %v1553_v17, %v7267_v2  ;;  %v1655_v17 = vsel %vm298_vm0, %v7403_v15, -inf }
 0x519   : > { %1626 = vmax.xlane.f32.xlu1 %v1625_v14  ;;  %v1637_v14 = vsel %vm298_vm0, %v7373_v30, -inf }
 0x51b   : > { %1629 = vmax.xlane.f32.xlu0 %v1628_v25  ;;  %v1640_v25 = vsel %vm298_vm0, %v7378_v11, -inf }
 0x51d   : > { %1632 = vmax.xlane.f32.xlu1 %v1631_v31  ;;  %v1643_v31 = vsel %vm298_vm0, %v7383_v16, -inf }
 0x51f   : > { %1635 = vmax.xlane.f32.xlu0 %v1634_v23  ;;  %v1646_v23 = vsel %vm298_vm0, %v7388_v34, -inf }
 0x521   : > { %1638 = vmax.xlane.f32.xlu1 %v1637_v14  ;;  %v1649_v14 = vsel %vm298_vm0, %v7393_v43, -inf }
 0x523   : > { %1641 = vmax.xlane.f32.xlu0 %v1640_v25  ;;  %v1652_v25 = vsel %vm298_vm0, %v7398_v35, -inf }
 0x525   : > { %1644 = vmax.xlane.f32.xlu1 %v1643_v31  ;;  %v1658_v31 = vsel %vm298_vm0, %v7408_v29, -inf }
 0x527   : > { %1647 = vmax.xlane.f32.xlu0 %v1646_v23 }
 0x529   : > { %1650 = vmax.xlane.f32.xlu1 %v1649_v14 }
 0x52b   : > { %1653 = vmax.xlane.f32.xlu0 %v1652_v25 }
 0x52d   : > { %1656 = vmax.xlane.f32.xlu1 %v1655_v17 }
 0x52f   : > { %1659 = vmax.xlane.f32.xlu0 %v1658_v31 }
 0x57e   : > { %v1591_v46 = vpop.xlane.xlu1 %1590 }
 0x57f   : > { %v1669_v23 = vsub.f32 %v7232_v57, %v1591_v46 }
 0x580   : > { %v1594_v2 = vpop.xlane.xlu0 %1593 }
 0x581   : > { %v1709_v14 = vmul.f32 1.442695, %v1669_v23  ;;  %v1670_v54 = vsub.f32 %v7242_v20, %v1594_v2 }
 0x582   : > { %v1597_v18 = vpop.xlane.xlu1 %1596 }
 0x583   : > { %6263 = vpow2.f32 %v1709_v14  ;;  %v1711_v22 = vmul.f32 1.442695, %v1670_v54  ;;  %v1671_v25 = vsub.f32 %v7239_v62, %v1597_v18 }
 0x584   : > { %v1600_v6 = vpop.xlane.xlu0 %1599 }
 0x585   : > { %6265 = vpow2.f32 %v1711_v22  ;;  %v1713_v28 = vmul.f32 1.442695, %v1671_v25  ;;  %v1672_v17 = vsub.f32 %v7250_v60, %v1600_v6 }
 0x586   : > { %v1603_v59 = vpop.xlane.xlu1 %1602 }
 0x587   : > { %6267 = vpow2.f32 %v1713_v28  ;;  %v1715_v31 = vmul.f32 1.442695, %v1672_v17  ;;  %v1673_v56 = vsub.f32 %v7261_v50, %v1603_v59 }
 0x588   : > { %v1606_v57 = vpop.xlane.xlu0 %1605 }
 0x589   : > { %6269 = vpow2.f32 %v1715_v31  ;;  %v1717_v46 = vmul.f32 1.442695, %v1673_v56  ;;  %v1674_v20 = vsub.f32 %v7273_v36, %v1606_v57 }
 0x58a   : > { %v1609_v2 = vpop.xlane.xlu1 %1608 }
 0x58b   : > { %6271 = vpow2.f32 %v1717_v46  ;;  %v1719_v23 = vmul.f32 1.442695, %v1674_v20  ;;  %v1675_v62 = vsub.f32 %v7270_v13, %v1609_v2 }
 0x58c   : > { %v1612_v18 = vpop.xlane.xlu0 %1611 }
 0x58d   : > { %v7423_v22 = vpop.eup %6263  ;;  %6273 = vpow2.f32 %v1719_v23  ;;  %v1721_v60 = vmul.f32 1.442695, %v1675_v62  ;;  %v1676_v28 = vsub.f32 %v7280_v39, %v1612_v18 }
 0x58e   : > { %v1567_v6 = vpop.xlane.xlu1 %1566  ;;  %v1781_v59 = vsel %vm298_vm0, %v7423_v22, 0.0 }
 0x58f   : > { %v7428_v50 = vpop.eup %6265  ;;  %6275 = vpow2.f32 %v1721_v60  ;;  %v1723_v56 = vmul.f32 1.442695, %v1676_v28  ;;  %v1661_v36 = vsub.f32 %v7286_v3, %v1567_v6  ;;  %1782 = vadd.xlane.f32.xlu1 %v1781_v59 }
 0x590   : > { %v1570_v14 = vpop.xlane.xlu0 %1569  ;;  %v1784_v13 = vsel %vm298_vm0, %v7428_v50, 0.0 }
 0x591   : > { %v7433_v54 = vpop.eup %6267  ;;  %6277 = vpow2.f32 %v1723_v56  ;;  %v1693_v25 = vmul.f32 1.442695, %v1661_v36  ;;  %v1662_v39 = vsub.f32 %v7292_v0, %v1570_v14  ;;  %1785 = vadd.xlane.f32.xlu0 %v1784_v13 }
 0x592   : > { %v1573_v17 = vpop.xlane.xlu1 %1572  ;;  %v1787_v31 = vsel %vm298_vm0, %v7433_v54, 0.0 }
 0x593   : > { %v7438_v57 = vpop.eup %6269  ;;  %6279 = vpow2.f32 %v1693_v25  ;;  %v1695_v3 = vmul.f32 1.442695, %v1662_v39  ;;  %v1663_v46 = vsub.f32 %v7298_v19, %v1573_v17  ;;  %1788 = vadd.xlane.f32.xlu1 %v1787_v31 }
 0x594   : > { %v1576_v20 = vpop.xlane.xlu0 %1575  ;;  %v1790_v2 = vsel %vm298_vm0, %v7438_v57, 0.0 }
 0x595   : > { %v7443_v23 = vpop.eup %6271  ;;  %6281 = vpow2.f32 %v1695_v3  ;;  %v1697_v0 = vmul.f32 1.442695, %v1663_v46  ;;  %v1664_v62 = vsub.f32 %v7304_v55, %v1576_v20  ;;  %1791 = vadd.xlane.f32.xlu0 %v1790_v2 }
 0x596   : > { %v1579_v18 = vpop.xlane.xlu1 %1578  ;;  %v1793_v60 = vsel %vm298_vm0, %v7443_v23, 0.0 }
 0x597   : > { %v7448_v28 = vpop.eup %6273  ;;  %6283 = vpow2.f32 %v1697_v0  ;;  %v1699_v19 = vmul.f32 1.442695, %v1664_v62  ;;  %v1665_v6 = vsub.f32 %v7310_v38, %v1579_v18  ;;  %1794 = vadd.xlane.f32.xlu1 %v1793_v60 }
 0x598   : > { %v1582_v59 = vpop.xlane.xlu0 %1581  ;;  %v1796_v56 = vsel %vm298_vm0, %v7448_v28, 0.0 }
 0x599   : > { %v7453_v36 = vpop.eup %6275  ;;  %6285 = vpow2.f32 %v1699_v19  ;;  %v1701_v55 = vmul.f32 1.442695, %v1665_v6  ;;  %v1666_v14 = vsub.f32 %v7316_v27, %v1582_v59  ;;  %1797 = vadd.xlane.f32.xlu0 %v1796_v56 }
 0x59a   : > { %v1585_v13 = vpop.xlane.xlu1 %1584  ;;  %v1799_v25 = vsel %vm298_vm0, %v7453_v36, 0.0 }
 0x59b   : > { %v7458_v39 = vpop.eup %6277  ;;  %6287 = vpow2.f32 %v1701_v55  ;;  %v1703_v38 = vmul.f32 1.442695, %v1666_v14  ;;  %v1667_v17 = vsub.f32 %v7322_v8, %v1585_v13  ;;  %1800 = vadd.xlane.f32.xlu1 %v1799_v25 }
 0x59c   : > { %v1588_v31 = vpop.xlane.xlu0 %1587  ;;  %v1802_v3 = vsel %vm298_vm0, %v7458_v39, 0.0 }
 0x59d   : > { %v7463_v46 = vpop.eup %6279  ;;  %6289 = vpow2.f32 %v1703_v38  ;;  %v1705_v27 = vmul.f32 1.442695, %v1667_v17  ;;  %v1668_v20 = vsub.f32 %v7328_v9, %v1588_v31  ;;  %1803 = vadd.xlane.f32.xlu0 %v1802_v3 }
 0x59e   : > { %v1615_v2 = vpop.xlane.xlu1 %1614  ;;  %v1757_v0 = vsel %vm298_vm0, %v7463_v46, 0.0 }
 0x59f   : > { %v7468_v62 = vpop.eup %6281  ;;  %6291 = vpow2.f32 %v1705_v27  ;;  %v1707_v8 = vmul.f32 1.442695, %v1668_v20  ;;  %v1677_v18 = vsub.f32 %v7333_v32, %v1615_v2  ;;  %1758 = vadd.xlane.f32.xlu1 %v1757_v0 }
 0x5a0   : > { %v1618_v60 = vpop.xlane.xlu0 %1617  ;;  %v1760_v19 = vsel %vm298_vm0, %v7468_v62, 0.0 }
 0x5a1   : > { %v7473_v6 = vpop.eup %6283  ;;  %6293 = vpow2.f32 %v1707_v8  ;;  %v1725_v9 = vmul.f32 1.442695, %v1677_v18  ;;  %v1678_v59 = vsub.f32 %v7338_v42, %v1618_v60  ;;  %1761 = vadd.xlane.f32.xlu0 %v1760_v19 }
 0x5a2   : > { %v1621_v56 = vpop.xlane.xlu1 %1620  ;;  %v1763_v55 = vsel %vm298_vm0, %v7473_v6, 0.0 }
 0x5a3   : > { %v7478_v14 = vpop.eup %6285  ;;  %6295 = vpow2.f32 %v1725_v9  ;;  %v1727_v32 = vmul.f32 1.442695, %v1678_v59  ;;  %v1679_v13 = vsub.f32 %v7343_v26, %v1621_v56  ;;  %1764 = vadd.xlane.f32.xlu1 %v1763_v55 }
 0x5a4   : > { %v1624_v25 = vpop.xlane.xlu0 %1623  ;;  %v1766_v38 = vsel %vm298_vm0, %v7478_v14, 0.0 }
 0x5a5   : > { %v7483_v17 = vpop.eup %6287  ;;  %6297 = vpow2.f32 %v1727_v32  ;;  %v1729_v42 = vmul.f32 1.442695, %v1679_v13  ;;  %v1680_v31 = vsub.f32 %v7348_v4, %v1624_v25  ;;  %1767 = vadd.xlane.f32.xlu0 %v1766_v38 }
 0x5a6   : > { %v1627_v3 = vpop.xlane.xlu1 %1626  ;;  %v1769_v27 = vsel %vm298_vm0, %v7483_v17, 0.0 }
 0x5a7   : > { %v7488_v20 = vpop.eup %6289  ;;  %6299 = vpow2.f32 %v1729_v42  ;;  %v1731_v26 = vmul.f32 1.442695, %v1680_v31  ;;  %v1681_v2 = vsub.f32 %v7353_v33, %v1627_v3  ;;  %1770 = vadd.xlane.f32.xlu1 %v1769_v27 }
 0x5a8   : > { %v1630_v0 = vpop.xlane.xlu0 %1629  ;;  %v1772_v8 = vsel %vm298_vm0, %v7488_v20, 0.0 }
 0x5a9   : > { %v7493_v18 = vpop.eup %6291  ;;  %6301 = vpow2.f32 %v1731_v26  ;;  %v1733_v4 = vmul.f32 1.442695, %v1681_v2  ;;  %v1682_v60 = vsub.f32 %v7358_v61, %v1630_v0  ;;  %1773 = vadd.xlane.f32.xlu0 %v1772_v8 }
 0x5aa   : > { %v1633_v19 = vpop.xlane.xlu1 %1632  ;;  %v1775_v9 = vsel %vm298_vm0, %v7493_v18, 0.0 }
 0x5ab   : > { %v7498_v59 = vpop.eup %6293  ;;  %6303 = vpow2.f32 %v1733_v4  ;;  %v1735_v33 = vmul.f32 1.442695, %v1682_v60  ;;  %v1683_v56 = vsub.f32 %v7363_v58, %v1633_v19  ;;  %1776 = vadd.xlane.f32.xlu1 %v1775_v9 }
 0x5ac   : > { %v1636_v55 = vpop.xlane.xlu0 %1635  ;;  %v1778_v32 = vsel %vm298_vm0, %v7498_v59, 0.0 }
 0x5ad   : > { %v7503_v13 = vpop.eup %6295  ;;  %6305 = vpow2.f32 %v1735_v33  ;;  %v1737_v61 = vmul.f32 1.442695, %v1683_v56  ;;  %v1684_v25 = vsub.f32 %v7368_v24, %v1636_v55  ;;  %1779 = vadd.xlane.f32.xlu0 %v1778_v32 }
 0x5ae   : > { %v1639_v38 = vpop.xlane.xlu1 %1638  ;;  %v1805_v42 = vsel %vm298_vm0, %v7503_v13, 0.0 }
 0x5af   : > { %v7508_v31 = vpop.eup %6297  ;;  %6307 = vpow2.f32 %v1737_v61  ;;  %v1739_v58 = vmul.f32 1.442695, %v1684_v25  ;;  %v1685_v3 = vsub.f32 %v7373_v30, %v1639_v38  ;;  %1806 = vadd.xlane.f32.xlu1 %v1805_v42 }
 0x5b0   : > { %v1642_v27 = vpop.xlane.xlu0 %1641  ;;  %v1808_v26 = vsel %vm298_vm0, %v7508_v31, 0.0 }
 0x5b1   : > { %v7513_v2 = vpop.eup %6299  ;;  %6309 = vpow2.f32 %v1739_v58  ;;  %v1741_v24 = vmul.f32 1.442695, %v1685_v3  ;;  %v1686_v0 = vsub.f32 %v7378_v11, %v1642_v27  ;;  %1809 = vadd.xlane.f32.xlu0 %v1808_v26 }
 0x5b2   : > { %v1645_v8 = vpop.xlane.xlu1 %1644  ;;  %v1811_v4 = vsel %vm298_vm0, %v7513_v2, 0.0 }
 0x5b3   : > { %v7518_v60 = vpop.eup %6301  ;;  %6311 = vpow2.f32 %v1741_v24  ;;  %v1743_v30 = vmul.f32 1.442695, %v1686_v0  ;;  %v1687_v19 = vsub.f32 %v7383_v16, %v1645_v8  ;;  %1812 = vadd.xlane.f32.xlu1 %v1811_v4 }
 0x5b4   : > { %v1648_v9 = vpop.xlane.xlu0 %1647  ;;  %v1814_v33 = vsel %vm298_vm0, %v7518_v60, 0.0 }
 0x5b5   : > { %v7523_v56 = vpop.eup %6303  ;;  %6313 = vpow2.f32 %v1743_v30  ;;  %v1745_v11 = vmul.f32 1.442695, %v1687_v19  ;;  %v1688_v55 = vsub.f32 %v7388_v34, %v1648_v9  ;;  %1815 = vadd.xlane.f32.xlu0 %v1814_v33 }
 0x5b6   : > { %v1651_v32 = vpop.xlane.xlu1 %1650  ;;  %v1817_v61 = vsel %vm298_vm0, %v7523_v56, 0.0 }
 0x5b7   : > { %v7528_v25 = vpop.eup %6305  ;;  %6315 = vpow2.f32 %v1745_v11  ;;  %v1747_v16 = vmul.f32 1.442695, %v1688_v55  ;;  %v1689_v38 = vsub.f32 %v7393_v43, %v1651_v32  ;;  %1818 = vadd.xlane.f32.xlu1 %v1817_v61 }
 0x5b8   : > { %v1654_v42 = vpop.xlane.xlu0 %1653  ;;  %v1820_v58 = vsel %vm298_vm0, %v7528_v25, 0.0 }
 0x5b9   : > { %v7533_v3 = vpop.eup %6307  ;;  %6317 = vpow2.f32 %v1747_v16  ;;  %v1749_v34 = vmul.f32 1.442695, %v1689_v38  ;;  %v1690_v27 = vsub.f32 %v7398_v35, %v1654_v42  ;;  %1821 = vadd.xlane.f32.xlu0 %v1820_v58 }
 0x5ba   : > { %v1657_v26 = vpop.xlane.xlu1 %1656  ;;  %v1823_v24 = vsel %vm298_vm0, %v7533_v3, 0.0 }
 0x5bb   : > { %v7538_v0 = vpop.eup %6309  ;;  %6319 = vpow2.f32 %v1749_v34  ;;  %v1751_v43 = vmul.f32 1.442695, %v1690_v27  ;;  %v1691_v8 = vsub.f32 %v7403_v15, %v1657_v26  ;;  %1824 = vadd.xlane.f32.xlu1 %v1823_v24 }
 0x5bc   : > { %v1660_v4 = vpop.xlane.xlu0 %1659  ;;  %v1826_v30 = vsel %vm298_vm0, %v7538_v0, 0.0 }
 0x5bd   : > { %v7543_v19 = vpop.eup %6311  ;;  %6321 = vpow2.f32 %v1751_v43  ;;  %v1753_v35 = vmul.f32 1.442695, %v1691_v8  ;;  %v1692_v9 = vsub.f32 %v7408_v29, %v1660_v4  ;;  %1827 = vadd.xlane.f32.xlu0 %v1826_v30 }
 0x5be   : > { %v1829_v33 = vsel %vm298_vm0, %v7543_v19, 0.0 }
 0x5bf   : > { %v7548_v11 = vpop.eup %6313  ;;  %6323 = vpow2.f32 %v1753_v35  ;;  %v1755_v55 = vmul.f32 1.442695, %v1692_v9  ;;  %1830 = vadd.xlane.f32.xlu1 %v1829_v33 }
 0x5c0   : > { %v1832_v15 = vsel %vm298_vm0, %v7548_v11, 0.0 }
 0x5c1   : > { %v7552_v32 = vpop.eup %6315  ;;  %6325 = vpow2.f32 %v1755_v55  ;;  %1833 = vadd.xlane.f32.xlu0 %v1832_v15 }
 0x5c2   : > { %v1835_v61 = vsel %vm298_vm0, %v7552_v32, 0.0 }
 0x5c3   : > { %v7556_v29 = vpop.eup %6317  ;;  %1836 = vadd.xlane.f32.xlu1 %v1835_v61 }
 0x5c4   : > { %v1838_v16 = vsel %vm298_vm0, %v7556_v29, 0.0 }
 0x5c5   : > { %v7560_v38 = vpop.eup %6319  ;;  %1839 = vadd.xlane.f32.xlu0 %v1838_v16 }
 0x5c6   : > { %v1841_v42 = vsel %vm298_vm0, %v7560_v38, 0.0 }
 0x5c7   : > { %v7564_v58 = vpop.eup %6321  ;;  %1842 = vadd.xlane.f32.xlu1 %v1841_v42 }
 0x5c8   : > { %v1844_v34 = vsel %vm298_vm0, %v7564_v58, 0.0 }
 0x5c9   : > { %v7568_v27 = vpop.eup %6323  ;;  %1845 = vadd.xlane.f32.xlu0 %v1844_v34 }
 0x5ca   : > { %v1847_v26 = vsel %vm298_vm0, %v7568_v27, 0.0 }
 0x5cb   : > { %v7572_v24 = vpop.eup %6325  ;;  %1848 = vadd.xlane.f32.xlu1 %v1847_v26 }
 0x5cc   : > { %v1850_v43 = vsel %vm298_vm0, %v7572_v24, 0.0 }
 0x5cd   : > { %1851 = vadd.xlane.f32.xlu0 %v1850_v43 }
 0x61c   : > { %v1783_v8 = vpop.xlane.xlu1 %1782 }
 0x61d   : > { %6327 = vrcp.f32 %v1783_v8 }
 0x61e   : > { %v1786_v4 = vpop.xlane.xlu0 %1785 }
 0x61f   : > { %6329 = vrcp.f32 %v1786_v4 }
 0x620   : > { %v1789_v30 = vpop.xlane.xlu1 %1788 }
 0x621   : > { %6331 = vrcp.f32 %v1789_v30 }
 0x622   : > { %v1792_v35 = vpop.xlane.xlu0 %1791 }
 0x623   : > { %6333 = vrcp.f32 %v1792_v35 }
 0x624   : > { %v1795_v9 = vpop.xlane.xlu1 %1794 }
 0x625   : > { %6335 = vrcp.f32 %v1795_v9 }
 0x626   : > { %v1798_v33 = vpop.xlane.xlu0 %1797 }
 0x627   : > { %v6328_v55 = vpop.eup %6327  ;;  %6337 = vrcp.f32 %v1798_v33 }
 0x628   : > { %v1801_v15 = vpop.xlane.xlu1 %1800  ;;  %v1893_v42 = vmul.f32 %v6328_v55, %v7423_v22  ;;  %v1934_v55 = vmul.bf16 %v7033_v12, %v7054_v10 }
 0x629   : > { %v6330_v61 = vpop.eup %6329  ;;  %6339 = vrcp.f32 %v1801_v15 }
 0x62a   : > { %v1804_v16 = vpop.xlane.xlu0 %1803  ;;  %v1894_v34 = vmul.f32 %v6330_v61, %v7428_v50 }
 0x62b   : > { %v6332_v26 = vpop.eup %6331  ;;  %6341 = vrcp.f32 %v1804_v16 }
 0x62c   : > { %v1759_v43 = vpop.xlane.xlu1 %1758  ;;  %v1921_v8 = vpack.c.bf16 %v1894_v34, %v1893_v42  ;;  %v1895_v30 = vmul.f32 %v6332_v26, %v7433_v54  ;;  %v1935_v26 = vmul.bf16 %v7082_v53, %v7054_v10 }
 0x62d   : > { %v6334_v4 = vpop.eup %6333  ;;  %6343 = vrcp.f32 %v1759_v43 }
 0x62e   : > { %v1896_v35 = vmul.f32 %v6334_v4, %v7438_v57  ;;  %v1762_v9 = vpop.xlane.xlu0 %1761  ;;  %5765 = vmatprep.mubr.msk.bf16.mxu0 %vm298_vm0, %v1921_v8 }
 0x62f   : > { %v6336_v33 = vpop.eup %6335  ;;  %6345 = vrcp.f32 %v1762_v9 }
 0x630   : > { %v1922_v15 = vpack.c.bf16 %v1896_v35, %v1895_v30  ;;  %v1765_v37 = vpop.xlane.xlu1 %1764  ;;  %v1897_v61 = vmul.f32 %v6336_v33, %v7443_v23  ;;  %v1936_v35 = vmul.bf16 %v7077_v1, %v7054_v10 }
 0x631   : > { %v6338_v22 = vpop.eup %6337  ;;  %6347 = vrcp.f32 %v1765_v37 }
 0x632   : > { %v1768_v50 = vpop.xlane.xlu0 %1767  ;;  %5766 = vmatmul.mubr.msk.bf16.vlgmr.msra.gmra.mrb[24].mxu0 %vm298_vm0, %v1922_v15  ;;  %v1898_v54 = vmul.f32 %v6338_v22, %v7448_v28 }
 0x633   : > { %v6340_v57 = vpop.eup %6339  ;;  %6349 = vrcp.f32 %v1768_v50  ;;  %5774 = vmatpush3.bf16.msra.mxu0 %v7107_v7 }
 0x634   : > { %5775 = vmatprep.subr.bf16.mxu0 %v1934_v55  ;;  %v1771_v16 = vpop.xlane.xlu1 %1770  ;;  %v1923_v42 = vpack.c.bf16 %v1898_v54, %v1897_v61  ;;  %v1899_v43 = vmul.f32 %v6340_v57, %v7453_v36 }
 0x635   : > { %v6342_v34 = vpop.eup %6341  ;;  %6351 = vrcp.f32 %v1771_v16 }
 0x636   : > { %v1774_v37 = vpop.xlane.xlu0 %1773  ;;  %5769 = vmatprep.mubr.msk.bf16.mxu0 %vm298_vm0, %v1923_v42  ;;  %v1900_v23 = vmul.f32 %v6342_v34, %v7458_v39 }
 0x637   : > { %v6344_v28 = vpop.eup %6343  ;;  %6353 = vrcp.f32 %v1774_v37  ;;  %5776 = vmatpush3.bf16.msra.mxu0 %v1934_v55 }
 0x638   : > { %5777 = vmatprep.subr.bf16.mxu0 %v1935_v26  ;;  %v1777_v7 = vpop.xlane.xlu1 %1776  ;;  %v1924_v8 = vpack.c.bf16 %v1900_v23, %v1899_v43  ;;  %v1885_v9 = vmul.f32 %v6344_v28, %v7463_v46  ;;  %v2095_v46 = vmul.bf16 %v7037_v63, %v7153_v21 }
 0x639   : > { %v6346_v4 = vpop.eup %6345  ;;  %6355 = vrcp.f32 %v1777_v7  ;;  %v2097_v7 = vmul.bf16 %v7082_v53, %v7153_v21 }
 0x63a   : > { %v1780_v30 = vpop.xlane.xlu0 %1779  ;;  %5770 = vmatmul.mubr.msk.bf16.gmra.mrb[28].mxu0 %vm298_vm0, %v1924_v8  ;;  %v1886_v36 = vmul.f32 %v6346_v4, %v7468_v62 }
 0x63b   : > { %v6348_v33 = vpop.eup %6347  ;;  %6357 = vrcp.f32 %v1780_v30  ;;  %5778 = vmatpush3.bf16.msra.mxu0 %v1935_v26 }
 0x63c   : > { %5779 = vmatprep.subr.bf16.mxu0 %v1936_v35  ;;  %v1807_v39 = vpop.xlane.xlu1 %1806  ;;  %v1917_v15 = vpack.c.bf16 %v1886_v36, %v1885_v9  ;;  %v1887_v50 = vmul.f32 %v6348_v33, %v7473_v6  ;;  %v2096_v6 = vmul.bf16 %v7033_v12, %v7153_v21  ;;  %v2098_v36 = vmul.bf16 %v7077_v1, %v7153_v21 }
 0x63d   : > { %v6350_v22 = vpop.eup %6349  ;;  %6359 = vrcp.f32 %v1807_v39 }
 0x63e   : > { %v1888_v55 = vmul.f32 %v6350_v22, %v7478_v14  ;;  %v1810_v61 = vpop.xlane.xlu0 %1809  ;;  %5781 = vmatprep.mubr.msk.bf16.mxu0 %vm298_vm0, %v1917_v15 }
 0x63f   : > { %v6352_v54 = vpop.eup %6351  ;;  %6361 = vrcp.f32 %v1810_v61  ;;  %5780 = vmatpush3.bf16.msra.mxu0 %v1936_v35 }
 0x640   : > { %v1918_v62 = vpack.c.bf16 %v1888_v55, %v1887_v50  ;;  %5789 = vmatprep.subr.bf16.mxu0 %v2095_v46  ;;  %v1813_v57 = vpop.xlane.xlu1 %1812  ;;  %v1889_v14 = vmul.f32 %v6352_v54, %v7483_v17 }
 0x641   : > { %v6354_v16 = vpop.eup %6353  ;;  %6363 = vrcp.f32 %v1813_v57 }
 0x642   : > { %v1816_v42 = vpop.xlane.xlu0 %1815  ;;  %5782 = vmatmul.mubr.msk.bf16.vlgmr.msra.gmra.mrb[24].mxu0 %vm298_vm0, %v1918_v62  ;;  %v1890_v34 = vmul.f32 %v6354_v16, %v7488_v20 }
 0x643   : > { %v6356_v37 = vpop.eup %6355  ;;  %6365 = vrcp.f32 %v1816_v42  ;;  %5790 = vmatpush3.bf16.msra.mxu0 %v2095_v46 }
 0x644   : > { %5791 = vmatprep.subr.bf16.mxu0 %v2096_v6  ;;  %v1819_v26 = vpop.xlane.xlu1 %1818  ;;  %v1919_v43 = vpack.c.bf16 %v1890_v34, %v1889_v14  ;;  %v1891_v8 = vmul.f32 %v6356_v37, %v7493_v18  ;;  %v2186_v37 = vmul.bf16 %v7082_v53, %v7172_v5 }
 0x645   : > { %v6358_v23 = vpop.eup %6357  ;;  %6367 = vrcp.f32 %v1819_v26 }
 0x646   : > { %v1822_v28 = vpop.xlane.xlu0 %1821  ;;  %5785 = vmatprep.mubr.msk.bf16.mxu0 %vm298_vm0, %v1919_v43  ;;  %v1892_v17 = vmul.f32 %v6358_v23, %v7498_v59 }
 0x647   : > { %v6360_v4 = vpop.eup %6359  ;;  %6369 = vrcp.f32 %v1822_v28  ;;  %5792 = vmatpush3.bf16.msra.mxu0 %v2096_v6 }
 0x648   : > { %5793 = vmatprep.subr.bf16.mxu0 %v2097_v7  ;;  %v1825_v20 = vpop.xlane.xlu1 %1824  ;;  %v1920_v30 = vpack.c.bf16 %v1892_v17, %v1891_v8  ;;  %v1901_v33 = vmul.f32 %v6360_v4, %v7503_v13  ;;  %v2184_v13 = vmul.bf16 %v7037_v63, %v7172_v5  ;;  %v6213_v17 = vld [vmem:[#allocation2 + $0x30] sm:$0xff]  }
 0x649   : > { %v6362_v35 = vpop.eup %6361  ;;  %6371 = vrcp.f32 %v1825_v20 }
 0x64a   : > { %v1828_v9 = vpop.xlane.xlu0 %1827  ;;  %5786 = vmatmul.mubr.msk.bf16.gmra.mrb[28].mxu0 %vm298_vm0, %v1920_v30  ;;  %v1902_v18 = vmul.f32 %v6362_v35, %v7508_v31 }
 0x64b   : > { %v6364_v39 = vpop.eup %6363  ;;  %6373 = vrcp.f32 %v1828_v9  ;;  %5794 = vmatpush3.bf16.msra.mxu0 %v2097_v7  ;;  %v2187_v7 = vmul.bf16 %v7077_v1, %v7172_v5 }
 0x64c   : > { %5795 = vmatprep.subr.bf16.mxu0 %v2098_v36  ;;  %v1831_v59 = vpop.xlane.xlu1 %1830  ;;  %v1925_v15 = vpack.c.bf16 %v1902_v18, %v1901_v33  ;;  %v1903_v50 = vmul.f32 %v6364_v39, %v7513_v2  ;;  %v2185_v2 = vmul.bf16 %v7033_v12, %v7172_v5 }
 0x64d   : > { %v6366_v22 = vpop.eup %6365  ;;  %6375 = vrcp.f32 %v1831_v59 }
 0x64e   : > { %v1904_v55 = vmul.f32 %v6366_v22, %v7518_v60  ;;  %v1834_v61 = vpop.xlane.xlu0 %1833  ;;  %5797 = vmatprep.mubr.msk.bf16.mxu0 %vm298_vm0, %v1925_v15 }
 0x64f   : > { %v6368_v46 = vpop.eup %6367  ;;  %6377 = vrcp.f32 %v1834_v61  ;;  %5796 = vmatpush3.bf16.msra.mxu0 %v2098_v36 }
 0x650   : > { %v1926_v31 = vpack.c.bf16 %v1904_v55, %v1903_v50  ;;  %5805 = vmatprep.subr.bf16.mxu0 %v2184_v13  ;;  %v1837_v54 = vpop.xlane.xlu1 %1836  ;;  %v1905_v60 = vmul.f32 %v6368_v46, %v7523_v56 }
 0x651   : > { %v6370_v62 = vpop.eup %6369  ;;  %6379 = vrcp.f32 %v1837_v54  ;;  %v5266_v54 = vld [vmem:[%s8628_s2 + $0x2] ss:$0 sm:$0xff] }
 0x652   : > { %v1840_v57 = vpop.xlane.xlu0 %1839  ;;  %5798 = vmatmul.mubr.msk.bf16.vlgmr.msra.gmra.mrb[24].mxu0 %vm298_vm0, %v1926_v31  ;;  %v1906_v16 = vmul.f32 %v6370_v62, %v7528_v25 }
 0x653   : > { %v6372_v42 = vpop.eup %6371  ;;  %6381 = vrcp.f32 %v1840_v57  ;;  %5806 = vmatpush3.bf16.msra.mxu0 %v2184_v13 }
 0x654   : > { %5807 = vmatprep.subr.bf16.mxu0 %v2185_v2  ;;  %v1843_v63 = vpop.xlane.xlu1 %1842  ;;  %v1927_v6 = vpack.c.bf16 %v1906_v16, %v1905_v60  ;;  %v1907_v12 = vmul.f32 %v6372_v42, %v7533_v3 }
 0x655   : > { %v6374_v14 = vpop.eup %6373  ;;  %6383 = vrcp.f32 %v1843_v63 }
 0x656   : > { %v1846_v34 = vpop.xlane.xlu0 %1845  ;;  %5801 = vmatprep.mubr.msk.bf16.mxu0 %vm298_vm0, %v1927_v6  ;;  %v1908_v56 = vmul.f32 %v6374_v14, %v7538_v0 }
 0x657   : > { %v6376_v26 = vpop.eup %6375  ;;  %6385 = vrcp.f32 %v1846_v34  ;;  %5808 = vmatpush3.bf16.msra.mxu0 %v2185_v2 }
 0x658   : > { %5809 = vmatprep.subr.bf16.mxu0 %v2186_v37  ;;  %v1849_v25 = vpop.xlane.xlu1 %1848  ;;  %v1928_v43 = vpack.c.bf16 %v1908_v56, %v1907_v12  ;;  %v1909_v53 = vmul.f32 %v6376_v26, %v7543_v19  ;;  %v6214_v19 = vld [vmem:[#allocation2 + $0x38] sm:$0xff]  }
 0x659   : > { %v6378_v23 = vpop.eup %6377  ;;  %6387 = vrcp.f32 %v1849_v25 }
 0x65a   : > { %v1852_v28 = vpop.xlane.xlu0 %1851  ;;  %5802 = vmatmul.mubr.msk.bf16.gmra.mrb[28].mxu0 %vm298_vm0, %v1928_v43  ;;  %v1910_v3 = vmul.f32 %v6378_v23, %v7548_v11 }
 0x65b   : > { %v6380_v8 = vpop.eup %6379  ;;  %6389 = vrcp.f32 %v1852_v28  ;;  %5810 = vmatpush3.bf16.msra.mxu0 %v2186_v37 }
 0x65c   : > { %5811 = vmatprep.subr.bf16.mxu0 %v2187_v7  ;;  %v1929_v0 = vpack.c.bf16 %v1910_v3, %v1909_v53  ;;  %v1911_v20 = vmul.f32 %v6380_v8, %v7552_v32 }
 0x65d   : > { %v6382_v4 = vpop.eup %6381 }
 0x65e   : > { %v1912_v30 = vmul.f32 %v6382_v4, %v7556_v29  ;;  %5813 = vmatprep.mubr.msk.bf16.mxu0 %vm298_vm0, %v1929_v0 }
 0x65f   : > { %v6384_v35 = vpop.eup %6383  ;;  %5812 = vmatpush3.bf16.msra.mxu0 %v2187_v7 }
 0x660   : > { %v1930_v1 = vpack.c.bf16 %v1912_v30, %v1911_v20  ;;  %5821 = vmatprep.subr.bf16.mxu0 %v6213_v17  ;;  %v1913_v11 = vmul.f32 %v6384_v35, %v7560_v38  ;;  %v6215_v20 = vld [vmem:[#allocation2 + $0x60] sm:$0xff]   ;;  %v6216_v30 = vld [vmem:[#allocation2 + $0x68] sm:$0xff]  }
 0x661   : > { %v6386_v9 = vpop.eup %6385  ;;  %5833 = vmatprep.subr.bf16.mxu1 %v6215_v20 }
 0x662   : > { %5814 = vmatmul.mubr.msk.bf16.vlgmr.msra.gmra.mrb[24].mxu0 %vm298_vm0, %v1930_v1  ;;  %v1914_v36 = vmul.f32 %v6386_v9, %v7564_v58  ;;  %5834 = vmatpush3.bf16.msra.mxu1 %v6215_v20 }
 0x663   : > { %v6388_v33 = vpop.eup %6387  ;;  %5822 = vmatpush3.bf16.msra.mxu0 %v6213_v17  ;;  %5835 = vmatprep.subr.bf16.mxu1 %v6216_v30 }
 0x664   : > { %v1931_v18 = vpack.c.bf16 %v1914_v36, %v1913_v11  ;;  %5823 = vmatprep.subr.bf16.mxu0 %v6214_v19  ;;  %v1915_v29 = vmul.f32 %v6388_v33, %v7568_v27 }
 0x665   : > { %v6390_v32 = vpop.eup %6389 }
 0x666   : > { %5817 = vmatprep.mubr.msk.bf16.mxu0 %vm298_vm0, %v1931_v18  ;;  %v1916_v39 = vmul.f32 %v6390_v32, %v7572_v24  ;;  %5836 = vmatpush3.bf16.msra.mxu1 %v6216_v30 }
 0x667   : > { %5824 = vmatpush3.bf16.msra.mxu0 %v6214_v19 }
 0x668   : > { %v1932_v59 = vpack.c.bf16 %v1916_v39, %v1915_v29 }
 0x66a   : > { %5818 = vmatmul.mubr.msk.bf16.gmra.mrb[28].mxu0 %vm298_vm0, %v1932_v59 }
 0x735   : > { %v5815_v15 = vpop.f32.mrb[24].mxu0 }
 0x736   : > { %v2234_v22 = vpop.f32.mrb[25].mxu0 }
 0x737   : > { %v5816_v38 = vpop.f32.mrb[26].mxu0 }
 0x738   : > { %v2274_v50 = vpack.c.bf16 %v5816_v38, %v5815_v15  ;;  %v2237_v58 = vpop.f32.mrb[27].mxu0 }
 0x739   : > { %v2273_v55 = vpack.c.bf16 %v2237_v58, %v2234_v22 }
 0x73b   : > { %5825 = vmatprep.mubr.msk.bf16.mxu0 %vm737_vm9, %v2273_v55 }
 0x73c   : > { %5826 = vmatmul.mubr.msk.bf16.vlgmr.msra.gmra.mrb[32].mxu0 %vm737_vm9, %v2274_v50 }
 0x73d   : > { %v5819_v61 = vpop.f32.mrb[28].mxu0 }
 0x73e   : > { %v2250_v13 = vpop.f32.mrb[29].mxu0 }
 0x73f   : > { %v5820_v46 = vpop.f32.mrb[30].mxu0 }
 0x740   : > { %v2276_v27 = vpack.c.bf16 %v5820_v46, %v5819_v61  ;;  %v2253_v31 = vpop.f32.mrb[31].mxu0 }
 0x741   : > { %v2275_v24 = vpack.c.bf16 %v2253_v31, %v2250_v13 }
 0x743   : > { %5829 = vmatprep.mubr.msk.bf16.mxu0 %vm737_vm9, %v2275_v24 }
 0x744   : > { %5830 = vmatmul.mubr.msk.bf16.gmra.mrb[36].mxu0 %vm737_vm9, %v2276_v27 }
 0x80f   : > { %v5827_v62 = vpop.f32.mrb[32].mxu0 }
 0x810   : > { %v2348_v57 = vadd.f32 %v5827_v62, %v5266_v54  ;;  %v2339_v2 = vpop.f32.mrb[33].mxu0 }
 0x811   : > { %v2340_v60 = vadd.f32 %v5266_v54, %v2339_v2  ;;  %v5828_v16 = vpop.f32.mrb[34].mxu0 }
 0x812   : > { %v7655_v42 = vadd.f32 %v2348_v57, %v6871_v45  ;;  %v2351_v63 = vadd.f32 %v5828_v16, %v5266_v54  ;;  %v2342_v6 = vpop.f32.mrb[35].mxu0 }
 0x813   : > { %v7658_v14 = vadd.f32 %v2340_v60, %v6863_v41  ;;  %v2343_v34 = vadd.f32 %v5266_v54, %v2342_v6 }
 0x814   : > { %v7661_v37 = vadd.f32 %v6869_v44, %v2351_v63  ;;  %v2384_v44 = vsel %vm737_vm9, %v7655_v42, 0.0 }
 0x815   : > { %v7664_v12 = vadd.f32 %v6861_v40, %v2343_v34  ;;  %v2378_v56 = vsel %vm737_vm9, %v7658_v14, 0.0 }
 0x816   : > { %2379 = vadd.xlane.f32.xlu1 %v2378_v56  ;;  %v2387_v8 = vsel %vm737_vm9, %v7661_v37, 0.0 }
 0x817   : > { %v5831_v26 = vpop.f32.mrb[36].mxu0  ;;  %v2381_v45 = vsel %vm737_vm9, %v7664_v12, 0.0 }
 0x818   : > { %v2364_v25 = vadd.f32 %v5831_v26, %v5266_v54  ;;  %2382 = vadd.xlane.f32.xlu0 %v2381_v45  ;;  %v2355_v43 = vpop.f32.mrb[37].mxu0 }
 0x819   : > { %v2356_v41 = vadd.f32 %v5266_v54, %v2355_v43  ;;  %v5832_v23 = vpop.f32.mrb[38].mxu0 }
 0x81a   : > { %v7673_v28 = vadd.f32 %v2364_v25, %v6885_v52  ;;  %v2367_v40 = vadd.f32 %v5832_v23, %v5266_v54  ;;  %2385 = vadd.xlane.f32.xlu1 %v2384_v44  ;;  %v2358_v7 = vpop.f32.mrb[39].mxu0  ;;  %v6217_v23 = vld [vmem:[#allocation2 + $0x70] sm:$0xff]   ;;  %v6218_v44 = vld [vmem:[#allocation2 + $0x78] sm:$0xff]  }
 0x81b   : > { %v7676_v53 = vadd.f32 %v2356_v41, %v6877_v48  ;;  %v2359_v3 = vadd.f32 %v5266_v54, %v2358_v7  ;;  %5845 = vmatprep.subr.bf16.mxu0 %v6217_v23 }
 0x81c   : > { %v7681_v0 = vadd.f32 %v6883_v51, %v2367_v40  ;;  %2388 = vadd.xlane.f32.xlu0 %v2387_v8  ;;  %v2396_v48 = vsel %vm737_vm9, %v7673_v28, 0.0  ;;  %5846 = vmatpush3.bf16.msra.mxu0 %v6217_v23 }
 0x81d   : > { %v7684_v17 = vadd.f32 %v6875_v47, %v2359_v3  ;;  %v2390_v52 = vsel %vm737_vm9, %v7676_v53, 0.0  ;;  %5847 = vmatprep.subr.bf16.mxu0 %v6218_v44 }
 0x81e   : > { %2391 = vadd.xlane.f32.xlu1 %v2390_v52  ;;  %v2399_v51 = vsel %vm737_vm9, %v7681_v0, 0.0 }
 0x81f   : > { %v2393_v4 = vsel %vm737_vm9, %v7684_v17, 0.0 }
 0x820   : > { %2394 = vadd.xlane.f32.xlu0 %v2393_v4  ;;  %5848 = vmatpush3.bf16.msra.mxu0 %v6218_v44 }
 0x822   : > { %2397 = vadd.xlane.f32.xlu1 %v2396_v48 }
 0x824   : > { %2400 = vadd.xlane.f32.xlu0 %v2399_v51 }
 0x8a3   : > { %v2380_v47 = vpop.xlane.xlu1 %2379 }
 0x8a4   : > { %v2402_v35 = vmul.f32 0.03125, %v2380_v47 }
 0x8a5   : > { %v2383_v1 = vpop.xlane.xlu0 %2382 }
 0x8a6   : > { %v7695_v19 = vsub.f32 %v7658_v14, %v2402_v35  ;;  %v2403_v9 = vmul.f32 0.03125, %v2383_v1 }
 0x8a7   : > { %v2386_v11 = vpop.xlane.xlu1 %2385 }
 0x8a8   : > { %v7698_v36 = vsub.f32 %v7664_v12, %v2403_v9  ;;  %v2404_v33 = vmul.f32 0.03125, %v2386_v11  ;;  %v2418_v18 = vmul.f32 %v7695_v19, %v7695_v19 }
 0x8a9   : > { %v2389_v32 = vpop.xlane.xlu0 %2388 }
 0x8aa   : > { %v7703_v29 = vsub.f32 %v7655_v42, %v2404_v33  ;;  %v2405_v39 = vmul.f32 0.03125, %v2389_v32  ;;  %v2426_v59 = vsel %vm737_vm9, %v2418_v18, 0.0  ;;  %v2419_v15 = vmul.f32 %v7698_v36, %v7698_v36 }
 0x8ab   : > { %2427 = vadd.xlane.f32.xlu1 %v2426_v59  ;;  %v2392_v22 = vpop.xlane.xlu1 %2391 }
 0x8ac   : > { %v7709_v38 = vsub.f32 %v7661_v37, %v2405_v39  ;;  %v2406_v50 = vmul.f32 0.03125, %v2392_v22  ;;  %v2429_v58 = vsel %vm737_vm9, %v2419_v15, 0.0  ;;  %v2420_v55 = vmul.f32 %v7703_v29, %v7703_v29 }
 0x8ad   : > { %2430 = vadd.xlane.f32.xlu0 %v2429_v58  ;;  %v2395_v61 = vpop.xlane.xlu0 %2394 }
 0x8ae   : > { %v7715_v13 = vsub.f32 %v7676_v53, %v2406_v50  ;;  %v2407_v46 = vmul.f32 0.03125, %v2395_v61  ;;  %v2432_v27 = vsel %vm737_vm9, %v2420_v55, 0.0  ;;  %v2421_v31 = vmul.f32 %v7709_v38, %v7709_v38  ;;  %v5273_v50 = vld [vmem:[%s8628_s2 + $0x3] ss:$0 sm:$0xff] }
 0x8af   : > { %2433 = vadd.xlane.f32.xlu1 %v2432_v27  ;;  %v2398_v24 = vpop.xlane.xlu1 %2397 }
 0x8b0   : > { %v7721_v54 = vsub.f32 %v7684_v17, %v2407_v46  ;;  %v2408_v62 = vmul.f32 0.03125, %v2398_v24  ;;  %v2435_v57 = vsel %vm737_vm9, %v2421_v31, 0.0  ;;  %v2422_v2 = vmul.f32 %v7715_v13, %v7715_v13 }
 0x8b1   : > { %2436 = vadd.xlane.f32.xlu0 %v2435_v57  ;;  %v2401_v60 = vpop.xlane.xlu0 %2400  ;;  %v5274_v57 = vld [vmem:[%s8628_s2 + $0x4] ss:$0 sm:$0xff] }
 0x8b2   : > { %v7727_v16 = vsub.f32 %v7673_v28, %v2408_v62  ;;  %v2409_v63 = vmul.f32 0.03125, %v2401_v60  ;;  %v2438_v6 = vsel %vm737_vm9, %v2422_v2, 0.0  ;;  %v2423_v34 = vmul.f32 %v7721_v54, %v7721_v54 }
 0x8b3   : > { %2439 = vadd.xlane.f32.xlu1 %v2438_v6 }
 0x8b4   : > { %v7733_v56 = vsub.f32 %v7681_v0, %v2409_v63  ;;  %v2441_v26 = vsel %vm737_vm9, %v2423_v34, 0.0  ;;  %v2424_v45 = vmul.f32 %v7727_v16, %v7727_v16 }
 0x8b5   : > { %2442 = vadd.xlane.f32.xlu0 %v2441_v26 }
 0x8b6   : > { %v2444_v25 = vsel %vm737_vm9, %v2424_v45, 0.0  ;;  %v2425_v43 = vmul.f32 %v7733_v56, %v7733_v56 }
 0x8b7   : > { %2445 = vadd.xlane.f32.xlu1 %v2444_v25 }
 0x8b8   : > { %v2447_v41 = vsel %vm737_vm9, %v2425_v43, 0.0 }
 0x8b9   : > { %2448 = vadd.xlane.f32.xlu0 %v2447_v41 }
 0x938   : > { %v2428_v40 = vpop.xlane.xlu1 %2427 }
 0x939   : > { %v2450_v7 = vmul.f32 0.03125, %v2428_v40 }
 0x93a   : > { %v2431_v3 = vpop.xlane.xlu0 %2430 }
 0x93b   : > { %v2458_v8 = vadd.f32 1e-05, %v2450_v7  ;;  %v2451_v52 = vmul.f32 0.03125, %v2431_v3 }
 0x93c   : > { %v2434_v4 = vpop.xlane.xlu1 %2433 }
 0x93d   : > { %6391 = vrsqrt.f32 %v2458_v8  ;;  %v2459_v48 = vadd.f32 1e-05, %v2451_v52  ;;  %v2452_v51 = vmul.f32 0.03125, %v2434_v4 }
 0x93e   : > { %v2437_v20 = vpop.xlane.xlu0 %2436 }
 0x93f   : > { %6393 = vrsqrt.f32 %v2459_v48  ;;  %v2460_v30 = vadd.f32 1e-05, %v2452_v51  ;;  %v2453_v47 = vmul.f32 0.03125, %v2437_v20 }
 0x940   : > { %v2440_v35 = vpop.xlane.xlu1 %2439 }
 0x941   : > { %6395 = vrsqrt.f32 %v2460_v30  ;;  %v2461_v1 = vadd.f32 1e-05, %v2453_v47  ;;  %v2454_v9 = vmul.f32 0.03125, %v2440_v35 }
 0x942   : > { %v2443_v11 = vpop.xlane.xlu0 %2442 }
 0x943   : > { %6397 = vrsqrt.f32 %v2461_v1  ;;  %v2462_v33 = vadd.f32 1e-05, %v2454_v9  ;;  %v2455_v18 = vmul.f32 0.03125, %v2443_v11  ;;  %v6219_v1 = vld [vmem:[#allocation2 + $0x80] sm:$0xff]   ;;  %v6221_v9 = vld [vmem:[#allocation2 + $0x90] sm:$0xff]  }
 0x944   : > { %v2446_v32 = vpop.xlane.xlu1 %2445  ;;  %5849 = vmatprep.subr.bf16.mxu0 %v6219_v1  ;;  %v6223_v11 = vld [vmem:[#allocation2 + $0xa0] sm:$0xff]  }
 0x945   : > { %6399 = vrsqrt.f32 %v2462_v33  ;;  %v2463_v39 = vadd.f32 1e-05, %v2455_v18  ;;  %v2456_v59 = vmul.f32 0.03125, %v2446_v32  ;;  %5850 = vmatpush3.bf16.msra.mxu0 %v6219_v1  ;;  %v6224_v33 = vld [vmem:[#allocation2 + $0xa8] sm:$0xff]   ;;  %v5275_v18 = vld [vmem:[%s8628_s2 + $0x6] ss:$0 sm:$0xff] }
 0x946   : > { %v2449_v15 = vpop.xlane.xlu0 %2448 }
 0x947   : > { %v6392_v22 = vpop.eup %6391  ;;  %6401 = vrsqrt.f32 %v2463_v39  ;;  %v2464_v58 = vadd.f32 1e-05, %v2456_v59  ;;  %v2457_v55 = vmul.f32 0.03125, %v2449_v15 }
 0x948   : > { %v2474_v61 = vmul.f32 %v6392_v22, %v7695_v19 }
 0x949   : > { %v6394_v46 = vpop.eup %6393  ;;  %6403 = vrsqrt.f32 %v2464_v58  ;;  %v2465_v27 = vadd.f32 1e-05, %v2457_v55 }
 0x94a   : > { %v2475_v31 = vmul.f32 %v6394_v46, %v7698_v36  ;;  %v2486_v24 = vmul.f32 %v5273_v50, %v2474_v61 }
 0x94b   : > { %v6396_v62 = vpop.eup %6395  ;;  %6405 = vrsqrt.f32 %v2465_v27 }
 0x94c   : > { %v2476_v2 = vmul.f32 %v6396_v62, %v7703_v29  ;;  %v2487_v60 = vmul.f32 %v5273_v50, %v2475_v31  ;;  %v2498_v19 = vadd.f32 %v5274_v57, %v2486_v24 }
 0x94d   : > { %v6398_v63 = vpop.eup %6397 }
 0x94e   : > { %v2488_v6 = vmul.f32 %v5273_v50, %v2476_v2  ;;  %v2477_v34 = vmul.f32 %v6398_v63, %v7709_v38  ;;  %v2499_v26 = vadd.f32 %v5274_v57, %v2487_v60 }
 0x94f   : > { %v6400_v45 = vpop.eup %6399 }
 0x950   : > { %v2489_v25 = vmul.f32 %v5273_v50, %v2477_v34  ;;  %v2506_v43 = vpack.c.bf16 %v2499_v26, %v2498_v19  ;;  %v2478_v36 = vmul.f32 %v6400_v45, %v7715_v13  ;;  %v2500_v23 = vadd.f32 %v5274_v57, %v2488_v6 }
 0x951   : > { %v6402_v41 = vpop.eup %6401 }
 0x952   : > { %v2501_v44 = vadd.f32 %v5274_v57, %v2489_v25  ;;  %5837 = vmatprep.mubr.msk.bf16.mxu1 %vm737_vm9, %v2506_v43  ;;  %v2479_v40 = vmul.f32 %v6402_v41, %v7721_v54  ;;  %v2490_v29 = vmul.f32 %v5273_v50, %v2478_v36 }
 0x953   : > { %v6404_v7 = vpop.eup %6403 }
 0x954   : > { %v2507_v3 = vpack.c.bf16 %v2501_v44, %v2500_v23  ;;  %v2491_v8 = vmul.f32 %v5273_v50, %v2479_v40  ;;  %v2480_v38 = vmul.f32 %v6404_v7, %v7727_v16  ;;  %v2502_v4 = vadd.f32 %v5274_v57, %v2490_v29  ;;  %v6220_v16 = vld [vmem:[#allocation2 + $0x88] sm:$0xff]  }
 0x955   : > { %v6406_v52 = vpop.eup %6405  ;;  %5851 = vmatprep.subr.bf16.mxu0 %v6220_v16 }
 0x956   : > { %5838 = vmatmul.mubr.msk.bf16.vlgmr.msra.gmra.mrb[56].mxu1 %vm737_vm9, %v2507_v3  ;;  %v2503_v48 = vadd.f32 %v5274_v57, %v2491_v8  ;;  %v2481_v13 = vmul.f32 %v6406_v52, %v7733_v56  ;;  %v2492_v51 = vmul.f32 %v5273_v50, %v2480_v38  ;;  %5852 = vmatpush3.bf16.msra.mxu0 %v6220_v16  ;;  %v6222_v56 = vld [vmem:[#allocation2 + $0x98] sm:$0xff]  }
 0x957   : > { %5853 = vmatprep.subr.bf16.mxu0 %v6221_v9 }
 0x958   : > { %v2508_v20 = vpack.c.bf16 %v2503_v48, %v2502_v4  ;;  %v2493_v30 = vmul.f32 %v5273_v50, %v2481_v13  ;;  %v2504_v47 = vadd.f32 %v5274_v57, %v2492_v51 }
 0x95a   : > { %5841 = vmatprep.mubr.msk.bf16.mxu1 %vm737_vm9, %v2508_v20  ;;  %v2505_v54 = vadd.f32 %v5274_v57, %v2493_v30  ;;  %5854 = vmatpush3.bf16.msra.mxu0 %v6221_v9 }
 0x95b   : > { %5855 = vmatprep.subr.bf16.mxu0 %v6222_v56 }
 0x95c   : > { %v2509_v35 = vpack.c.bf16 %v2505_v54, %v2504_v47 }
 0x95e   : > { %5842 = vmatmul.mubr.msk.bf16.gmra.mrb[60].mxu1 %vm737_vm9, %v2509_v35  ;;  %5856 = vmatpush3.bf16.msra.mxu0 %v6222_v56 }
 0x95f   : > { %5857 = vmatprep.subr.bf16.mxu0 %v6223_v11 }
 0x962   : > { %5858 = vmatpush3.bf16.msra.mxu0 %v6223_v11 }
 0x963   : > { %5859 = vmatprep.subr.bf16.mxu0 %v6224_v33 }
 0x966   : > { %5860 = vmatpush3.bf16.msra.mxu0 %v6224_v33 }
 0xa29   : > { %v5839_v32 = vpop.f32.mrb[56].mxu1 }
 0xa2a   : > { %v2581_v39 = vadd.f32 %v5839_v32, %v5275_v18  ;;  %v2572_v59 = vpop.f32.mrb[57].mxu1 }
 0xa2b   : > { %v2573_v15 = vadd.f32 %v5275_v18, %v2572_v59  ;;  %v5840_v22 = vpop.f32.mrb[58].mxu1 }
 0xa2c   : > { %v2613_v50 = vmul.f32 0.70710677, %v2581_v39  ;;  %v2584_v58 = vadd.f32 %v5840_v22, %v5275_v18  ;;  %v2575_v55 = vpop.f32.mrb[59].mxu1  ;;  %v2605_v29 = vmul.f32 0.5, %v2581_v39 }
 0xa2d   : > { %v2611_v61 = vmul.f32 0.70710677, %v2573_v15  ;;  %v2576_v46 = vadd.f32 %v5275_v18, %v2575_v55  ;;  %v2603_v8 = vmul.f32 0.5, %v2573_v15 }
 0xa2e   : > { %6407 = verf.f32 %v2613_v50  ;;  %v2614_v27 = vmul.f32 0.70710677, %v2584_v58  ;;  %v2606_v7 = vmul.f32 0.5, %v2584_v58 }
 0xa2f   : > { %6409 = verf.f32 %v2611_v61  ;;  %v2612_v31 = vmul.f32 0.70710677, %v2576_v46  ;;  %v2604_v38 = vmul.f32 0.5, %v2576_v46  ;;  %v5282_v61 = vld [vmem:[%s8628_s2 + $0x5] ss:$0 sm:$0xff] }
 0xa30   : > { %6411 = verf.f32 %v2614_v27 }
 0xa31   : > { %6413 = verf.f32 %v2612_v31  ;;  %v5843_v24 = vpop.f32.mrb[60].mxu1 }
 0xa32   : > { %v2597_v62 = vadd.f32 %v5843_v24, %v5275_v18  ;;  %v2588_v57 = vpop.f32.mrb[61].mxu1 }
 0xa33   : > { %v2589_v2 = vadd.f32 %v5275_v18, %v2588_v57  ;;  %v5844_v60 = vpop.f32.mrb[62].mxu1 }
 0xa34   : > { %v2617_v63 = vmul.f32 0.70710677, %v2597_v62  ;;  %v2600_v6 = vadd.f32 %v5844_v60, %v5275_v18  ;;  %v2591_v34 = vpop.f32.mrb[63].mxu1  ;;  %v2609_v56 = vmul.f32 0.5, %v2597_v62 }
 0xa35   : > { %v2615_v19 = vmul.f32 0.70710677, %v2589_v2  ;;  %v2592_v26 = vadd.f32 %v5275_v18, %v2591_v34  ;;  %v2607_v18 = vmul.f32 0.5, %v2589_v2 }
 0xa36   : > { %6415 = verf.f32 %v2617_v63  ;;  %v2618_v45 = vmul.f32 0.70710677, %v2600_v6  ;;  %v2610_v11 = vmul.f32 0.5, %v2600_v6 }
 0xa37   : > { %6417 = verf.f32 %v2615_v19  ;;  %v2616_v25 = vmul.f32 0.70710677, %v2592_v26  ;;  %v2608_v32 = vmul.f32 0.5, %v2592_v26 }
 0xa38   : > { %v6408_v43 = vpop.eup %6407  ;;  %6419 = verf.f32 %v2618_v45 }
 0xa39   : > { %v6410_v36 = vpop.eup %6409  ;;  %v2629_v41 = vadd.f32 1.0, %v6408_v43  ;;  %6421 = verf.f32 %v2616_v25 }
 0xa3a   : > { %v6412_v23 = vpop.eup %6411  ;;  %v2627_v44 = vadd.f32 1.0, %v6410_v36 }
 0xa3b   : > { %v6414_v40 = vpop.eup %6413  ;;  %v2630_v3 = vadd.f32 1.0, %v6412_v23  ;;  %v2637_v4 = vmul.f32 %v2629_v41, %v2605_v29 }
 0xa3c   : > { %v2628_v52 = vadd.f32 1.0, %v6414_v40  ;;  %v2635_v13 = vmul.f32 %v2627_v44, %v2603_v8 }
 0xa3d   : > { %v2638_v48 = vmul.f32 %v2630_v3, %v2606_v7 }
 0xa3e   : > { %v2636_v51 = vmul.f32 %v2628_v52, %v2604_v38 }
 0xa3f   : > { %v2644_v20 = vpack.c.bf16 %v2638_v48, %v2637_v4 }
 0xa40   : > { %v6416_v30 = vpop.eup %6415  ;;  %v2643_v47 = vpack.c.bf16 %v2636_v51, %v2635_v13 }
 0xa41   : > { %v6418_v54 = vpop.eup %6417  ;;  %v2633_v35 = vadd.f32 1.0, %v6416_v30 }
 0xa42   : > { %v6420_v1 = vpop.eup %6419  ;;  %v2631_v16 = vadd.f32 1.0, %v6418_v54  ;;  %5861 = vmatprep.mubr.bf16.mxu0 %v2643_v47 }
 0xa43   : > { %v6422_v9 = vpop.eup %6421  ;;  %v2634_v33 = vadd.f32 1.0, %v6420_v1  ;;  %5862 = vmatmul.mubr.bf16.vlgmr.msra.gmra.mrb[40].mxu0 %v2644_v20  ;;  %v2641_v59 = vmul.f32 %v2633_v35, %v2609_v56 }
 0xa44   : > { %v2632_v39 = vadd.f32 1.0, %v6422_v9  ;;  %v2639_v22 = vmul.f32 %v2631_v16, %v2607_v18 }
 0xa45   : > { %v2642_v15 = vmul.f32 %v2634_v33, %v2610_v11 }
 0xa46   : > { %v2640_v50 = vmul.f32 %v2632_v39, %v2608_v32 }
 0xa47   : > { %v2646_v58 = vpack.c.bf16 %v2642_v15, %v2641_v59 }
 0xa48   : > { %v2645_v55 = vpack.c.bf16 %v2640_v50, %v2639_v22 }
 0xa4a   : > { %5865 = vmatprep.mubr.bf16.mxu0 %v2645_v55 }
 0xa4b   : > { %5866 = vmatmul.mubr.bf16.gmra.mrb[44].mxu0 %v2646_v58 }
 0xb16   : > { %v5863_v46 = vpop.f32.mrb[40].mxu0 }
 0xb17   : > { %v2733_v27 = vpop.f32.mrb[41].mxu0  ;;  %v2742_v31 = vadd.f32 %v5863_v46, %v5282_v61 }
 0xb18   : > { %v2734_v24 = vadd.f32 %v5282_v61, %v2733_v27  ;;  %v5864_v62 = vpop.f32.mrb[42].mxu0 }
 0xb19   : > { %v2736_v57 = vpop.f32.mrb[43].mxu0  ;;  %v2745_v60 = vadd.f32 %v5864_v62, %v5282_v61  ;;  %v7770_v6 = vadd.f32 %v2742_v31, %v7655_v42 }
 0xb1a   : > { %v7767_v2 = vadd.f32 %v2734_v24, %v7658_v14  ;;  %v2737_v63 = vadd.f32 %v5282_v61, %v2736_v57 }
 0xb1b   : > { %v7778_v26 = vadd.f32 %v2745_v60, %v7661_v37 }
 0xb1c   : > { %v7773_v34 = vadd.f32 %v2737_v63, %v7664_v12  ;;  %v2825_v19 = vsel %vm737_vm9, %v7767_v2, 0.0  ;;  %v2831_v12 = vsel %vm737_vm9, %v7770_v6, 0.0 }
 0xb1d   : > { %2826 = vadd.xlane.f32.xlu1 %v2825_v19  ;;  %v2834_v40 = vsel %vm737_vm9, %v7778_v26, 0.0 }
 0xb1e   : > { %v5867_v45 = vpop.f32.mrb[44].mxu0  ;;  %v2828_v14 = vsel %vm737_vm9, %v7773_v34, 0.0 }
 0xb1f   : > { %2829 = vadd.xlane.f32.xlu0 %v2828_v14  ;;  %v2749_v25 = vpop.f32.mrb[45].mxu0  ;;  %v2758_v43 = vadd.f32 %v5867_v45, %v5282_v61 }
 0xb20   : > { %v2750_v36 = vadd.f32 %v5282_v61, %v2749_v25  ;;  %v5868_v42 = vpop.f32.mrb[46].mxu0 }
 0xb21   : > { %2832 = vadd.xlane.f32.xlu1 %v2831_v12  ;;  %v2752_v41 = vpop.f32.mrb[47].mxu0  ;;  %v2761_v44 = vadd.f32 %v5868_v42, %v5282_v61  ;;  %v7790_v29 = vadd.f32 %v2758_v43, %v7673_v28  ;;  %v6225_v43 = vld [vmem:[#allocation2 + $0xb0] sm:$0xff]   ;;  %v6226_v42 = vld [vmem:[#allocation2 + $0xb8] sm:$0xff]   ;;  %v6228_v12 = vld [vmem:[#allocation2 + $0xc8] sm:$0xff]  }
 0xb22   : > { %v7785_v23 = vadd.f32 %v2750_v36, %v7676_v53  ;;  %v2753_v37 = vadd.f32 %v5282_v61, %v2752_v41  ;;  %v6227_v36 = vld [vmem:[#allocation2 + $0xc0] sm:$0xff]   ;;  %5869 = vmatprep.subr.bf16.mxu1 %v6225_v43  ;;  %v7854_v41 = vld [vmem:[#allocation2 + $0xf0] sm:$0xff]  }
 0xb23   : > { %2835 = vadd.xlane.f32.xlu0 %v2834_v40  ;;  %v7798_v8 = vadd.f32 %v2761_v44, %v7681_v0  ;;  %v2843_v38 = vsel %vm737_vm9, %v7790_v29, 0.0  ;;  %5893 = vmatprep.subr.bf16.mxu0 %v6227_v36  ;;  %v7857_v44 = vld [vmem:[#allocation2 + $0xd0] sm:$0xff]  }
 0xb24   : > { %v7793_v7 = vadd.f32 %v2753_v37, %v7684_v17  ;;  %v2837_v3 = vsel %vm737_vm9, %v7785_v23, 0.0  ;;  %5870 = vmatpush3.bf16.msra.mxu1 %v6225_v43  ;;  %5894 = vmatpush3.bf16.msra.mxu0 %v6227_v36 }
 0xb25   : > { %2838 = vadd.xlane.f32.xlu1 %v2837_v3  ;;  %v2846_v28 = vsel %vm737_vm9, %v7798_v8, 0.0  ;;  %5871 = vmatprep.subr.bf16.mxu1 %v6226_v42 }
 0xb26   : > { %v2840_v53 = vsel %vm737_vm9, %v7793_v7, 0.0  ;;  %5895 = vmatprep.subr.bf16.mxu0 %v6228_v12 }
 0xb27   : > { %2841 = vadd.xlane.f32.xlu0 %v2840_v53 }
 0xb28   : > { %5872 = vmatpush3.bf16.msra.mxu1 %v6226_v42  ;;  %5896 = vmatpush3.bf16.msra.mxu0 %v6228_v12 }
 0xb29   : > { %2844 = vadd.xlane.f32.xlu1 %v2843_v38  ;;  %5881 = vmatprep.subr.bf16.mxu1 %v7854_v41 }
 0xb2a   : > { %5917 = vmatprep.subr.bf16.mxu0 %v7857_v44 }
 0xb2b   : > { %2847 = vadd.xlane.f32.xlu0 %v2846_v28 }
 0xbaa   : > { %v2827_v17 = vpop.xlane.xlu1 %2826 }
 0xbab   : > { %v2849_v52 = vmul.f32 0.03125, %v2827_v17 }
 0xbac   : > { %v2830_v4 = vpop.xlane.xlu0 %2829 }
 0xbad   : > { %v7807_v48 = vsub.f32 %v7767_v2, %v2849_v52  ;;  %v2850_v0 = vmul.f32 0.03125, %v2830_v4 }
 0xbae   : > { %v2833_v13 = vpop.xlane.xlu1 %2832 }
 0xbaf   : > { %v7810_v51 = vsub.f32 %v7773_v34, %v2850_v0  ;;  %v2851_v20 = vmul.f32 0.03125, %v2833_v13  ;;  %v2865_v30 = vmul.f32 %v7807_v48, %v7807_v48 }
 0xbb0   : > { %v2836_v47 = vpop.xlane.xlu0 %2835 }
 0xbb1   : > { %v7815_v54 = vsub.f32 %v7770_v6, %v2851_v20  ;;  %v2852_v35 = vmul.f32 0.03125, %v2836_v47  ;;  %v2873_v1 = vsel %vm737_vm9, %v2865_v30, 0.0  ;;  %v2866_v16 = vmul.f32 %v7810_v51, %v7810_v51 }
 0xbb2   : > { %2874 = vadd.xlane.f32.xlu1 %v2873_v1  ;;  %v2839_v9 = vpop.xlane.xlu1 %2838 }
 0xbb3   : > { %v7821_v56 = vsub.f32 %v7778_v26, %v2852_v35  ;;  %v2853_v11 = vmul.f32 0.03125, %v2839_v9  ;;  %v2876_v33 = vsel %vm737_vm9, %v2866_v16, 0.0  ;;  %v2867_v18 = vmul.f32 %v7815_v54, %v7815_v54 }
 0xbb4   : > { %2877 = vadd.xlane.f32.xlu0 %v2876_v33  ;;  %v2842_v32 = vpop.xlane.xlu0 %2841 }
 0xbb5   : > { %v7827_v39 = vsub.f32 %v7785_v23, %v2853_v11  ;;  %v2854_v59 = vmul.f32 0.03125, %v2842_v32  ;;  %v2879_v15 = vsel %vm737_vm9, %v2867_v18, 0.0  ;;  %v2868_v22 = vmul.f32 %v7821_v56, %v7821_v56 }
 0xbb6   : > { %2880 = vadd.xlane.f32.xlu1 %v2879_v15  ;;  %v2845_v50 = vpop.xlane.xlu1 %2844 }
 0xbb7   : > { %v7833_v58 = vsub.f32 %v7793_v7, %v2854_v59  ;;  %v2855_v55 = vmul.f32 0.03125, %v2845_v50  ;;  %v2882_v61 = vsel %vm737_vm9, %v2868_v22, 0.0  ;;  %v2869_v46 = vmul.f32 %v7827_v39, %v7827_v39  ;;  %v5298_v59 = vld [vmem:[%s8628_s2 + $0x8] ss:$0 sm:$0xff] }
 0xbb8   : > { %2883 = vadd.xlane.f32.xlu0 %v2882_v61  ;;  %v2848_v27 = vpop.xlane.xlu0 %2847 }
 0xbb9   : > { %v7839_v31 = vsub.f32 %v7790_v29, %v2855_v55  ;;  %v2856_v24 = vmul.f32 0.03125, %v2848_v27  ;;  %v2885_v62 = vsel %vm737_vm9, %v2869_v46, 0.0  ;;  %v2870_v57 = vmul.f32 %v7833_v58, %v7833_v58 }
 0xbba   : > { %2886 = vadd.xlane.f32.xlu1 %v2885_v62  ;;  %v5299_v62 = vld [vmem:[%s8628_s2 + $0x9] ss:$0 sm:$0xff] }
 0xbbb   : > { %v7845_v60 = vsub.f32 %v7798_v8, %v2856_v24  ;;  %v2888_v63 = vsel %vm737_vm9, %v2870_v57, 0.0  ;;  %v2871_v19 = vmul.f32 %v7839_v31, %v7839_v31 }
 0xbbc   : > { %2889 = vadd.xlane.f32.xlu0 %v2888_v63 }
 0xbbd   : > { %v2891_v45 = vsel %vm737_vm9, %v2871_v19, 0.0  ;;  %v2872_v14 = vmul.f32 %v7845_v60, %v7845_v60 }
 0xbbe   : > { %2892 = vadd.xlane.f32.xlu1 %v2891_v45 }
 0xbbf   : > { %v2894_v25 = vsel %vm737_vm9, %v2872_v14, 0.0 }
 0xbc0   : > { %2895 = vadd.xlane.f32.xlu0 %v2894_v25 }
 0xc3f   : > { %v2875_v37 = vpop.xlane.xlu1 %2874 }
 0xc40   : > { %v2897_v40 = vmul.f32 0.03125, %v2875_v37 }
 0xc41   : > { %v2878_v3 = vpop.xlane.xlu0 %2877 }
 0xc42   : > { %v2905_v53 = vadd.f32 1e-05, %v2897_v40  ;;  %v2898_v38 = vmul.f32 0.03125, %v2878_v3 }
 0xc43   : > { %v2881_v28 = vpop.xlane.xlu1 %2880 }
 0xc44   : > { %6423 = vrsqrt.f32 %v2905_v53  ;;  %v2906_v17 = vadd.f32 1e-05, %v2898_v38  ;;  %v2899_v52 = vmul.f32 0.03125, %v2881_v28 }
 0xc45   : > { %v2884_v4 = vpop.xlane.xlu0 %2883 }
 0xc46   : > { %6425 = vrsqrt.f32 %v2906_v17  ;;  %v2907_v0 = vadd.f32 1e-05, %v2899_v52  ;;  %v2900_v13 = vmul.f32 0.03125, %v2884_v4  ;;  %v6230_v17 = vld [vmem:[#allocation2 + $0xf8] sm:$0xff]  }
 0xc47   : > { %v2887_v20 = vpop.xlane.xlu1 %2886  ;;  %v6232_v52 = vld [vmem:[#allocation2 + $0xd8] sm:$0xff]  }
 0xc48   : > { %6427 = vrsqrt.f32 %v2907_v0  ;;  %v2908_v30 = vadd.f32 1e-05, %v2900_v13  ;;  %v2901_v47 = vmul.f32 0.03125, %v2887_v20 }
 0xc49   : > { %v2890_v35 = vpop.xlane.xlu0 %2889 }
 0xc4a   : > { %6429 = vrsqrt.f32 %v2908_v30  ;;  %v2909_v1 = vadd.f32 1e-05, %v2901_v47  ;;  %v2902_v16 = vmul.f32 0.03125, %v2890_v35 }
 0xc4b   : > { %v2893_v9 = vpop.xlane.xlu1 %2892 }
 0xc4c   : > { %6431 = vrsqrt.f32 %v2909_v1  ;;  %v2910_v11 = vadd.f32 1e-05, %v2902_v16  ;;  %v2903_v33 = vmul.f32 0.03125, %v2893_v9 }
 0xc4d   : > { %v2896_v18 = vpop.xlane.xlu0 %2895 }
 0xc4e   : > { %v6424_v32 = vpop.eup %6423  ;;  %6433 = vrsqrt.f32 %v2910_v11  ;;  %v2911_v15 = vadd.f32 1e-05, %v2903_v33  ;;  %v2904_v22 = vmul.f32 0.03125, %v2896_v18 }
 0xc4f   : > { %v2921_v50 = vmul.f32 %v6424_v32, %v7807_v48 }
 0xc50   : > { %v6426_v55 = vpop.eup %6425  ;;  %6435 = vrsqrt.f32 %v2911_v15  ;;  %v2912_v61 = vadd.f32 1e-05, %v2904_v22 }
 0xc51   : > { %v2933_v46 = vmul.f32 %v5298_v59, %v2921_v50  ;;  %v2922_v27 = vmul.f32 %v6426_v55, %v7810_v51 }
 0xc52   : > { %v6428_v24 = vpop.eup %6427  ;;  %6437 = vrsqrt.f32 %v2912_v61 }
 0xc53   : > { %v2934_v57 = vmul.f32 %v5298_v59, %v2922_v27  ;;  %v2923_v63 = vmul.f32 %v6428_v24, %v7815_v54  ;;  %v2945_v48 = vadd.f32 %v5299_v62, %v2933_v46 }
 0xc54   : > { %v6430_v19 = vpop.eup %6429 }
 0xc55   : > { %v2935_v45 = vmul.f32 %v5298_v59, %v2923_v63  ;;  %v2924_v14 = vmul.f32 %v6430_v19, %v7821_v56  ;;  %v2946_v25 = vadd.f32 %v5299_v62, %v2934_v57  ;;  %v7914_v57 = vld [vmem:[#allocation4 + $0x78] sm:$0xff] }
 0xc56   : > { %v6432_v43 = vpop.eup %6431  ;;  %v7917_v19 = vld [vmem:[#allocation4 + $0xb8] sm:$0xff] }
 0xc57   : > { %v2936_v36 = vmul.f32 %v5298_v59, %v2924_v14  ;;  %v2925_v42 = vmul.f32 %v6432_v43, %v7827_v39  ;;  %v2953_v51 = vpack.c.bf16 %v2946_v25, %v2945_v48  ;;  %v2947_v37 = vadd.f32 %v5299_v62, %v2935_v45  ;;  %v7920_v25 = vld [vmem:[#allocation4 + $0x68] sm:$0xff] }
 0xc58   : > { %v6434_v12 = vpop.eup %6433 }
 0xc59   : > { %v2948_v40 = vadd.f32 %v5299_v62, %v2936_v36  ;;  %v2937_v3 = vmul.f32 %v5298_v59, %v2925_v42  ;;  %v2926_v53 = vmul.f32 %v6434_v12, %v7833_v58  ;;  %5873 = vmatprep.mubr.msk.bf16.mxu1 %vm737_vm9, %v2953_v51  ;;  %5897 = vmatprep.mubr.msk.bf16.mxu0 %vm737_vm9, %v2953_v51  ;;  %v7923_v36 = vld [vmem:[#allocation4 + $0xa8] sm:$0xff] }
 0xc5a   : > { %v6436_v54 = vpop.eup %6435 }
 0xc5b   : > { %v2938_v38 = vmul.f32 %v5298_v59, %v2926_v53  ;;  %v2927_v56 = vmul.f32 %v6436_v54, %v7839_v31  ;;  %v2954_v28 = vpack.c.bf16 %v2948_v40, %v2947_v37  ;;  %v2949_v39 = vadd.f32 %v5299_v62, %v2937_v3  ;;  %v6233_v31 = vld [vmem:[#allocation2 + $0x100] sm:$0xff]  }
 0xc5c   : > { %v6438_v4 = vpop.eup %6437  ;;  %v7926_v37 = vld [vmem:[#allocation4 + $0x80] sm:$0xff] }
 0xc5d   : > { %v2939_v0 = vmul.f32 %v5298_v59, %v2927_v56  ;;  %v2928_v13 = vmul.f32 %v6438_v4, %v7845_v60  ;;  %5874 = vmatmul.mubr.msk.bf16.vlgmr.msra.gmra.mrb[64].mxu1 %vm737_vm9, %v2954_v28  ;;  %5898 = vmatmul.mubr.msk.bf16.vlgmr.msra.gmra.mrb[48].mxu0 %vm737_vm9, %v2954_v28  ;;  %v2950_v58 = vadd.f32 %v5299_v62, %v2938_v38  ;;  %v7929_v53 = vld [vmem:[#allocation4 + $0xc0] sm:$0xff] }
 0xc5e   : > { %5882 = vmatpush3.bf16.msra.mxu1 %v7854_v41  ;;  %5918 = vmatpush3.bf16.msra.mxu0 %v7857_v44  ;;  %v6234_v41 = vld [vmem:[#allocation2 + $0x108] sm:$0xff]  }
 0xc5f   : > { %v2940_v20 = vmul.f32 %v5298_v59, %v2928_v13  ;;  %v2955_v30 = vpack.c.bf16 %v2950_v58, %v2949_v39  ;;  %5883 = vmatprep.subr.bf16.mxu1 %v6230_v17  ;;  %5919 = vmatprep.subr.bf16.mxu0 %v6232_v52  ;;  %v2951_v47 = vadd.f32 %v5299_v62, %v2939_v0  ;;  %v7937_v39 = vld [vmem:[#allocation4 + $0xb0] sm:$0xff] }
 0xc61   : > { %5877 = vmatprep.mubr.msk.bf16.mxu1 %vm737_vm9, %v2955_v30  ;;  %5901 = vmatprep.mubr.msk.bf16.mxu0 %vm737_vm9, %v2955_v30  ;;  %v2952_v60 = vadd.f32 %v5299_v62, %v2940_v20 }
 0xc62   : > { %5884 = vmatpush3.bf16.msra.mxu1 %v6230_v17  ;;  %5920 = vmatpush3.bf16.msra.mxu0 %v6232_v52  ;;  %v7934_v17 = vld [vmem:[#allocation4 + $0x70] sm:$0xff] }
 0xc63   : > { %v2956_v35 = vpack.c.bf16 %v2952_v60, %v2951_v47  ;;  %5905 = vmatprep.subr.bf16.mxu1 %v6233_v31 }
 0xc65   : > { %5878 = vmatmul.mubr.msk.bf16.gmra.mrb[68].mxu1 %vm737_vm9, %v2956_v35  ;;  %5902 = vmatmul.mubr.msk.bf16.gmra.mrb[52].mxu0 %vm737_vm9, %v2956_v35 }
 0xc66   : > { %5885 = vmatprep.mubr.msk.bf16.mxu1 %vm737_vm9, %v2953_v51  ;;  %5921 = vmatprep.mubr.msk.bf16.mxu0 %vm737_vm9, %v2953_v51 }
 0xc6d   : > { %5886 = vmatmul.mubr.msk.bf16.vlgmr.msra.gmra.mrb[72].mxu1 %vm737_vm9, %v2954_v28  ;;  %5922 = vmatmul.mubr.msk.bf16.vlgmr.msra.gmra.mrb[56].mxu0 %vm737_vm9, %v2954_v28 }
 0xc6e   : > { %5906 = vmatpush3.bf16.msra.mxu1 %v6233_v31  ;;  %5889 = vmatprep.mubr.msk.bf16.mxu1 %vm737_vm9, %v2955_v30 }
 0xc6f   : > { %5925 = vmatprep.mubr.msk.bf16.mxu0 %vm737_vm9, %v2955_v30  ;;  %5907 = vmatprep.subr.bf16.mxu1 %v6234_v41 }
 0xc72   : > { %5908 = vmatpush3.bf16.msra.mxu1 %v6234_v41 }
 0xc75   : > { %5890 = vmatmul.mubr.msk.bf16.gmra.mrb[76].mxu1 %vm737_vm9, %v2956_v35  ;;  %5926 = vmatmul.mubr.msk.bf16.gmra.mrb[60].mxu0 %vm737_vm9, %v2956_v35 }
 0xc76   : > { %5909 = vmatprep.mubr.msk.bf16.mxu1 %vm737_vm9, %v2953_v51 }
 0xc7d   : > { %5910 = vmatmul.mubr.msk.bf16.vlgmr.msra.gmra.mrb[80].mxu1 %vm737_vm9, %v2954_v28 }
 0xc7e   : > { %5913 = vmatprep.mubr.msk.bf16.mxu1 %vm737_vm9, %v2955_v30 }
 0xc85   : > { %5914 = vmatmul.mubr.msk.bf16.gmra.mrb[84].mxu1 %vm737_vm9, %v2956_v35 }
 0xd30   : > { %v5875_v44 = vpop.f32.mrb[64].mxu1  ;;  %v7896_v1 = vpop.f32.mrb[48].mxu0 }
 0xd31   : > { %v3015_v16 = vpop.f32.mrb[65].mxu1  ;;  %v7898_v9 = vpop.f32.mrb[49].mxu0  ;;  %v3360_v63 = vmul.f32 %v7914_v57, %v5875_v44  ;;  %v6623_v44 = vld [vmem:[#allocation4 + $0x98] sm:$0xff] }
 0xd32   : > { %v5876_v11 = vpop.f32.mrb[66].mxu1  ;;  %v7900_v33 = vpop.f32.mrb[50].mxu0  ;;  %v3358_v43 = vmul.f32 %v7920_v25, %v3015_v16 }
 0xd33   : > { %v3018_v18 = vpop.f32.mrb[67].mxu1  ;;  %v7902_v32 = vpop.f32.mrb[51].mxu0  ;;  %v3361_v40 = vmul.f32 %v7926_v37, %v5876_v11  ;;  %v6624_v11 = vld [vmem:[#allocation4 + $0xd8] sm:$0xff] }
 0xd34   : > { %v3359_v52 = vmul.f32 %v7934_v17, %v3018_v18 }
 0xd38   : > { %v5879_v59 = vpop.f32.mrb[68].mxu1  ;;  %v7904_v15 = vpop.f32.mrb[52].mxu0 }
 0xd39   : > { %v3031_v22 = vpop.f32.mrb[69].mxu1  ;;  %v7906_v50 = vpop.f32.mrb[53].mxu0  ;;  %v3364_v16 = vmul.f32 %v6623_v44, %v5879_v59 }
 0xd3a   : > { %v5880_v55 = vpop.f32.mrb[70].mxu1  ;;  %v7908_v61 = vpop.f32.mrb[54].mxu0 }
 0xd3b   : > { %v7910_v46 = vpop.f32.mrb[71].mxu1  ;;  %v7912_v27 = vpop.f32.mrb[55].mxu0 }
 0xd40   : > { %v5887_v24 = vpop.f32.mrb[72].mxu1  ;;  %v5923_v62 = vpop.f32.mrb[56].mxu0 }
 0xd41   : > { %v3368_v45 = vmul.f32 %v7917_v19, %v5887_v24  ;;  %v3092_v14 = vpop.f32.mrb[73].mxu1  ;;  %v3323_v48 = vpop.f32.mrb[57].mxu0 }
 0xd42   : > { %v3366_v42 = vmul.f32 %v7923_v36, %v3092_v14  ;;  %v5888_v51 = vpop.f32.mrb[74].mxu1  ;;  %v5924_v12 = vpop.f32.mrb[58].mxu0  ;;  %v6626_v14 = vld [vmem:[#allocation4 + $0xc8] sm:$0xff] }
 0xd43   : > { %v3376_v3 = vadd.f32 %v3368_v45, %v3360_v63  ;;  %v3369_v54 = vmul.f32 %v7929_v53, %v5888_v51  ;;  %v7932_v38 = vpack.c.bf16 %v5924_v12, %v5923_v62  ;;  %v3095_v56 = vpop.f32.mrb[75].mxu1  ;;  %v3326_v28 = vpop.f32.mrb[59].mxu0  ;;  %v6625_v63 = vld [vmem:[#allocation4 + $0x88] sm:$0xff]  ;;  %v6627_v12 = vld [vmem:[#allocation4 + $0xa0] sm:$0xff] }
 0xd44   : > { %v3374_v4 = vadd.f32 %v3366_v42, %v3358_v43  ;;  %v3367_v0 = vmul.f32 %v7937_v39, %v3095_v56  ;;  %v7940_v13 = vpack.c.bf16 %v3326_v28, %v3323_v48  ;;  %v3362_v45 = vmul.f32 %v6625_v63, %v3031_v22 }
 0xd45   : > { %v3377_v58 = vadd.f32 %v3369_v54, %v3361_v40  ;;  %v4024_v41 = vmul.bf16 %v7932_v38, %v7027_v49  ;;  %v3365_v40 = vmul.f32 %v6627_v12, %v5880_v55  ;;  %v6628_v54 = vld [vmem:[#allocation4 + $0xe0] sm:$0xff] }
 0xd46   : > { %v3375_v20 = vadd.f32 %v3367_v0, %v3359_v52  ;;  %v4023_v30 = vmul.bf16 %v7940_v13, %v7027_v49 }
 0xd47   : > { %v7944_v31 = vpack.c.bf16 %v3377_v58, %v3376_v3  ;;  %v6630_v58 = vld [vmem:[#allocation4 + $0xd0] sm:$0xff] }
 0xd48   : > { %v7946_v47 = vpack.c.bf16 %v3375_v20, %v3374_v4  ;;  %v5891_v60 = vpop.f32.mrb[76].mxu1  ;;  %v5927_v35 = vpop.f32.mrb[60].mxu0  ;;  %5969 = vmatprep.subr.bf16.mxu0 %v4023_v30  ;;  %v6629_v4 = vld [vmem:[#allocation4 + $0x90] sm:$0xff] }
 0xd49   : > { %v3372_v18 = vmul.f32 %v6624_v11, %v5891_v60  ;;  %v3108_v24 = vpop.f32.mrb[77].mxu1  ;;  %v3339_v62 = vpop.f32.mrb[61].mxu0  ;;  %5970 = vmatpush3.bf16.msra.mxu0 %v4023_v30  ;;  %v3363_v22 = vmul.f32 %v6629_v4, %v7910_v46 }
 0xd4a   : > { %v3370_v48 = vmul.f32 %v6626_v14, %v3108_v24  ;;  %v5892_v43 = vpop.f32.mrb[78].mxu1  ;;  %v5928_v42 = vpop.f32.mrb[62].mxu0  ;;  %5971 = vmatprep.subr.bf16.mxu0 %v4024_v41  ;;  %v3414_v51 = vmul.bf16 %v7946_v47, %v7054_v10 }
 0xd4b   : > { %v3380_v3 = vadd.f32 %v3372_v18, %v3364_v16  ;;  %v3373_v59 = vmul.f32 %v6628_v54, %v5892_v43  ;;  %v7952_v56 = vpack.c.bf16 %v5928_v42, %v5927_v35  ;;  %v3111_v28 = vpop.f32.mrb[79].mxu1  ;;  %v3342_v52 = vpop.f32.mrb[63].mxu0 }
 0xd4c   : > { %v3378_v0 = vadd.f32 %v3370_v48, %v3362_v45  ;;  %v3371_v20 = vmul.f32 %v6630_v58, %v3111_v28  ;;  %v7955_v30 = vpack.c.bf16 %v3342_v52, %v3339_v62  ;;  %5937 = vmatprep.mubr.msk.bf16.mxu1 %vm737_vm9, %v3414_v51  ;;  %v3388_v62 = vmul.f32 %v7914_v57, %v7896_v1 }
 0xd4d   : > { %v3381_v60 = vadd.f32 %v3373_v59, %v3365_v40  ;;  %5972 = vmatpush3.bf16.msra.mxu0 %v4024_v41  ;;  %v4026_v46 = vmul.bf16 %v7952_v56, %v7027_v49  ;;  %v3386_v41 = vmul.f32 %v7920_v25, %v7898_v9  ;;  %v3389_v51 = vmul.f32 %v7926_v37, %v7900_v33 }
 0xd4e   : > { %v3379_v55 = vadd.f32 %v3371_v20, %v3363_v22  ;;  %v4025_v16 = vmul.bf16 %v7955_v30, %v7027_v49  ;;  %v3387_v1 = vmul.f32 %v7934_v17, %v7902_v32  ;;  %v7980_v9 = vmul.bf16 %v7940_v13, %v7054_v10 }
 0xd4f   : > { %v7960_v35 = vpack.c.bf16 %v3381_v60, %v3380_v3  ;;  %v3390_v32 = vmul.f32 %v6625_v63, %v7906_v50  ;;  %v3393_v20 = vmul.f32 %v6627_v12, %v7908_v61  ;;  %v3415_v12 = vmul.bf16 %v7944_v31, %v7054_v10 }
 0xd50   : > { %v7962_v18 = vpack.c.bf16 %v3379_v55, %v3378_v0  ;;  %v5911_v24 = vpop.f32.mrb[80].mxu1  ;;  %5973 = vmatprep.subr.bf16.mxu0 %v4025_v16 }
 0xd51   : > { %v3396_v45 = vmul.f32 %v7917_v19, %v5911_v24  ;;  %v3246_v48 = vpop.f32.mrb[81].mxu1  ;;  %5974 = vmatpush3.bf16.msra.mxu0 %v4025_v16  ;;  %v3391_v24 = vmul.f32 %v6629_v4, %v7912_v27  ;;  %v3417_v4 = vmul.bf16 %v7960_v35, %v7054_v10 }
 0xd52   : > { %v3394_v43 = vmul.f32 %v7923_v36, %v3246_v48  ;;  %v5912_v42 = vpop.f32.mrb[82].mxu1  ;;  %5975 = vmatprep.subr.bf16.mxu0 %v4026_v46  ;;  %v3421_v48 = vmul.bf16 %v7960_v35, %v7027_v49 }
 0xd53   : > { %v3404_v40 = vadd.f32 %v3396_v45, %v3388_v62  ;;  %v3397_v3 = vmul.f32 %v7929_v53, %v5912_v42  ;;  %v3249_v59 = vpop.f32.mrb[83].mxu1  ;;  %v3392_v53 = vmul.f32 %v6623_v44, %v7904_v15  ;;  %v3419_v62 = vmul.bf16 %v7944_v31, %v7027_v49 }
 0xd54   : > { %v3402_v57 = vadd.f32 %v3394_v43, %v3386_v41  ;;  %v3395_v19 = vmul.f32 %v7937_v39, %v3249_v59  ;;  %v3420_v45 = vmul.bf16 %v7962_v18, %v7027_v49  ;;  %v3422_v41 = vmul.bf16 %v7946_v47, %v7153_v21 }
 0xd55   : > { %v3405_v25 = vadd.f32 %v3397_v3, %v3389_v51  ;;  %5976 = vmatpush3.bf16.msra.mxu0 %v4026_v46  ;;  %v3423_v43 = vmul.bf16 %v7944_v31, %v7153_v21  ;;  %v3424_v42 = vmul.bf16 %v7962_v18, %v7153_v21  ;;  %v3426_v51 = vmul.bf16 %v7946_v47, %v7172_v5 }
 0xd56   : > { %v3403_v36 = vadd.f32 %v3395_v19, %v3387_v1  ;;  %5985 = vmatprep.subr.bf16.mxu0 %v7980_v9  ;;  %v3428_v3 = vmul.bf16 %v7962_v18, %v7172_v5  ;;  %v3429_v59 = vmul.bf16 %v7960_v35, %v7172_v5 }
 0xd57   : > { %v3411_v33 = vpack.c.bf16 %v3405_v25, %v3404_v40  ;;  %v3427_v40 = vmul.bf16 %v7944_v31, %v7172_v5 }
 0xd58   : > { %v3410_v37 = vpack.c.bf16 %v3403_v36, %v3402_v57  ;;  %v5915_v28 = vpop.f32.mrb[84].mxu1 }
 0xd59   : > { %v3400_v52 = vmul.f32 %v6624_v11, %v5915_v28  ;;  %v3262_v22 = vpop.f32.mrb[85].mxu1 }
 0xd5a   : > { %v3398_v17 = vmul.f32 %v6626_v14, %v3262_v22  ;;  %v5916_v39 = vpop.f32.mrb[86].mxu1  ;;  %6161 = vmatprep.subr.msk.bf16.mxu1 %vm737_vm9, %v3410_v37  ;;  %v3479_v0 = vsel %vm737_vm9, %v3410_v37, 0  ;;  %v3482_v14 = vsel %vm737_vm9, %v3411_v33, 0 }
 0xd5b   : > { %v3408_v60 = vadd.f32 %v3400_v52, %v3392_v53  ;;  %v3401_v55 = vmul.f32 %v6628_v54, %v5916_v39  ;;  %v3265_v16 = vpop.f32.mrb[87].mxu1  ;;  %5930 = vmatpush3.bf16.xpose.msra.mxu1 %v3479_v0  ;;  %v3416_v54 = vmul.bf16 %v7962_v18, %v7054_v10  ;;  %v8665_v18 = vld [vmem:[#allocation8_spill] sm:$0xff] }
 0xd5c   : > { %v3406_v46 = vadd.f32 %v3398_v17, %v3390_v32  ;;  %v3399_v15 = vmul.f32 %v6630_v58, %v3265_v16  ;;  %6162 = vmatprep.subr.msk.bf16.mxu1 %vm737_vm9, %v3411_v33  ;;  %v3418_v58 = vmul.bf16 %v7946_v47, %v7027_v49  ;;  %v3425_v49 = vmul.bf16 %v7960_v35, %v7153_v21  ;;  %v8666_v32 = vld [vmem:[#allocation9_spill] sm:$0xff]  ;;  %v8667_v35 = vld [vmem:[#allocation10_spill] sm:$0xff] }
 0xd5d   : > { %v3409_v44 = vadd.f32 %v3401_v55, %v3393_v20  ;;  %v8668_v20 = vld [vmem:[#allocation11_spill] sm:$0xff] }
 0xd5e   : > { %v3407_v50 = vadd.f32 %v3399_v15, %v3391_v24  ;;  %v8669_v15 = vld [vmem:[#allocation12_spill] sm:$0xff] }
 0xd5f   : > { %v3413_v11 = vpack.c.bf16 %v3409_v44, %v3408_v60 }
 0xd60   : > { %v3412_v63 = vpack.c.bf16 %v3407_v50, %v3406_v46 }
 0xd61   : > { %v3488_v27 = vsel %vm737_vm9, %v3413_v11, 0 }
 0xd62   : > { %v3485_v61 = vsel %vm737_vm9, %v3412_v63, 0 }
 0xd63   : > { %5932 = vmatpush3.bf16.xpose.msra.mxu1 %v3482_v14  ;;  %v8670_v14 = vld [vmem:[#allocation13_spill] sm:$0xff] }
 0xd64   : > { %6163 = vmatprep.subr.msk.bf16.mxu1 %vm737_vm9, %v3412_v63 }
 0xd6b   : > { %5934 = vmatpush3.bf16.xpose.msra.mxu1 %v3485_v61 }
 0xd6c   : > { %6164 = vmatprep.subr.msk.bf16.mxu1 %vm737_vm9, %v3413_v11 }
 0xd73   : > { %5936 = vmatpush3.bf16.xpose.msra.mxu1 %v3488_v27  ;;  %v8671_v27 = vld [vmem:[#allocation14_spill] sm:$0xff] }
 0xd7a   : > { %5938 = vmatmul.mubr.msk.bf16.vlgmr.msra.gmra.mrb[88].mxu1 %vm737_vm9, %v3415_v12 }
 0xd7b   : > { %5941 = vmatprep.mubr.msk.bf16.mxu1 %vm737_vm9, %v3416_v54 }
 0xd82   : > { %5942 = vmatmul.mubr.msk.bf16.gmra.mrb[92].mxu1 %vm737_vm9, %v3417_v4  ;;  %v8672_v4 = vld [vmem:[#allocation15_spill] sm:$0xff] }
 0xd83   : > { %5945 = vmatprep.mubr.msk.bf16.mxu1 %vm737_vm9, %v3418_v58 }
 0xd8a   : > { %5946 = vmatmul.mubr.msk.bf16.gmra.mrb[96].mxu1 %vm737_vm9, %v3419_v62 }
 0xd8b   : > { %5949 = vmatprep.mubr.msk.bf16.mxu1 %vm737_vm9, %v3420_v45 }
 0xd92   : > { %5950 = vmatmul.mubr.msk.bf16.gmra.mrb[100].mxu1 %vm737_vm9, %v3421_v48 }
 0xd93   : > { %5953 = vmatprep.mubr.msk.bf16.mxu1 %vm737_vm9, %v3422_v41 }
 0xd9a   : > { %5954 = vmatmul.mubr.msk.bf16.gmra.mrb[104].mxu1 %vm737_vm9, %v3423_v43 }
 0xd9b   : > { %5957 = vmatprep.mubr.msk.bf16.mxu1 %vm737_vm9, %v3424_v42 }
 0xda2   : > { %5958 = vmatmul.mubr.msk.bf16.gmra.mrb[108].mxu1 %vm737_vm9, %v3425_v49 }
 0xda3   : > { %5961 = vmatprep.mubr.msk.bf16.mxu1 %vm737_vm9, %v3426_v51 }
 0xdaa   : > { %5962 = vmatmul.mubr.msk.bf16.gmra.mrb[112].mxu1 %vm737_vm9, %v3427_v40 }
 0xdab   : > { %5965 = vmatprep.mubr.msk.bf16.mxu1 %vm737_vm9, %v3428_v3 }
 0xdb2   : > { %5966 = vmatmul.mubr.msk.bf16.gmra.mrb[116].mxu1 %vm737_vm9, %v3429_v59 }
 0xe4d   : > { %v5939_v47 = vpop.f32.mrb[88].mxu1 }
 0xe4e   : > { %v3524_v1 = vpop.f32.mrb[89].mxu1  ;;  %v8087_v3 = vadd.f32 %v5939_v47, %v8666_v32 }
 0xe4f   : > { %v5940_v57 = vpop.f32.mrb[90].mxu1  ;;  %v8077_v45 = vadd.f32 %v3524_v1, %v8665_v18 }
 0xe50   : > { %v3527_v19 = vpop.f32.mrb[91].mxu1  ;;  %v8092_v1 = vadd.f32 %v5940_v57, %v8668_v20 }
 0xe51   : > { %v8082_v42 = vadd.f32 %v3527_v19, %v8667_v35  ;;  %v3651_v59 = vsel %vm298_vm0, %v8077_v45, -inf }
 0xe52   : > { %v3660_v57 = vsel %vm298_vm0, %v8092_v1, -inf }
 0xe53   : > { %v3654_v19 = vsel %vm298_vm0, %v8082_v42, -inf }
 0xe55   : > { %v5943_v25 = vpop.f32.mrb[92].mxu1 }
 0xe56   : > { %v3540_v36 = vpop.f32.mrb[93].mxu1 }
 0xe57   : > { %v5944_v33 = vpop.f32.mrb[94].mxu1 }
 0xe58   : > { %v3543_v31 = vpop.f32.mrb[95].mxu1 }
 0xe5d   : > { %v5947_v37 = vpop.f32.mrb[96].mxu1 }
 0xe5e   : > { %v3556_v28 = vpop.f32.mrb[97].mxu1  ;;  %v8044_v17 = vadd.f32 %v5947_v37, %v8666_v32  ;;  %v8097_v37 = vadd.f32 %v3540_v36, %v8669_v15 }
 0xe5f   : > { %v8041_v53 = vadd.f32 %v3556_v28, %v8665_v18  ;;  %v5948_v52 = vpop.f32.mrb[98].mxu1 }
 0xe60   : > { %v3559_v22 = vpop.f32.mrb[99].mxu1  ;;  %v8052_v60 = vadd.f32 %v5948_v52, %v8668_v20  ;;  %v3681_v24 = vsel %vm298_vm0, %v8044_v17, -inf  ;;  %v3657_v52 = vsel %vm298_vm0, %v8087_v3, -inf  ;;  %v3663_v36 = vsel %vm298_vm0, %v8097_v37, -inf }
 0xe61   : > { %v8047_v39 = vadd.f32 %v3559_v22, %v8667_v35  ;;  %v3675_v0 = vsel %vm298_vm0, %v8041_v53, -inf  ;;  %v8102_v22 = vadd.f32 %v3543_v31, %v8671_v27 }
 0xe62   : > { %3676 = vmax.xlane.f32.xlu1 %v3675_v0  ;;  %v3684_v11 = vsel %vm298_vm0, %v8052_v60, -inf }
 0xe63   : > { %v3678_v55 = vsel %vm298_vm0, %v8047_v39, -inf  ;;  %v3666_v31 = vsel %vm298_vm0, %v8102_v22, -inf }
 0xe64   : > { %3679 = vmax.xlane.f32.xlu0 %v3678_v55 }
 0xe65   : > { %v5951_v16 = vpop.f32.mrb[100].mxu1 }
 0xe66   : > { %v3572_v46 = vpop.f32.mrb[101].mxu1  ;;  %3682 = vmax.xlane.f32.xlu1 %v3681_v24  ;;  %v8064_v61 = vadd.f32 %v5951_v16, %v8670_v14  ;;  %v8107_v16 = vadd.f32 %v5943_v25, %v8670_v14  ;;  %v8112_v24 = vadd.f32 %v5944_v33, %v8672_v4 }
 0xe67   : > { %v8059_v44 = vadd.f32 %v3572_v46, %v8669_v15  ;;  %v5952_v50 = vpop.f32.mrb[102].mxu1 }
 0xe68   : > { %v3575_v63 = vpop.f32.mrb[103].mxu1  ;;  %3685 = vmax.xlane.f32.xlu0 %v3684_v11  ;;  %v8072_v58 = vadd.f32 %v5952_v50, %v8672_v4  ;;  %v3693_v41 = vsel %vm298_vm0, %v8064_v61, -inf  ;;  %v3669_v11 = vsel %vm298_vm0, %v8107_v16, -inf  ;;  %v3672_v33 = vsel %vm298_vm0, %v8112_v24, -inf }
 0xe69   : > { %v8067_v12 = vadd.f32 %v3575_v63, %v8671_v27  ;;  %v3687_v54 = vsel %vm298_vm0, %v8059_v44, -inf }
 0xe6a   : > { %3688 = vmax.xlane.f32.xlu1 %v3687_v54  ;;  %v3696_v51 = vsel %vm298_vm0, %v8072_v58, -inf }
 0xe6b   : > { %v3690_v62 = vsel %vm298_vm0, %v8067_v12, -inf }
 0xe6c   : > { %3691 = vmax.xlane.f32.xlu0 %v3690_v62 }
 0xe6d   : > { %v5955_v48 = vpop.f32.mrb[104].mxu1 }
 0xe6e   : > { %v3588_v43 = vpop.f32.mrb[105].mxu1  ;;  %3694 = vmax.xlane.f32.xlu1 %v3693_v41  ;;  %v8127_v41 = vadd.f32 %v5955_v48, %v8666_v32 }
 0xe6f   : > { %v5956_v49 = vpop.f32.mrb[106].mxu1  ;;  %v8117_v46 = vadd.f32 %v3588_v43, %v8665_v18 }
 0xe70   : > { %v3591_v40 = vpop.f32.mrb[107].mxu1  ;;  %3697 = vmax.xlane.f32.xlu0 %v3696_v51  ;;  %v8132_v51 = vadd.f32 %v5956_v49, %v8668_v20 }
 0xe71   : > { %v8122_v63 = vadd.f32 %v3591_v40, %v8667_v35  ;;  %v3699_v43 = vsel %vm298_vm0, %v8117_v46, -inf }
 0xe72   : > { %3652 = vmax.xlane.f32.xlu1 %v3651_v59  ;;  %v3708_v49 = vsel %vm298_vm0, %v8132_v51, -inf }
 0xe73   : > { %v3702_v40 = vsel %vm298_vm0, %v8122_v63, -inf }
 0xe74   : > { %3655 = vmax.xlane.f32.xlu0 %v3654_v19 }
 0xe75   : > { %v5959_v28 = vpop.f32.mrb[108].mxu1 }
 0xe76   : > { %v3604_v47 = vpop.f32.mrb[109].mxu1  ;;  %3658 = vmax.xlane.f32.xlu1 %v3657_v52  ;;  %v3705_v52 = vsel %vm298_vm0, %v8127_v41, -inf }
 0xe77   : > { %v5960_v0 = vpop.f32.mrb[110].mxu1  ;;  %v8137_v59 = vadd.f32 %v3604_v47, %v8669_v15 }
 0xe78   : > { %v3607_v55 = vpop.f32.mrb[111].mxu1  ;;  %3661 = vmax.xlane.f32.xlu0 %v3660_v57 }
 0xe79   : > { %v8142_v57 = vadd.f32 %v3607_v55, %v8671_v27  ;;  %v3711_v47 = vsel %vm298_vm0, %v8137_v59, -inf }
 0xe7a   : > { %3664 = vmax.xlane.f32.xlu1 %v3663_v36 }
 0xe7b   : > { %v3714_v55 = vsel %vm298_vm0, %v8142_v57, -inf }
 0xe7c   : > { %3667 = vmax.xlane.f32.xlu0 %v3666_v31 }
 0xe7d   : > { %v5963_v50 = vpop.f32.mrb[112].mxu1 }
 0xe7e   : > { %v3620_v25 = vpop.f32.mrb[113].mxu1  ;;  %3670 = vmax.xlane.f32.xlu1 %v3669_v11  ;;  %v8147_v11 = vadd.f32 %v5959_v28, %v8670_v14 }
 0xe7f   : > { %v5964_v54 = vpop.f32.mrb[114].mxu1 }
 0xe80   : > { %v3623_v62 = vpop.f32.mrb[115].mxu1  ;;  %3673 = vmax.xlane.f32.xlu0 %v3672_v33  ;;  %v8152_v33 = vadd.f32 %v5960_v0, %v8672_v4  ;;  %v8167_v0 = vadd.f32 %v5963_v50, %v8666_v32 }
 0xe81   : > { %v8162_v28 = vadd.f32 %v3623_v62, %v8667_v35 }
 0xe82   : > { %3700 = vmax.xlane.f32.xlu1 %v3699_v43  ;;  %v8157_v43 = vadd.f32 %v3620_v25, %v8665_v18  ;;  %v8172_v18 = vadd.f32 %v5964_v54, %v8668_v20  ;;  %v3729_v62 = vsel %vm298_vm0, %v8167_v0, -inf }
 0xe83   : > { %v3726_v25 = vsel %vm298_vm0, %v8162_v28, -inf }
 0xe84   : > { %3703 = vmax.xlane.f32.xlu0 %v3702_v40  ;;  %v3717_v40 = vsel %vm298_vm0, %v8147_v11, -inf  ;;  %v3732_v50 = vsel %vm298_vm0, %v8172_v18, -inf }
 0xe85   : > { %v5967_v19 = vpop.f32.mrb[116].mxu1 }
 0xe86   : > { %v3636_v48 = vpop.f32.mrb[117].mxu1  ;;  %3706 = vmax.xlane.f32.xlu1 %v3705_v52  ;;  %v3720_v52 = vsel %vm298_vm0, %v8152_v33, -inf  ;;  %v8187_v20 = vadd.f32 %v5967_v19, %v8670_v14 }
 0xe87   : > { %v5968_v36 = vpop.f32.mrb[118].mxu1  ;;  %v8177_v35 = vadd.f32 %v3636_v48, %v8669_v15 }
 0xe88   : > { %v3639_v31 = vpop.f32.mrb[119].mxu1  ;;  %3709 = vmax.xlane.f32.xlu0 %v3708_v49  ;;  %v3723_v49 = vsel %vm298_vm0, %v8157_v43, -inf  ;;  %v8192_v15 = vadd.f32 %v5968_v36, %v8672_v4 }
 0xe89   : > { %v8182_v32 = vadd.f32 %v3639_v31, %v8671_v27  ;;  %v3735_v54 = vsel %vm298_vm0, %v8177_v35, -inf  ;;  %v3741_v27 = vsel %vm298_vm0, %v8187_v20, -inf }
 0xe8a   : > { %3712 = vmax.xlane.f32.xlu1 %v3711_v47  ;;  %v3744_v31 = vsel %vm298_vm0, %v8192_v15, -inf }
 0xe8b   : > { %v3738_v48 = vsel %vm298_vm0, %v8182_v32, -inf }
 0xe8c   : > { %3715 = vmax.xlane.f32.xlu0 %v3714_v55 }
 0xe8e   : > { %3718 = vmax.xlane.f32.xlu1 %v3717_v40 }
 0xe90   : > { %3721 = vmax.xlane.f32.xlu0 %v3720_v52 }
 0xe92   : > { %3724 = vmax.xlane.f32.xlu1 %v3723_v49 }
 0xe94   : > { %3727 = vmax.xlane.f32.xlu0 %v3726_v25 }
 0xe96   : > { %3730 = vmax.xlane.f32.xlu1 %v3729_v62 }
 0xe98   : > { %3733 = vmax.xlane.f32.xlu0 %v3732_v50 }
 0xe9a   : > { %3736 = vmax.xlane.f32.xlu1 %v3735_v54 }
 0xe9c   : > { %3739 = vmax.xlane.f32.xlu0 %v3738_v48 }
 0xe9e   : > { %3742 = vmax.xlane.f32.xlu1 %v3741_v27 }
 0xea0   : > { %3745 = vmax.xlane.f32.xlu0 %v3744_v31 }
 0xeef   : > { %v3677_v14 = vpop.xlane.xlu1 %3676 }
 0xef0   : > { %v3755_v19 = vsub.f32 %v8041_v53, %v3677_v14 }
 0xef1   : > { %v3680_v47 = vpop.xlane.xlu0 %3679 }
 0xef2   : > { %v3795_v55 = vmul.f32 1.442695, %v3755_v19  ;;  %v3756_v4 = vsub.f32 %v8047_v39, %v3680_v47 }
 0xef3   : > { %v3683_v36 = vpop.xlane.xlu1 %3682 }
 0xef4   : > { %6439 = vpow2.f32 %v3795_v55  ;;  %v3797_v40 = vmul.f32 1.442695, %v3756_v4  ;;  %v3757_v52 = vsub.f32 %v8044_v17, %v3683_v36 }
 0xef5   : > { %v3686_v49 = vpop.xlane.xlu0 %3685 }
 0xef6   : > { %6441 = vpow2.f32 %v3797_v40  ;;  %v3799_v25 = vmul.f32 1.442695, %v3757_v52  ;;  %v3758_v62 = vsub.f32 %v8052_v60, %v3686_v49 }
 0xef7   : > { %v3689_v50 = vpop.xlane.xlu1 %3688 }
 0xef8   : > { %6443 = vpow2.f32 %v3799_v25  ;;  %v3801_v54 = vmul.f32 1.442695, %v3758_v62  ;;  %v3759_v48 = vsub.f32 %v8059_v44, %v3689_v50 }
 0xef9   : > { %v3692_v53 = vpop.xlane.xlu0 %3691 }
 0xefa   : > { %6445 = vpow2.f32 %v3801_v54  ;;  %v3803_v27 = vmul.f32 1.442695, %v3759_v48  ;;  %v3760_v39 = vsub.f32 %v8067_v12, %v3692_v53 }
 0xefb   : > { %v3695_v31 = vpop.xlane.xlu1 %3694 }
 0xefc   : > { %6447 = vpow2.f32 %v3803_v27  ;;  %v3805_v14 = vmul.f32 1.442695, %v3760_v39  ;;  %v3761_v17 = vsub.f32 %v8064_v61, %v3695_v31 }
 0xefd   : > { %v3698_v19 = vpop.xlane.xlu0 %3697 }
 0xefe   : > { %v8207_v47 = vpop.eup %6439  ;;  %6449 = vpow2.f32 %v3805_v14  ;;  %v3807_v60 = vmul.f32 1.442695, %v3761_v17  ;;  %v3762_v55 = vsub.f32 %v8072_v58, %v3698_v19 }
 0xeff   : > { %v3653_v4 = vpop.xlane.xlu1 %3652  ;;  %v3867_v44 = vsel %vm298_vm0, %v8207_v47, 0.0 }
 0xf00   : > { %v8212_v36 = vpop.eup %6441  ;;  %6451 = vpow2.f32 %v3807_v60  ;;  %v3809_v12 = vmul.f32 1.442695, %v3762_v55  ;;  %v3747_v40 = vsub.f32 %v8077_v45, %v3653_v4  ;;  %3868 = vadd.xlane.f32.xlu1 %v3867_v44 }
 0xf01   : > { %v3656_v52 = vpop.xlane.xlu0 %3655  ;;  %v3870_v61 = vsel %vm298_vm0, %v8212_v36, 0.0 }
 0xf02   : > { %v8217_v49 = vpop.eup %6443  ;;  %6453 = vpow2.f32 %v3809_v12  ;;  %v3779_v25 = vmul.f32 1.442695, %v3747_v40  ;;  %v3748_v58 = vsub.f32 %v8082_v42, %v3656_v52  ;;  %3871 = vadd.xlane.f32.xlu0 %v3870_v61 }
 0xf03   : > { %v3659_v62 = vpop.xlane.xlu1 %3658  ;;  %v3873_v50 = vsel %vm298_vm0, %v8217_v49, 0.0 }
 0xf04   : > { %v8222_v54 = vpop.eup %6445  ;;  %6455 = vpow2.f32 %v3779_v25  ;;  %v3781_v45 = vmul.f32 1.442695, %v3748_v58  ;;  %v3749_v48 = vsub.f32 %v8087_v3, %v3659_v62  ;;  %3874 = vadd.xlane.f32.xlu1 %v3873_v50 }
 0xf05   : > { %v3662_v53 = vpop.xlane.xlu0 %3661  ;;  %v3876_v27 = vsel %vm298_vm0, %v8222_v54, 0.0 }
 0xf06   : > { %v8227_v39 = vpop.eup %6447  ;;  %6457 = vpow2.f32 %v3781_v45  ;;  %v3783_v42 = vmul.f32 1.442695, %v3749_v48  ;;  %v3750_v31 = vsub.f32 %v8092_v1, %v3662_v53  ;;  %3877 = vadd.xlane.f32.xlu0 %v3876_v27 }
 0xf07   : > { %v3665_v14 = vpop.xlane.xlu1 %3664  ;;  %v3879_v17 = vsel %vm298_vm0, %v8227_v39, 0.0 }
 0xf08   : > { %v8232_v19 = vpop.eup %6449  ;;  %6459 = vpow2.f32 %v3783_v42  ;;  %v3785_v3 = vmul.f32 1.442695, %v3750_v31  ;;  %v3751_v60 = vsub.f32 %v8097_v37, %v3665_v14  ;;  %3880 = vadd.xlane.f32.xlu1 %v3879_v17 }
 0xf09   : > { %v3668_v55 = vpop.xlane.xlu0 %3667  ;;  %v3882_v4 = vsel %vm298_vm0, %v8232_v19, 0.0 }
 0xf0a   : > { %v8237_v44 = vpop.eup %6451  ;;  %6461 = vpow2.f32 %v3785_v3  ;;  %v3787_v1 = vmul.f32 1.442695, %v3751_v60  ;;  %v3752_v12 = vsub.f32 %v8102_v22, %v3668_v55  ;;  %3883 = vadd.xlane.f32.xlu0 %v3882_v4 }
 0xf0b   : > { %v3671_v40 = vpop.xlane.xlu1 %3670  ;;  %v3885_v52 = vsel %vm298_vm0, %v8237_v44, 0.0 }
 0xf0c   : > { %v8242_v61 = vpop.eup %6453  ;;  %6463 = vpow2.f32 %v3787_v1  ;;  %v3789_v37 = vmul.f32 1.442695, %v3752_v12  ;;  %v3753_v25 = vsub.f32 %v8107_v16, %v3671_v40  ;;  %3886 = vadd.xlane.f32.xlu1 %v3885_v52 }
 0xf0d   : > { %v3674_v58 = vpop.xlane.xlu0 %3673  ;;  %v3888_v62 = vsel %vm298_vm0, %v8242_v61, 0.0 }
 0xf0e   : > { %v8247_v50 = vpop.eup %6455  ;;  %6465 = vpow2.f32 %v3789_v37  ;;  %v3791_v22 = vmul.f32 1.442695, %v3753_v25  ;;  %v3754_v45 = vsub.f32 %v8112_v24, %v3674_v58  ;;  %3889 = vadd.xlane.f32.xlu0 %v3888_v62 }
 0xf0f   : > { %v3701_v48 = vpop.xlane.xlu1 %3700  ;;  %v3843_v53 = vsel %vm298_vm0, %v8247_v50, 0.0 }
 0xf10   : > { %v8252_v27 = vpop.eup %6457  ;;  %6467 = vpow2.f32 %v3791_v22  ;;  %v3793_v16 = vmul.f32 1.442695, %v3754_v45  ;;  %v3763_v42 = vsub.f32 %v8117_v46, %v3701_v48  ;;  %3844 = vadd.xlane.f32.xlu1 %v3843_v53 }
 0xf11   : > { %v3704_v31 = vpop.xlane.xlu0 %3703  ;;  %v3846_v14 = vsel %vm298_vm0, %v8252_v27, 0.0 }
 0xf12   : > { %v8257_v17 = vpop.eup %6459  ;;  %6469 = vpow2.f32 %v3793_v16  ;;  %v3811_v24 = vmul.f32 1.442695, %v3763_v42  ;;  %v3764_v3 = vsub.f32 %v8122_v63, %v3704_v31  ;;  %3847 = vadd.xlane.f32.xlu0 %v3846_v14 }
 0xf13   : > { %v3707_v60 = vpop.xlane.xlu1 %3706  ;;  %v3849_v55 = vsel %vm298_vm0, %v8257_v17, 0.0 }
 0xf14   : > { %v8262_v4 = vpop.eup %6461  ;;  %6471 = vpow2.f32 %v3811_v24  ;;  %v3813_v46 = vmul.f32 1.442695, %v3764_v3  ;;  %v3765_v1 = vsub.f32 %v8127_v41, %v3707_v60  ;;  %3850 = vadd.xlane.f32.xlu1 %v3849_v55 }
 0xf15   : > { %v3710_v12 = vpop.xlane.xlu0 %3709  ;;  %v3852_v40 = vsel %vm298_vm0, %v8262_v4, 0.0 }
 0xf16   : > { %v8267_v52 = vpop.eup %6463  ;;  %6473 = vpow2.f32 %v3813_v46  ;;  %v3815_v63 = vmul.f32 1.442695, %v3765_v1  ;;  %v3766_v37 = vsub.f32 %v8132_v51, %v3710_v12  ;;  %3853 = vadd.xlane.f32.xlu0 %v3852_v40 }
 0xf17   : > { %v3713_v25 = vpop.xlane.xlu1 %3712  ;;  %v3855_v58 = vsel %vm298_vm0, %v8267_v52, 0.0 }
 0xf18   : > { %v8272_v62 = vpop.eup %6465  ;;  %6475 = vpow2.f32 %v3815_v63  ;;  %v3817_v41 = vmul.f32 1.442695, %v3766_v37  ;;  %v3767_v22 = vsub.f32 %v8137_v59, %v3713_v25  ;;  %3856 = vadd.xlane.f32.xlu1 %v3855_v58 }
 0xf19   : > { %v3716_v45 = vpop.xlane.xlu0 %3715  ;;  %v3858_v48 = vsel %vm298_vm0, %v8272_v62, 0.0 }
 0xf1a   : > { %v8277_v53 = vpop.eup %6467  ;;  %6477 = vpow2.f32 %v3817_v41  ;;  %v3819_v51 = vmul.f32 1.442695, %v3767_v22  ;;  %v3768_v16 = vsub.f32 %v8142_v57, %v3716_v45  ;;  %3859 = vadd.xlane.f32.xlu0 %v3858_v48 }
 0xf1b   : > { %v3719_v42 = vpop.xlane.xlu1 %3718  ;;  %v3861_v31 = vsel %vm298_vm0, %v8277_v53, 0.0 }
 0xf1c   : > { %v8282_v14 = vpop.eup %6469  ;;  %6479 = vpow2.f32 %v3819_v51  ;;  %v3821_v59 = vmul.f32 1.442695, %v3768_v16  ;;  %v3769_v24 = vsub.f32 %v8147_v11, %v3719_v42  ;;  %3862 = vadd.xlane.f32.xlu1 %v3861_v31 }
 0xf1d   : > { %v3722_v3 = vpop.xlane.xlu0 %3721  ;;  %v3864_v60 = vsel %vm298_vm0, %v8282_v14, 0.0 }
 0xf1e   : > { %v8287_v55 = vpop.eup %6471  ;;  %6481 = vpow2.f32 %v3821_v59  ;;  %v3823_v57 = vmul.f32 1.442695, %v3769_v24  ;;  %v3770_v46 = vsub.f32 %v8152_v33, %v3722_v3  ;;  %3865 = vadd.xlane.f32.xlu0 %v3864_v60 }
 0xf1f   : > { %v3725_v1 = vpop.xlane.xlu1 %3724  ;;  %v3891_v12 = vsel %vm298_vm0, %v8287_v55, 0.0 }
 0xf20   : > { %v8292_v40 = vpop.eup %6473  ;;  %6483 = vpow2.f32 %v3823_v57  ;;  %v3825_v11 = vmul.f32 1.442695, %v3770_v46  ;;  %v3771_v63 = vsub.f32 %v8157_v43, %v3725_v1  ;;  %3892 = vadd.xlane.f32.xlu1 %v3891_v12 }
 0xf21   : > { %v3728_v37 = vpop.xlane.xlu0 %3727  ;;  %v3894_v25 = vsel %vm298_vm0, %v8292_v40, 0.0 }
 0xf22   : > { %v8297_v58 = vpop.eup %6475  ;;  %6485 = vpow2.f32 %v3825_v11  ;;  %v3827_v33 = vmul.f32 1.442695, %v3771_v63  ;;  %v3772_v41 = vsub.f32 %v8162_v28, %v3728_v37  ;;  %3895 = vadd.xlane.f32.xlu0 %v3894_v25 }
 0xf23   : > { %v3731_v22 = vpop.xlane.xlu1 %3730  ;;  %v3897_v45 = vsel %vm298_vm0, %v8297_v58, 0.0 }
 0xf24   : > { %v8302_v48 = vpop.eup %6477  ;;  %6487 = vpow2.f32 %v3827_v33  ;;  %v3829_v43 = vmul.f32 1.442695, %v3772_v41  ;;  %v3773_v51 = vsub.f32 %v8167_v0, %v3731_v22  ;;  %3898 = vadd.xlane.f32.xlu1 %v3897_v45 }
 0xf25   : > { %v3734_v16 = vpop.xlane.xlu0 %3733  ;;  %v3900_v42 = vsel %vm298_vm0, %v8302_v48, 0.0 }
 0xf26   : > { %v8307_v31 = vpop.eup %6479  ;;  %6489 = vpow2.f32 %v3829_v43  ;;  %v3831_v28 = vmul.f32 1.442695, %v3773_v51  ;;  %v3774_v59 = vsub.f32 %v8172_v18, %v3734_v16  ;;  %3901 = vadd.xlane.f32.xlu0 %v3900_v42 }
 0xf27   : > { %v3737_v24 = vpop.xlane.xlu1 %3736  ;;  %v3903_v3 = vsel %vm298_vm0, %v8307_v31, 0.0 }
 0xf28   : > { %v8312_v60 = vpop.eup %6481  ;;  %6491 = vpow2.f32 %v3831_v28  ;;  %v3833_v0 = vmul.f32 1.442695, %v3774_v59  ;;  %v3775_v57 = vsub.f32 %v8177_v35, %v3737_v24  ;;  %3904 = vadd.xlane.f32.xlu1 %v3903_v3 }
 0xf29   : > { %v3740_v46 = vpop.xlane.xlu0 %3739  ;;  %v3906_v1 = vsel %vm298_vm0, %v8312_v60, 0.0 }
 0xf2a   : > { %v8317_v12 = vpop.eup %6483  ;;  %6493 = vpow2.f32 %v3833_v0  ;;  %v3835_v18 = vmul.f32 1.442695, %v3775_v57  ;;  %v3776_v11 = vsub.f32 %v8182_v32, %v3740_v46  ;;  %3907 = vadd.xlane.f32.xlu0 %v3906_v1 }
 0xf2b   : > { %v3743_v63 = vpop.xlane.xlu1 %3742  ;;  %v3909_v37 = vsel %vm298_vm0, %v8317_v12, 0.0 }
 0xf2c   : > { %v8322_v25 = vpop.eup %6485  ;;  %6495 = vpow2.f32 %v3835_v18  ;;  %v3837_v35 = vmul.f32 1.442695, %v3776_v11  ;;  %v3777_v33 = vsub.f32 %v8187_v20, %v3743_v63  ;;  %3910 = vadd.xlane.f32.xlu1 %v3909_v37 }
 0xf2d   : > { %v3746_v41 = vpop.xlane.xlu0 %3745  ;;  %v3912_v22 = vsel %vm298_vm0, %v8322_v25, 0.0 }
 0xf2e   : > { %v8327_v45 = vpop.eup %6487  ;;  %6497 = vpow2.f32 %v3837_v35  ;;  %v3839_v32 = vmul.f32 1.442695, %v3777_v33  ;;  %v3778_v43 = vsub.f32 %v8192_v15, %v3746_v41  ;;  %3913 = vadd.xlane.f32.xlu0 %v3912_v22 }
 0xf2f   : > { %v3915_v51 = vsel %vm298_vm0, %v8327_v45, 0.0 }
 0xf30   : > { %v8332_v16 = vpop.eup %6489  ;;  %6499 = vpow2.f32 %v3839_v32  ;;  %v3841_v42 = vmul.f32 1.442695, %v3778_v43  ;;  %3916 = vadd.xlane.f32.xlu1 %v3915_v51 }
 0xf31   : > { %v3918_v20 = vsel %vm298_vm0, %v8332_v16, 0.0 }
 0xf32   : > { %v8336_v28 = vpop.eup %6491  ;;  %6501 = vpow2.f32 %v3841_v42  ;;  %3919 = vadd.xlane.f32.xlu0 %v3918_v20 }
 0xf33   : > { %v3921_v59 = vsel %vm298_vm0, %v8336_v28, 0.0 }
 0xf34   : > { %v8340_v15 = vpop.eup %6493  ;;  %3922 = vadd.xlane.f32.xlu1 %v3921_v59 }
 0xf35   : > { %v3924_v24 = vsel %vm298_vm0, %v8340_v15, 0.0 }
 0xf36   : > { %v8344_v3 = vpop.eup %6495  ;;  %3925 = vadd.xlane.f32.xlu0 %v3924_v24 }
 0xf37   : > { %v3927_v0 = vsel %vm298_vm0, %v8344_v3, 0.0 }
 0xf38   : > { %v8348_v57 = vpop.eup %6497  ;;  %3928 = vadd.xlane.f32.xlu1 %v3927_v0 }
 0xf39   : > { %v3930_v46 = vsel %vm298_vm0, %v8348_v57, 0.0 }
 0xf3a   : > { %v8352_v1 = vpop.eup %6499  ;;  %3931 = vadd.xlane.f32.xlu0 %v3930_v46 }
 0xf3b   : > { %v3933_v18 = vsel %vm298_vm0, %v8352_v1, 0.0 }
 0xf3c   : > { %v8356_v11 = vpop.eup %6501  ;;  %3934 = vadd.xlane.f32.xlu1 %v3933_v18 }
 0xf3d   : > { %v3936_v63 = vsel %vm298_vm0, %v8356_v11, 0.0 }
 0xf3e   : > { %3937 = vadd.xlane.f32.xlu0 %v3936_v63 }
 0xf8d   : > { %v3869_v37 = vpop.xlane.xlu1 %3868 }
 0xf8e   : > { %6503 = vrcp.f32 %v3869_v37 }
 0xf8f   : > { %v3872_v35 = vpop.xlane.xlu0 %3871 }
 0xf90   : > { %6505 = vrcp.f32 %v3872_v35 }
 0xf91   : > { %v3875_v33 = vpop.xlane.xlu1 %3874 }
 0xf92   : > { %6507 = vrcp.f32 %v3875_v33 }
 0xf93   : > { %v3878_v41 = vpop.xlane.xlu0 %3877 }
 0xf94   : > { %6509 = vrcp.f32 %v3878_v41 }
 0xf95   : > { %v3881_v22 = vpop.xlane.xlu1 %3880 }
 0xf96   : > { %6511 = vrcp.f32 %v3881_v22 }
 0xf97   : > { %v3884_v32 = vpop.xlane.xlu0 %3883 }
 0xf98   : > { %v6504_v43 = vpop.eup %6503  ;;  %6513 = vrcp.f32 %v3884_v32 }
 0xf99   : > { %v3887_v51 = vpop.xlane.xlu1 %3886  ;;  %v3979_v59 = vmul.f32 %v6504_v43, %v8207_v47  ;;  %v4020_v43 = vmul.bf16 %v7932_v38, %v7054_v10 }
 0xf9a   : > { %v6506_v42 = vpop.eup %6505  ;;  %6515 = vrcp.f32 %v3887_v51 }
 0xf9b   : > { %v3890_v20 = vpop.xlane.xlu0 %3889  ;;  %v3980_v24 = vmul.f32 %v6506_v42, %v8212_v36 }
 0xf9c   : > { %v6508_v0 = vpop.eup %6507  ;;  %6517 = vrcp.f32 %v3890_v20 }
 0xf9d   : > { %v3845_v46 = vpop.xlane.xlu1 %3844  ;;  %v4007_v18 = vpack.c.bf16 %v3980_v24, %v3979_v59  ;;  %v3981_v37 = vmul.f32 %v6508_v0, %v8217_v49  ;;  %v4021_v0 = vmul.bf16 %v7955_v30, %v7054_v10 }
 0xf9e   : > { %v6510_v63 = vpop.eup %6509  ;;  %6519 = vrcp.f32 %v3845_v46 }
 0xf9f   : > { %v3982_v35 = vmul.f32 %v6510_v63, %v8222_v54  ;;  %v3848_v33 = vpop.xlane.xlu0 %3847  ;;  %5977 = vmatprep.mubr.msk.bf16.mxu0 %vm298_vm0, %v4007_v18 }
 0xfa0   : > { %v6512_v41 = vpop.eup %6511  ;;  %6521 = vrcp.f32 %v3848_v33 }
 0xfa1   : > { %v4008_v22 = vpack.c.bf16 %v3982_v35, %v3981_v37  ;;  %v3851_v32 = vpop.xlane.xlu1 %3850  ;;  %v3983_v51 = vmul.f32 %v6512_v41, %v8227_v39  ;;  %v4022_v35 = vmul.bf16 %v7952_v56, %v7054_v10  ;;  %v4181_v10 = vmul.bf16 %v7940_v13, %v7153_v21 }
 0xfa2   : > { %v6514_v47 = vpop.eup %6513  ;;  %6523 = vrcp.f32 %v3851_v32 }
 0xfa3   : > { %v3854_v36 = vpop.xlane.xlu0 %3853  ;;  %5978 = vmatmul.mubr.msk.bf16.vlgmr.msra.gmra.mrb[64].mxu0 %vm298_vm0, %v4008_v22  ;;  %v3984_v49 = vmul.f32 %v6514_v47, %v8232_v19 }
 0xfa4   : > { %v6516_v54 = vpop.eup %6515  ;;  %6525 = vrcp.f32 %v3854_v36  ;;  %5986 = vmatpush3.bf16.msra.mxu0 %v7980_v9 }
 0xfa5   : > { %5987 = vmatprep.subr.bf16.mxu0 %v4020_v43  ;;  %v3857_v42 = vpop.xlane.xlu1 %3856  ;;  %v4009_v20 = vpack.c.bf16 %v3984_v49, %v3983_v51  ;;  %v3985_v46 = vmul.f32 %v6516_v54, %v8237_v44 }
 0xfa6   : > { %v6518_v59 = vpop.eup %6517  ;;  %6527 = vrcp.f32 %v3857_v42 }
 0xfa7   : > { %v3860_v24 = vpop.xlane.xlu0 %3859  ;;  %5981 = vmatprep.mubr.msk.bf16.mxu0 %vm298_vm0, %v4009_v20  ;;  %v3986_v39 = vmul.f32 %v6518_v59, %v8242_v61 }
 0xfa8   : > { %v6520_v19 = vpop.eup %6519  ;;  %6529 = vrcp.f32 %v3860_v24  ;;  %5988 = vmatpush3.bf16.msra.mxu0 %v4020_v43 }
 0xfa9   : > { %5989 = vmatprep.subr.bf16.mxu0 %v4021_v0  ;;  %v3863_v9 = vpop.xlane.xlu1 %3862  ;;  %v4010_v18 = vpack.c.bf16 %v3986_v39, %v3985_v46  ;;  %v3971_v33 = vmul.f32 %v6520_v19, %v8247_v50  ;;  %v4183_v39 = vmul.bf16 %v7955_v30, %v7153_v21 }
 0xfaa   : > { %v6522_v63 = vpop.eup %6521  ;;  %6531 = vrcp.f32 %v3863_v9 }
 0xfab   : > { %v3866_v37 = vpop.xlane.xlu0 %3865  ;;  %5982 = vmatmul.mubr.msk.bf16.gmra.mrb[68].mxu0 %vm298_vm0, %v4010_v18  ;;  %v3972_v44 = vmul.f32 %v6522_v63, %v8252_v27 }
 0xfac   : > { %v6524_v41 = vpop.eup %6523  ;;  %6533 = vrcp.f32 %v3866_v37  ;;  %5990 = vmatpush3.bf16.msra.mxu0 %v4021_v0 }
 0xfad   : > { %5991 = vmatprep.subr.bf16.mxu0 %v4022_v35  ;;  %v3893_v61 = vpop.xlane.xlu1 %3892  ;;  %v4003_v22 = vpack.c.bf16 %v3972_v44, %v3971_v33  ;;  %v3973_v47 = vmul.f32 %v6524_v41, %v8257_v17  ;;  %v4182_v17 = vmul.bf16 %v7932_v38, %v7153_v21 }
 0xfae   : > { %v6526_v32 = vpop.eup %6525  ;;  %6535 = vrcp.f32 %v3893_v61 }
 0xfaf   : > { %v3974_v36 = vmul.f32 %v6526_v32, %v8262_v4  ;;  %v3896_v43 = vpop.xlane.xlu0 %3895  ;;  %5993 = vmatprep.mubr.msk.bf16.mxu0 %vm298_vm0, %v4003_v22 }
 0xfb0   : > { %v6528_v50 = vpop.eup %6527  ;;  %6537 = vrcp.f32 %v3896_v43  ;;  %5992 = vmatpush3.bf16.msra.mxu0 %v4022_v35  ;;  %v4184_v35 = vmul.bf16 %v7952_v56, %v7153_v21  ;;  %v4270_v21 = vmul.bf16 %v7940_v13, %v7172_v5 }
 0xfb1   : > { %v4004_v27 = vpack.c.bf16 %v3974_v36, %v3973_v47  ;;  %6001 = vmatprep.subr.bf16.mxu0 %v4181_v10  ;;  %v3899_v51 = vpop.xlane.xlu1 %3898  ;;  %v3975_v4 = vmul.f32 %v6528_v50, %v8267_v52 }
 0xfb2   : > { %v6530_v49 = vpop.eup %6529  ;;  %6539 = vrcp.f32 %v3899_v51 }
 0xfb3   : > { %v3902_v54 = vpop.xlane.xlu0 %3901  ;;  %5994 = vmatmul.mubr.msk.bf16.vlgmr.msra.gmra.mrb[64].mxu0 %vm298_vm0, %v4004_v27  ;;  %v3976_v42 = vmul.f32 %v6530_v49, %v8272_v62 }
 0xfb4   : > { %v6532_v20 = vpop.eup %6531  ;;  %6541 = vrcp.f32 %v3902_v54  ;;  %6002 = vmatpush3.bf16.msra.mxu0 %v4181_v10 }
 0xfb5   : > { %6003 = vmatprep.subr.bf16.mxu0 %v4182_v17  ;;  %v3905_v59 = vpop.xlane.xlu1 %3904  ;;  %v4005_v24 = vpack.c.bf16 %v3976_v42, %v3975_v4  ;;  %v3977_v19 = vmul.f32 %v6532_v20, %v8277_v53 }
 0xfb6   : > { %v6534_v0 = vpop.eup %6533  ;;  %6543 = vrcp.f32 %v3905_v59 }
 0xfb7   : > { %v3908_v46 = vpop.xlane.xlu0 %3907  ;;  %5997 = vmatprep.mubr.msk.bf16.mxu0 %vm298_vm0, %v4005_v24  ;;  %v3978_v52 = vmul.f32 %v6534_v0, %v8282_v14  ;;  %v4273_v24 = vmul.bf16 %v7952_v56, %v7172_v5  ;;  %v6236_v56 = vld [vmem:[#allocation2 + $0xe8] sm:$0xff]  }
 0xfb8   : > { %v6536_v9 = vpop.eup %6535  ;;  %6545 = vrcp.f32 %v3908_v46  ;;  %6004 = vmatpush3.bf16.msra.mxu0 %v4182_v17  ;;  %v4272_v17 = vmul.bf16 %v7955_v30, %v7172_v5  ;;  %v6235_v46 = vld [vmem:[#allocation2 + $0xe0] sm:$0xff]  }
 0xfb9   : > { %6005 = vmatprep.subr.bf16.mxu0 %v4183_v39  ;;  %v3911_v62 = vpop.xlane.xlu1 %3910  ;;  %v4006_v18 = vpack.c.bf16 %v3978_v52, %v3977_v19  ;;  %v3987_v33 = vmul.f32 %v6536_v9, %v8287_v55 }
 0xfba   : > { %v6538_v63 = vpop.eup %6537  ;;  %6547 = vrcp.f32 %v3911_v62 }
 0xfbb   : > { %v3914_v37 = vpop.xlane.xlu0 %3913  ;;  %5998 = vmatmul.mubr.msk.bf16.gmra.mrb[68].mxu0 %vm298_vm0, %v4006_v18  ;;  %v3988_v53 = vmul.f32 %v6538_v63, %v8292_v40 }
 0xfbc   : > { %v6540_v44 = vpop.eup %6539  ;;  %6549 = vrcp.f32 %v3914_v37  ;;  %6006 = vmatpush3.bf16.msra.mxu0 %v4183_v39 }
 0xfbd   : > { %6007 = vmatprep.subr.bf16.mxu0 %v4184_v35  ;;  %v3917_v14 = vpop.xlane.xlu1 %3916  ;;  %v4011_v41 = vpack.c.bf16 %v3988_v53, %v3987_v33  ;;  %v3989_v22 = vmul.f32 %v6540_v44, %v8297_v58  ;;  %v4271_v58 = vmul.bf16 %v7932_v38, %v7172_v5 }
 0xfbe   : > { %v6542_v61 = vpop.eup %6541  ;;  %6551 = vrcp.f32 %v3917_v14 }
 0xfbf   : > { %v3990_v32 = vmul.f32 %v6542_v61, %v8302_v48  ;;  %v3920_v47 = vpop.xlane.xlu0 %3919  ;;  %6009 = vmatprep.mubr.msk.bf16.mxu0 %vm298_vm0, %v4011_v41 }
 0xfc0   : > { %v6544_v55 = vpop.eup %6543  ;;  %6553 = vrcp.f32 %v3920_v47  ;;  %6008 = vmatpush3.bf16.msra.mxu0 %v4184_v35  ;;  %v5362_v47 = vld [vmem:[%s8628_s2 + $0xa] ss:$0 sm:$0xff] }
 0xfc1   : > { %v4012_v40 = vpack.c.bf16 %v3990_v32, %v3989_v22  ;;  %6017 = vmatprep.subr.bf16.mxu0 %v4270_v21  ;;  %v3923_v36 = vpop.xlane.xlu1 %3922  ;;  %v3991_v48 = vmul.f32 %v6544_v55, %v8307_v31 }
 0xfc2   : > { %v6546_v43 = vpop.eup %6545  ;;  %6555 = vrcp.f32 %v3923_v36 }
 0xfc3   : > { %v3926_v10 = vpop.xlane.xlu0 %3925  ;;  %6010 = vmatmul.mubr.msk.bf16.vlgmr.msra.gmra.mrb[64].mxu0 %vm298_vm0, %v4012_v40  ;;  %v3992_v50 = vmul.f32 %v6546_v43, %v8312_v60 }
 0xfc4   : > { %v6548_v27 = vpop.eup %6547  ;;  %6557 = vrcp.f32 %v3926_v10  ;;  %6018 = vmatpush3.bf16.msra.mxu0 %v4270_v21 }
 0xfc5   : > { %6019 = vmatprep.subr.bf16.mxu0 %v4271_v58  ;;  %v3929_v13 = vpop.xlane.xlu1 %3928  ;;  %v4013_v51 = vpack.c.bf16 %v3992_v50, %v3991_v48  ;;  %v3993_v38 = vmul.f32 %v6548_v27, %v8317_v12 }
 0xfc6   : > { %v6550_v49 = vpop.eup %6549  ;;  %6559 = vrcp.f32 %v3929_v13 }
 0xfc7   : > { %v3932_v54 = vpop.xlane.xlu0 %3931  ;;  %6013 = vmatprep.mubr.msk.bf16.mxu0 %vm298_vm0, %v4013_v51  ;;  %v3994_v31 = vmul.f32 %v6550_v49, %v8322_v25 }
 0xfc8   : > { %v6552_v4 = vpop.eup %6551  ;;  %6561 = vrcp.f32 %v3932_v54  ;;  %6020 = vmatpush3.bf16.msra.mxu0 %v4271_v58 }
 0xfc9   : > { %6021 = vmatprep.subr.bf16.mxu0 %v4272_v17  ;;  %v3935_v60 = vpop.xlane.xlu1 %3934  ;;  %v4014_v42 = vpack.c.bf16 %v3994_v31, %v3993_v38  ;;  %v3995_v30 = vmul.f32 %v6552_v4, %v8327_v45 }
 0xfca   : > { %v6554_v20 = vpop.eup %6553  ;;  %6563 = vrcp.f32 %v3935_v60 }
 0xfcb   : > { %v3938_v59 = vpop.xlane.xlu0 %3937  ;;  %6014 = vmatmul.mubr.msk.bf16.gmra.mrb[68].mxu0 %vm298_vm0, %v4014_v42  ;;  %v3996_v12 = vmul.f32 %v6554_v20, %v8332_v16 }
 0xfcc   : > { %v6556_v0 = vpop.eup %6555  ;;  %6565 = vrcp.f32 %v3938_v59  ;;  %6022 = vmatpush3.bf16.msra.mxu0 %v4272_v17 }
 0xfcd   : > { %6023 = vmatprep.subr.bf16.mxu0 %v4273_v24  ;;  %v4015_v25 = vpack.c.bf16 %v3996_v12, %v3995_v30  ;;  %v3997_v19 = vmul.f32 %v6556_v0, %v8336_v28 }
 0xfce   : > { %v6558_v39 = vpop.eup %6557 }
 0xfcf   : > { %v3998_v52 = vmul.f32 %v6558_v39, %v8340_v15  ;;  %6025 = vmatprep.mubr.msk.bf16.mxu0 %vm298_vm0, %v4015_v25  ;;  %v6238_v25 = vld [vmem:[#allocation2 + $0x118] sm:$0xff]  }
 0xfd0   : > { %v6560_v9 = vpop.eup %6559  ;;  %6024 = vmatpush3.bf16.msra.mxu0 %v4273_v24 }
 0xfd1   : > { %v4016_v5 = vpack.c.bf16 %v3998_v52, %v3997_v19  ;;  %6033 = vmatprep.subr.bf16.mxu0 %v6235_v46  ;;  %v3999_v16 = vmul.f32 %v6560_v9, %v8344_v3 }
 0xfd2   : > { %v6562_v45 = vpop.eup %6561 }
 0xfd3   : > { %6026 = vmatmul.mubr.msk.bf16.vlgmr.msra.gmra.mrb[64].mxu0 %vm298_vm0, %v4016_v5  ;;  %v4000_v62 = vmul.f32 %v6562_v45, %v8348_v57 }
 0xfd4   : > { %v6564_v18 = vpop.eup %6563  ;;  %6034 = vmatpush3.bf16.msra.mxu0 %v6235_v46 }
 0xfd5   : > { %v4017_v63 = vpack.c.bf16 %v4000_v62, %v3999_v16  ;;  %6035 = vmatprep.subr.bf16.mxu0 %v6236_v56  ;;  %v4001_v15 = vmul.f32 %v6564_v18, %v8352_v1 }
 0xfd6   : > { %v6566_v28 = vpop.eup %6565 }
 0xfd7   : > { %6029 = vmatprep.mubr.msk.bf16.mxu0 %vm298_vm0, %v4017_v63  ;;  %v4002_v37 = vmul.f32 %v6566_v28, %v8356_v11 }
 0xfd8   : > { %6036 = vmatpush3.bf16.msra.mxu0 %v6236_v56 }
 0xfd9   : > { %v4018_v35 = vpack.c.bf16 %v4002_v37, %v4001_v15 }
 0xfdb   : > { %6030 = vmatmul.mubr.msk.bf16.gmra.mrb[68].mxu0 %vm298_vm0, %v4018_v35 }
0x10a6   : > { %v6027_v33 = vpop.f32.mrb[64].mxu0 }
0x10a7   : > { %v4320_v53 = vpop.f32.mrb[65].mxu0 }
0x10a8   : > { %v6028_v3 = vpop.f32.mrb[66].mxu0 }
0x10a9   : > { %v4360_v44 = vpack.c.bf16 %v6028_v3, %v6027_v33  ;;  %v4323_v57 = vpop.f32.mrb[67].mxu0 }
0x10aa   : > { %v4359_v14 = vpack.c.bf16 %v4323_v57, %v4320_v53 }
0x10ac   : > { %6037 = vmatprep.mubr.msk.bf16.mxu0 %vm737_vm9, %v4359_v14 }
0x10ad   : > { %6038 = vmatmul.mubr.msk.bf16.vlgmr.msra.gmra.mrb[72].mxu0 %vm737_vm9, %v4360_v44 }
0x10ae   : > { %v6031_v41 = vpop.f32.mrb[68].mxu0 }
0x10af   : > { %v4336_v61 = vpop.f32.mrb[69].mxu0 }
0x10b0   : > { %v6032_v22 = vpop.f32.mrb[70].mxu0 }
0x10b1   : > { %v4362_v1 = vpack.c.bf16 %v6032_v22, %v6031_v41  ;;  %v4339_v32 = vpop.f32.mrb[71].mxu0 }
0x10b2   : > { %v4361_v11 = vpack.c.bf16 %v4339_v32, %v4336_v61 }
0x10b4   : > { %6041 = vmatprep.mubr.msk.bf16.mxu0 %vm737_vm9, %v4361_v11 }
0x10b5   : > { %6042 = vmatmul.mubr.msk.bf16.gmra.mrb[76].mxu0 %vm737_vm9, %v4362_v1 }
0x1180   : > { %v6039_v21 = vpop.f32.mrb[72].mxu0 }
0x1181   : > { %v4425_v55 = vpop.f32.mrb[73].mxu0  ;;  %v4434_v40 = vadd.f32 %v6039_v21, %v5362_v47 }
0x1182   : > { %v4426_v36 = vadd.f32 %v5362_v47, %v4425_v55  ;;  %v6040_v43 = vpop.f32.mrb[74].mxu0 }
0x1183   : > { %v4428_v10 = vpop.f32.mrb[75].mxu0  ;;  %v4437_v48 = vadd.f32 %v6040_v43, %v5362_v47  ;;  %v8442_v27 = vadd.f32 %v4434_v40, %v7770_v6 }
0x1184   : > { %v8439_v58 = vadd.f32 %v4426_v36, %v7767_v2  ;;  %v4429_v50 = vadd.f32 %v5362_v47, %v4428_v10 }
0x1185   : > { %v8450_v49 = vadd.f32 %v4437_v48, %v7778_v26 }
0x1186   : > { %v8445_v13 = vadd.f32 %v4429_v50, %v7773_v34  ;;  %v4464_v51 = vsel %vm737_vm9, %v8439_v58, 0.0  ;;  %v4470_v34 = vsel %vm737_vm9, %v8442_v27, 0.0 }
0x1187   : > { %4465 = vadd.xlane.f32.xlu1 %v4464_v51  ;;  %v4473_v20 = vsel %vm737_vm9, %v8450_v49, 0.0 }
0x1188   : > { %v6043_v54 = vpop.f32.mrb[76].mxu0  ;;  %v4467_v2 = vsel %vm737_vm9, %v8445_v13, 0.0 }
0x1189   : > { %4468 = vadd.xlane.f32.xlu0 %v4467_v2  ;;  %v4441_v17 = vpop.f32.mrb[77].mxu0  ;;  %v4450_v38 = vadd.f32 %v6043_v54, %v5362_v47  ;;  %v6239_v2 = vld [vmem:[#allocation2 + $0x120] sm:$0xff]  }
0x118a   : > { %v4442_v31 = vadd.f32 %v5362_v47, %v4441_v17  ;;  %v6044_v6 = vpop.f32.mrb[78].mxu0  ;;  %v6240_v17 = vld [vmem:[#allocation2 + $0x128] sm:$0xff]   ;;  %6057 = vmatprep.subr.bf16.mxu0 %v6239_v2 }
0x118b   : > { %4471 = vadd.xlane.f32.xlu1 %v4470_v34  ;;  %v4444_v4 = vpop.f32.mrb[79].mxu0  ;;  %v4453_v42 = vadd.f32 %v6044_v6, %v5362_v47  ;;  %v8462_v59 = vadd.f32 %v4450_v38, %v7790_v29  ;;  %6058 = vmatpush3.bf16.msra.mxu0 %v6239_v2 }
0x118c   : > { %v8457_v60 = vadd.f32 %v4442_v31, %v7785_v23  ;;  %v4445_v26 = vadd.f32 %v5362_v47, %v4444_v4  ;;  %6059 = vmatprep.subr.bf16.mxu0 %v6240_v17 }
0x118d   : > { %4474 = vadd.xlane.f32.xlu0 %v4473_v20  ;;  %v8470_v12 = vadd.f32 %v4453_v42, %v7798_v8  ;;  %v4482_v0 = vsel %vm737_vm9, %v8462_v59, 0.0 }
0x118e   : > { %v8465_v24 = vadd.f32 %v4445_v26, %v7793_v7  ;;  %v4476_v30 = vsel %vm737_vm9, %v8457_v60, 0.0  ;;  %v6237_v7 = vld [vmem:[#allocation2 + $0x110] sm:$0xff]  }
0x118f   : > { %4477 = vadd.xlane.f32.xlu1 %v4476_v30  ;;  %v4485_v29 = vsel %vm737_vm9, %v8470_v12, 0.0  ;;  %6045 = vmatprep.subr.bf16.mxu1 %v6237_v7 }
0x1190   : > { %v4479_v23 = vsel %vm737_vm9, %v8465_v24, 0.0  ;;  %6046 = vmatpush3.bf16.msra.mxu1 %v6237_v7  ;;  %6060 = vmatpush3.bf16.msra.mxu0 %v6240_v17 }
0x1191   : > { %4480 = vadd.xlane.f32.xlu0 %v4479_v23  ;;  %6047 = vmatprep.subr.bf16.mxu1 %v6238_v25 }
0x1193   : > { %4483 = vadd.xlane.f32.xlu1 %v4482_v0 }
0x1194   : > { %6048 = vmatpush3.bf16.msra.mxu1 %v6238_v25 }
0x1195   : > { %4486 = vadd.xlane.f32.xlu0 %v4485_v29 }
0x1214   : > { %v4466_v8 = vpop.xlane.xlu1 %4465 }
0x1215   : > { %v4488_v46 = vmul.f32 0.03125, %v4466_v8 }
0x1216   : > { %v4469_v39 = vpop.xlane.xlu0 %4468 }
0x1217   : > { %v8479_v19 = vsub.f32 %v8439_v58, %v4488_v46  ;;  %v4489_v52 = vmul.f32 0.03125, %v4469_v39 }
0x1218   : > { %v4472_v9 = vpop.xlane.xlu1 %4471 }
0x1219   : > { %v8482_v5 = vsub.f32 %v8445_v13, %v4489_v52  ;;  %v4490_v56 = vmul.f32 0.03125, %v4472_v9  ;;  %v4504_v45 = vmul.f32 %v8479_v19, %v8479_v19 }
0x121a   : > { %v4475_v16 = vpop.xlane.xlu0 %4474 }
0x121b   : > { %v8487_v62 = vsub.f32 %v8442_v27, %v4490_v56  ;;  %v4491_v18 = vmul.f32 0.03125, %v4475_v16  ;;  %v4512_v63 = vsel %vm737_vm9, %v4504_v45, 0.0  ;;  %v4505_v28 = vmul.f32 %v8482_v5, %v8482_v5 }
0x121c   : > { %4513 = vadd.xlane.f32.xlu1 %v4512_v63  ;;  %v4478_v15 = vpop.xlane.xlu1 %4477 }
0x121d   : > { %v8493_v37 = vsub.f32 %v8450_v49, %v4491_v18  ;;  %v4492_v35 = vmul.f32 0.03125, %v4478_v15  ;;  %v4515_v33 = vsel %vm737_vm9, %v4505_v28, 0.0  ;;  %v4506_v53 = vmul.f32 %v8487_v62, %v8487_v62  ;;  %v5369_v18 = vld [vmem:[%s8628_s2 + $0xb] ss:$0 sm:$0xff] }
0x121e   : > { %4516 = vadd.xlane.f32.xlu0 %v4515_v33  ;;  %v4481_v3 = vpop.xlane.xlu0 %4480 }
0x121f   : > { %v8499_v44 = vsub.f32 %v8457_v60, %v4492_v35  ;;  %v4493_v57 = vmul.f32 0.03125, %v4481_v3  ;;  %v4518_v14 = vsel %vm737_vm9, %v4506_v53, 0.0  ;;  %v4507_v41 = vmul.f32 %v8493_v37, %v8493_v37 }
0x1220   : > { %4519 = vadd.xlane.f32.xlu1 %v4518_v14  ;;  %v4484_v61 = vpop.xlane.xlu1 %4483  ;;  %v5370_v14 = vld [vmem:[%s8628_s2 + $0xc] ss:$0 sm:$0xff] }
0x1221   : > { %v8505_v22 = vsub.f32 %v8465_v24, %v4493_v57  ;;  %v4494_v1 = vmul.f32 0.03125, %v4484_v61  ;;  %v4521_v32 = vsel %vm737_vm9, %v4507_v41, 0.0  ;;  %v4508_v11 = vmul.f32 %v8499_v44, %v8499_v44 }
0x1222   : > { %4522 = vadd.xlane.f32.xlu0 %v4521_v32  ;;  %v4487_v47 = vpop.xlane.xlu0 %4486 }
0x1223   : > { %v8511_v21 = vsub.f32 %v8462_v59, %v4494_v1  ;;  %v4495_v55 = vmul.f32 0.03125, %v4487_v47  ;;  %v4524_v40 = vsel %vm737_vm9, %v4508_v11, 0.0  ;;  %v4509_v36 = vmul.f32 %v8505_v22, %v8505_v22 }
0x1224   : > { %4525 = vadd.xlane.f32.xlu1 %v4524_v40 }
0x1225   : > { %v8517_v43 = vsub.f32 %v8470_v12, %v4495_v55  ;;  %v4527_v10 = vsel %vm737_vm9, %v4509_v36, 0.0  ;;  %v4510_v48 = vmul.f32 %v8511_v21, %v8511_v21 }
0x1226   : > { %4528 = vadd.xlane.f32.xlu0 %v4527_v10 }
0x1227   : > { %v4530_v50 = vsel %vm737_vm9, %v4510_v48, 0.0  ;;  %v4511_v51 = vmul.f32 %v8517_v43, %v8517_v43 }
0x1228   : > { %4531 = vadd.xlane.f32.xlu1 %v4530_v50 }
0x1229   : > { %v4533_v54 = vsel %vm737_vm9, %v4511_v51, 0.0 }
0x122a   : > { %4534 = vadd.xlane.f32.xlu0 %v4533_v54 }
0x12a9   : > { %v4514_v38 = vpop.xlane.xlu1 %4513 }
0x12aa   : > { %v4536_v31 = vmul.f32 0.03125, %v4514_v38 }
0x12ab   : > { %v4517_v6 = vpop.xlane.xlu0 %4516 }
0x12ac   : > { %v4544_v34 = vadd.f32 1e-05, %v4536_v31  ;;  %v4537_v4 = vmul.f32 0.03125, %v4517_v6 }
0x12ad   : > { %v4520_v42 = vpop.xlane.xlu1 %4519 }
0x12ae   : > { %6567 = vrsqrt.f32 %v4544_v34  ;;  %v4545_v26 = vadd.f32 1e-05, %v4537_v4  ;;  %v4538_v20 = vmul.f32 0.03125, %v4520_v42 }
0x12af   : > { %v4523_v30 = vpop.xlane.xlu0 %4522 }
0x12b0   : > { %6569 = vrsqrt.f32 %v4545_v26  ;;  %v4546_v23 = vadd.f32 1e-05, %v4538_v20  ;;  %v4539_v0 = vmul.f32 0.03125, %v4523_v30  ;;  %v6242_v30 = vld [vmem:[#allocation2 + $0x138] sm:$0xff]  }
0x12b1   : > { %v4526_v29 = vpop.xlane.xlu1 %4525 }
0x12b2   : > { %6571 = vrsqrt.f32 %v4546_v23  ;;  %v4547_v7 = vadd.f32 1e-05, %v4539_v0  ;;  %v4540_v25 = vmul.f32 0.03125, %v4526_v29  ;;  %v6244_v23 = vld [vmem:[#allocation2 + $0x148] sm:$0xff]   ;;  %v6245_v0 = vld [vmem:[#allocation2 + $0x150] sm:$0xff]   ;;  %v6246_v29 = vld [vmem:[#allocation2 + $0x158] sm:$0xff]  }
0x12b3   : > { %v4529_v8 = vpop.xlane.xlu0 %4528 }
0x12b4   : > { %6573 = vrsqrt.f32 %v4547_v7  ;;  %v4548_v46 = vadd.f32 1e-05, %v4540_v25  ;;  %v4541_v39 = vmul.f32 0.03125, %v4529_v8  ;;  %v5371_v7 = vld [vmem:[%s8628_s2 + $0xe] ss:$0 sm:$0xff] }
0x12b5   : > { %v4532_v52 = vpop.xlane.xlu1 %4531 }
0x12b6   : > { %6575 = vrsqrt.f32 %v4548_v46  ;;  %v4549_v9 = vadd.f32 1e-05, %v4541_v39  ;;  %v4542_v56 = vmul.f32 0.03125, %v4532_v52 }
0x12b7   : > { %v4535_v45 = vpop.xlane.xlu0 %4534 }
0x12b8   : > { %v6568_v16 = vpop.eup %6567  ;;  %6577 = vrsqrt.f32 %v4549_v9  ;;  %v4550_v63 = vadd.f32 1e-05, %v4542_v56  ;;  %v4543_v28 = vmul.f32 0.03125, %v4535_v45 }
0x12b9   : > { %v4560_v15 = vmul.f32 %v6568_v16, %v8479_v19 }
0x12ba   : > { %v6570_v35 = vpop.eup %6569  ;;  %6579 = vrsqrt.f32 %v4550_v63  ;;  %v4551_v33 = vadd.f32 1e-05, %v4543_v28 }
0x12bb   : > { %v4561_v53 = vmul.f32 %v6570_v35, %v8482_v5  ;;  %v4572_v3 = vmul.f32 %v5369_v18, %v4560_v15 }
0x12bc   : > { %v6572_v57 = vpop.eup %6571  ;;  %6581 = vrsqrt.f32 %v4551_v33 }
0x12bd   : > { %v4562_v41 = vmul.f32 %v6572_v57, %v8487_v62  ;;  %v4573_v61 = vmul.f32 %v5369_v18, %v4561_v53  ;;  %v4584_v19 = vadd.f32 %v5370_v14, %v4572_v3 }
0x12be   : > { %v6574_v1 = vpop.eup %6573 }
0x12bf   : > { %v4574_v32 = vmul.f32 %v5369_v18, %v4562_v41  ;;  %v4563_v11 = vmul.f32 %v6574_v1, %v8493_v37  ;;  %v4585_v47 = vadd.f32 %v5370_v14, %v4573_v61 }
0x12c0   : > { %v6576_v55 = vpop.eup %6575 }
0x12c1   : > { %v4575_v40 = vmul.f32 %v5369_v18, %v4563_v11  ;;  %v4564_v5 = vmul.f32 %v6576_v55, %v8499_v44  ;;  %v4592_v36 = vpack.c.bf16 %v4585_v47, %v4584_v19  ;;  %v4586_v48 = vadd.f32 %v5370_v14, %v4574_v32 }
0x12c2   : > { %v6578_v10 = vpop.eup %6577 }
0x12c3   : > { %v4587_v50 = vadd.f32 %v5370_v14, %v4575_v40  ;;  %v4565_v51 = vmul.f32 %v6578_v10, %v8505_v22  ;;  %6049 = vmatprep.mubr.msk.bf16.mxu1 %vm737_vm9, %v4592_v36  ;;  %v4576_v62 = vmul.f32 %v5369_v18, %v4564_v5 }
0x12c4   : > { %v6580_v54 = vpop.eup %6579 }
0x12c5   : > { %v4566_v2 = vmul.f32 %v6580_v54, %v8511_v21  ;;  %v4593_v17 = vpack.c.bf16 %v4587_v50, %v4586_v48  ;;  %v4577_v37 = vmul.f32 %v5369_v18, %v4565_v51  ;;  %v4588_v44 = vadd.f32 %v5370_v14, %v4576_v62  ;;  %v6241_v21 = vld [vmem:[#allocation2 + $0x130] sm:$0xff]  }
0x12c6   : > { %v6582_v38 = vpop.eup %6581  ;;  %6061 = vmatprep.subr.bf16.mxu0 %v6241_v21 }
0x12c7   : > { %v4567_v31 = vmul.f32 %v6582_v38, %v8517_v43  ;;  %6050 = vmatmul.mubr.msk.bf16.vlgmr.msra.gmra.mrb[120].mxu1 %vm737_vm9, %v4593_v17  ;;  %v4589_v6 = vadd.f32 %v5370_v14, %v4577_v37  ;;  %v4578_v34 = vmul.f32 %v5369_v18, %v4566_v2  ;;  %6062 = vmatpush3.bf16.msra.mxu0 %v6241_v21  ;;  %v6243_v43 = vld [vmem:[#allocation2 + $0x140] sm:$0xff]  }
0x12c8   : > { %6063 = vmatprep.subr.bf16.mxu0 %v6242_v30 }
0x12c9   : > { %v4594_v4 = vpack.c.bf16 %v4589_v6, %v4588_v44  ;;  %v4579_v42 = vmul.f32 %v5369_v18, %v4567_v31  ;;  %v4590_v22 = vadd.f32 %v5370_v14, %v4578_v34 }
0x12cb   : > { %6053 = vmatprep.mubr.msk.bf16.mxu1 %vm737_vm9, %v4594_v4  ;;  %v4591_v26 = vadd.f32 %v5370_v14, %v4579_v42  ;;  %6064 = vmatpush3.bf16.msra.mxu0 %v6242_v30 }
0x12cc   : > { %6065 = vmatprep.subr.bf16.mxu0 %v6243_v43 }
0x12cd   : > { %v4595_v20 = vpack.c.bf16 %v4591_v26, %v4590_v22 }
0x12cf   : > { %6054 = vmatmul.mubr.msk.bf16.gmra.mrb[124].mxu1 %vm737_vm9, %v4595_v20  ;;  %6066 = vmatpush3.bf16.msra.mxu0 %v6243_v43 }
0x12d0   : > { %6067 = vmatprep.subr.bf16.mxu0 %v6244_v23 }
0x12d3   : > { %6068 = vmatpush3.bf16.msra.mxu0 %v6244_v23 }
0x12d4   : > { %6069 = vmatprep.subr.bf16.mxu0 %v6245_v0 }
0x12d7   : > { %6070 = vmatpush3.bf16.msra.mxu0 %v6245_v0 }
0x12d8   : > { %6071 = vmatprep.subr.bf16.mxu0 %v6246_v29 }
0x12db   : > { %6072 = vmatpush3.bf16.msra.mxu0 %v6246_v29 }
0x139a   : > { %v6051_v25 = vpop.f32.mrb[120].mxu1 }
0x139b   : > { %v4667_v8 = vadd.f32 %v6051_v25, %v5371_v7  ;;  %v4658_v46 = vpop.f32.mrb[121].mxu1 }
0x139c   : > { %v4659_v39 = vadd.f32 %v5371_v7, %v4658_v46  ;;  %v6052_v52 = vpop.f32.mrb[122].mxu1 }
0x139d   : > { %v4699_v9 = vmul.f32 0.70710677, %v4667_v8  ;;  %v4670_v56 = vadd.f32 %v6052_v52, %v5371_v7  ;;  %v4661_v45 = vpop.f32.mrb[123].mxu1  ;;  %v4691_v10 = vmul.f32 0.5, %v4667_v8  ;;  %v5378_v52 = vld [vmem:[%s8628_s2 + $0xd] ss:$0 sm:$0xff] }
0x139e   : > { %v4697_v16 = vmul.f32 0.70710677, %v4659_v39  ;;  %v4662_v18 = vadd.f32 %v5371_v7, %v4661_v45  ;;  %v4689_v51 = vmul.f32 0.5, %v4659_v39 }
0x139f   : > { %6583 = verf.f32 %v4699_v9  ;;  %v4700_v63 = vmul.f32 0.70710677, %v4670_v56  ;;  %v4692_v48 = vmul.f32 0.5, %v4670_v56 }
0x13a0   : > { %6585 = verf.f32 %v4697_v16  ;;  %v4698_v28 = vmul.f32 0.70710677, %v4662_v18  ;;  %v4690_v62 = vmul.f32 0.5, %v4662_v18 }
0x13a1   : > { %6587 = verf.f32 %v4700_v63 }
0x13a2   : > { %6589 = verf.f32 %v4698_v28  ;;  %v6055_v15 = vpop.f32.mrb[124].mxu1 }
0x13a3   : > { %v4683_v35 = vadd.f32 %v6055_v15, %v5371_v7  ;;  %v4674_v33 = vpop.f32.mrb[125].mxu1 }
0x13a4   : > { %v4675_v53 = vadd.f32 %v5371_v7, %v4674_v33  ;;  %v6056_v3 = vpop.f32.mrb[126].mxu1 }
0x13a5   : > { %v4703_v57 = vmul.f32 0.70710677, %v4683_v35  ;;  %v4686_v14 = vadd.f32 %v6056_v3, %v5371_v7  ;;  %v4677_v41 = vpop.f32.mrb[127].mxu1  ;;  %v4695_v20 = vmul.f32 0.5, %v4683_v35 }
0x13a6   : > { %v4701_v61 = vmul.f32 0.70710677, %v4675_v53  ;;  %v4678_v1 = vadd.f32 %v5371_v7, %v4677_v41  ;;  %v4693_v43 = vmul.f32 0.5, %v4675_v53 }
0x13a7   : > { %6591 = verf.f32 %v4703_v57  ;;  %v4704_v32 = vmul.f32 0.70710677, %v4686_v14  ;;  %v4696_v21 = vmul.f32 0.5, %v4686_v14 }
0x13a8   : > { %6593 = verf.f32 %v4701_v61  ;;  %v4702_v11 = vmul.f32 0.70710677, %v4678_v1  ;;  %v4694_v23 = vmul.f32 0.5, %v4678_v1 }
0x13a9   : > { %v6584_v19 = vpop.eup %6583  ;;  %6595 = verf.f32 %v4704_v32 }
0x13aa   : > { %v6586_v47 = vpop.eup %6585  ;;  %v4715_v55 = vadd.f32 1.0, %v6584_v19  ;;  %6597 = verf.f32 %v4702_v11 }
0x13ab   : > { %v6588_v40 = vpop.eup %6587  ;;  %v4713_v5 = vadd.f32 1.0, %v6586_v47 }
0x13ac   : > { %v6590_v36 = vpop.eup %6589  ;;  %v4716_v50 = vadd.f32 1.0, %v6588_v40  ;;  %v4723_v2 = vmul.f32 %v4715_v55, %v4691_v10 }
0x13ad   : > { %v4714_v54 = vadd.f32 1.0, %v6590_v36  ;;  %v4721_v37 = vmul.f32 %v4713_v5, %v4689_v51 }
0x13ae   : > { %v4724_v17 = vmul.f32 %v4716_v50, %v4692_v48 }
0x13af   : > { %v4722_v38 = vmul.f32 %v4714_v54, %v4690_v62 }
0x13b0   : > { %v4730_v31 = vpack.c.bf16 %v4724_v17, %v4723_v2 }
0x13b1   : > { %v6592_v44 = vpop.eup %6591  ;;  %v4729_v6 = vpack.c.bf16 %v4722_v38, %v4721_v37 }
0x13b2   : > { %v6594_v34 = vpop.eup %6593  ;;  %v4719_v4 = vadd.f32 1.0, %v6592_v44 }
0x13b3   : > { %v6596_v42 = vpop.eup %6595  ;;  %v4717_v22 = vadd.f32 1.0, %v6594_v34  ;;  %6073 = vmatprep.mubr.bf16.mxu0 %v4729_v6 }
0x13b4   : > { %v6598_v26 = vpop.eup %6597  ;;  %v4720_v30 = vadd.f32 1.0, %v6596_v42  ;;  %6074 = vmatmul.mubr.bf16.vlgmr.msra.gmra.mrb[80].mxu0 %v4730_v31  ;;  %v4727_v29 = vmul.f32 %v4719_v4, %v4695_v20 }
0x13b5   : > { %v4718_v0 = vadd.f32 1.0, %v6598_v26  ;;  %v4725_v25 = vmul.f32 %v4717_v22, %v4693_v43 }
0x13b6   : > { %v4728_v7 = vmul.f32 %v4720_v30, %v4696_v21 }
0x13b7   : > { %v4726_v8 = vmul.f32 %v4718_v0, %v4694_v23 }
0x13b8   : > { %v4732_v46 = vpack.c.bf16 %v4728_v7, %v4727_v29 }
0x13b9   : > { %v4731_v39 = vpack.c.bf16 %v4726_v8, %v4725_v25 }
0x13bb   : > { %6077 = vmatprep.mubr.bf16.mxu0 %v4731_v39 }
0x13bc   : > { %6078 = vmatmul.mubr.bf16.gmra.mrb[84].mxu0 %v4732_v46 }
0x1487   : > { %v6075_v9 = vpop.f32.mrb[80].mxu0 }
0x1488   : > { %v4819_v56 = vpop.f32.mrb[81].mxu0  ;;  %v4828_v45 = vadd.f32 %v6075_v9, %v5378_v52 }
0x1489   : > { %v4820_v16 = vadd.f32 %v5378_v52, %v4819_v56  ;;  %v6076_v18 = vpop.f32.mrb[82].mxu0 }
0x148a   : > { %v4822_v63 = vpop.f32.mrb[83].mxu0  ;;  %v4831_v15 = vadd.f32 %v6076_v18, %v5378_v52  ;;  %v4852_v33 = vadd.f32 %v4828_v45, %v8442_v27 }
0x148b   : > { %v4850_v28 = vadd.f32 %v4820_v16, %v8439_v58  ;;  %v4823_v35 = vadd.f32 %v5378_v52, %v4822_v63 }
0x148c   : > { %v4853_v57 = vadd.f32 %v4831_v15, %v8450_v49  ;;  %v4866_v58 = vsel %vm737_vm9, %v4852_v33, 0.0 }
0x148d   : > { %v4851_v53 = vadd.f32 %v4823_v35, %v8445_v13  ;;  %v4860_v3 = vsel %vm737_vm9, %v4850_v28, 0.0  ;;  %v4992_v35 = vld [vmem:[#allocation4 + $0x40] sm:$0xff] }
0x148e   : > { %4861 = vadd.xlane.f32.xlu1 %v4860_v3  ;;  %v4869_v55 = vsel %vm737_vm9, %v4853_v57, 0.0  ;;  %v4994_v3 = vld [vmem:[#allocation4 + $0x50] sm:$0xff] }
0x148f   : > { %v6079_v14 = vpop.f32.mrb[84].mxu0  ;;  %v4863_v41 = vsel %vm737_vm9, %v4851_v53, 0.0 }
0x1490   : > { %4864 = vadd.xlane.f32.xlu0 %v4863_v41  ;;  %v4835_v61 = vpop.f32.mrb[85].mxu0  ;;  %v4844_v1 = vadd.f32 %v6079_v14, %v5378_v52 }
0x1491   : > { %v4836_v32 = vadd.f32 %v5378_v52, %v4835_v61  ;;  %v6080_v11 = vpop.f32.mrb[86].mxu0 }
0x1492   : > { %4867 = vadd.xlane.f32.xlu1 %v4866_v58  ;;  %v4838_v19 = vpop.f32.mrb[87].mxu0  ;;  %v4847_v13 = vadd.f32 %v6080_v11, %v5378_v52  ;;  %v4856_v49 = vadd.f32 %v4844_v1, %v8462_v59 }
0x1493   : > { %v4854_v27 = vadd.f32 %v4836_v32, %v8457_v60  ;;  %v4839_v47 = vadd.f32 %v5378_v52, %v4838_v19 }
0x1494   : > { %4870 = vadd.xlane.f32.xlu0 %v4869_v55  ;;  %v4857_v36 = vadd.f32 %v4847_v13, %v8470_v12  ;;  %v4878_v48 = vsel %vm737_vm9, %v4856_v49, 0.0 }
0x1495   : > { %v4855_v40 = vadd.f32 %v4839_v47, %v8465_v24  ;;  %v4872_v5 = vsel %vm737_vm9, %v4854_v27, 0.0 }
0x1496   : > { %4873 = vadd.xlane.f32.xlu1 %v4872_v5  ;;  %v4881_v60 = vsel %vm737_vm9, %v4857_v36, 0.0 }
0x1497   : > { %v4875_v10 = vsel %vm737_vm9, %v4855_v40, 0.0 }
0x1498   : > { %4876 = vadd.xlane.f32.xlu0 %v4875_v10 }
0x149a   : > { %4879 = vadd.xlane.f32.xlu1 %v4878_v48 }
0x149c   : > { %4882 = vadd.xlane.f32.xlu0 %v4881_v60 }
0x151b   : > { %v4862_v50 = vpop.xlane.xlu1 %4861 }
0x151c   : > { %v4884_v51 = vmul.f32 0.03125, %v4862_v50 }
0x151d   : > { %v4865_v62 = vpop.xlane.xlu0 %4864 }
0x151e   : > { %v8566_v59 = vsub.f32 %v4850_v28, %v4884_v51  ;;  %v4885_v24 = vmul.f32 0.03125, %v4865_v62 }
0x151f   : > { %v4868_v54 = vpop.xlane.xlu1 %4867 }
0x1520   : > { %v8568_v2 = vsub.f32 %v4851_v53, %v4885_v24  ;;  %v4886_v17 = vmul.f32 0.03125, %v4868_v54  ;;  %v4900_v12 = vmul.f32 %v8566_v59, %v8566_v59  ;;  %v5387_v54 = vld [vmem:[#allocation4 + $0x60] ss:$0 sm:$0xff] }
0x1521   : > { %v4871_v37 = vpop.xlane.xlu0 %4870 }
0x1522   : > { %v8572_v38 = vsub.f32 %v4852_v33, %v4886_v17  ;;  %v4887_v31 = vmul.f32 0.03125, %v4871_v37  ;;  %v4908_v44 = vsel %vm737_vm9, %v4900_v12, 0.0  ;;  %v4901_v6 = vmul.f32 %v8568_v2, %v8568_v2  ;;  %v4993_v33 = vld [vmem:[#allocation4 + $0x48] sm:$0xff] }
0x1523   : > { %4909 = vadd.xlane.f32.xlu1 %v4908_v44  ;;  %v4874_v34 = vpop.xlane.xlu1 %4873  ;;  %v4996_v53 = vpack.c.bf16 %v4993_v33, %v4992_v35 }
0x1524   : > { %v8577_v4 = vsub.f32 %v4853_v57, %v4887_v31  ;;  %v4888_v42 = vmul.f32 0.03125, %v4874_v34  ;;  %v4911_v22 = vsel %vm737_vm9, %v4901_v6, 0.0  ;;  %v4902_v26 = vmul.f32 %v8572_v38, %v8572_v38  ;;  %v4995_v57 = vld [vmem:[#allocation4 + $0x58] sm:$0xff] }
0x1525   : > { %4912 = vadd.xlane.f32.xlu0 %v4911_v22  ;;  %v4877_v20 = vpop.xlane.xlu0 %4876  ;;  %6081 = vmatprep.subr.bf16.mxu1 %v4996_v53  ;;  %v4997_v14 = vpack.c.bf16 %v4995_v57, %v4994_v3  ;;  %v5388_v22 = vld [vmem:[#allocation4 + $0x61] ss:$0 sm:$0xff] }
0x1526   : > { %v8582_v21 = vsub.f32 %v4854_v27, %v4888_v42  ;;  %v4889_v30 = vmul.f32 0.03125, %v4877_v20  ;;  %v4914_v43 = vsel %vm737_vm9, %v4902_v26, 0.0  ;;  %v4903_v23 = vmul.f32 %v8577_v4, %v8577_v4  ;;  %6082 = vmatpush3.bf16.msra.mxu1 %v4996_v53 }
0x1527   : > { %4915 = vadd.xlane.f32.xlu1 %v4914_v43  ;;  %v4880_v0 = vpop.xlane.xlu1 %4879  ;;  %6083 = vmatprep.subr.bf16.mxu1 %v4997_v14 }
0x1528   : > { %v8587_v29 = vsub.f32 %v4855_v40, %v4889_v30  ;;  %v4890_v7 = vmul.f32 0.03125, %v4880_v0  ;;  %v4917_v25 = vsel %vm737_vm9, %v4903_v23, 0.0  ;;  %v4904_v8 = vmul.f32 %v8582_v21, %v8582_v21 }
0x1529   : > { %4918 = vadd.xlane.f32.xlu0 %v4917_v25  ;;  %v4883_v46 = vpop.xlane.xlu0 %4882 }
0x152a   : > { %v8592_v39 = vsub.f32 %v4856_v49, %v4890_v7  ;;  %v4891_v52 = vmul.f32 0.03125, %v4883_v46  ;;  %v4920_v9 = vsel %vm737_vm9, %v4904_v8, 0.0  ;;  %v4905_v56 = vmul.f32 %v8587_v29, %v8587_v29  ;;  %6084 = vmatpush3.bf16.msra.mxu1 %v4997_v14 }
0x152b   : > { %4921 = vadd.xlane.f32.xlu1 %v4920_v9 }
0x152c   : > { %v8597_v45 = vsub.f32 %v4857_v36, %v4891_v52  ;;  %v4923_v16 = vsel %vm737_vm9, %v4905_v56, 0.0  ;;  %v4906_v18 = vmul.f32 %v8592_v39, %v8592_v39 }
0x152d   : > { %4924 = vadd.xlane.f32.xlu0 %v4923_v16 }
0x152e   : > { %v4926_v63 = vsel %vm737_vm9, %v4906_v18, 0.0  ;;  %v4907_v28 = vmul.f32 %v8597_v45, %v8597_v45 }
0x152f   : > { %4927 = vadd.xlane.f32.xlu1 %v4926_v63 }
0x1530   : > { %v4929_v15 = vsel %vm737_vm9, %v4907_v28, 0.0 }
0x1531   : > { %4930 = vadd.xlane.f32.xlu0 %v4929_v15 }
0x15b0   : > { %v4910_v41 = vpop.xlane.xlu1 %4909 }
0x15b1   : > { %v4932_v61 = vmul.f32 0.03125, %v4910_v41 }
0x15b2   : > { %v4913_v1 = vpop.xlane.xlu0 %4912 }
0x15b3   : > { %v4940_v32 = vadd.f32 1e-05, %v4932_v61  ;;  %v4933_v11 = vmul.f32 0.03125, %v4913_v1 }
0x15b4   : > { %v4916_v58 = vpop.xlane.xlu1 %4915 }
0x15b5   : > { %6599 = vrsqrt.f32 %v4940_v32  ;;  %v4941_v19 = vadd.f32 1e-05, %v4933_v11  ;;  %v4934_v27 = vmul.f32 0.03125, %v4916_v58 }
0x15b6   : > { %v4919_v13 = vpop.xlane.xlu0 %4918 }
0x15b7   : > { %6601 = vrsqrt.f32 %v4941_v19  ;;  %v4942_v47 = vadd.f32 1e-05, %v4934_v27  ;;  %v4935_v55 = vmul.f32 0.03125, %v4919_v13 }
0x15b8   : > { %v4922_v49 = vpop.xlane.xlu1 %4921 }
0x15b9   : > { %6603 = vrsqrt.f32 %v4942_v47  ;;  %v4943_v40 = vadd.f32 1e-05, %v4935_v55  ;;  %v4936_v5 = vmul.f32 0.03125, %v4922_v49 }
0x15ba   : > { %v4925_v36 = vpop.xlane.xlu0 %4924 }
0x15bb   : > { %6605 = vrsqrt.f32 %v4943_v40  ;;  %v4944_v10 = vadd.f32 1e-05, %v4936_v5  ;;  %v4937_v48 = vmul.f32 0.03125, %v4925_v36 }
0x15bc   : > { %v4928_v60 = vpop.xlane.xlu1 %4927 }
0x15bd   : > { %6607 = vrsqrt.f32 %v4944_v10  ;;  %v4945_v50 = vadd.f32 1e-05, %v4937_v48  ;;  %v4938_v51 = vmul.f32 0.03125, %v4928_v60 }
0x15be   : > { %v4931_v62 = vpop.xlane.xlu0 %4930 }
0x15bf   : > { %v6600_v24 = vpop.eup %6599  ;;  %6609 = vrsqrt.f32 %v4945_v50  ;;  %v4946_v17 = vadd.f32 1e-05, %v4938_v51  ;;  %v4939_v12 = vmul.f32 0.03125, %v4931_v62 }
0x15c0   : > { %v4956_v37 = vmul.f32 %v6600_v24, %v8566_v59 }
0x15c1   : > { %v6602_v31 = vpop.eup %6601  ;;  %6611 = vrsqrt.f32 %v4946_v17  ;;  %v4947_v44 = vadd.f32 1e-05, %v4939_v12 }
0x15c2   : > { %v4957_v6 = vmul.f32 %v6602_v31, %v8568_v2  ;;  %v4968_v34 = vmul.f32 %v5387_v54, %v4956_v37 }
0x15c3   : > { %v6604_v42 = vpop.eup %6603  ;;  %6613 = vrsqrt.f32 %v4947_v44 }
0x15c4   : > { %v4958_v26 = vmul.f32 %v6604_v42, %v8572_v38  ;;  %v4969_v20 = vmul.f32 %v5387_v54, %v4957_v6  ;;  %v4980_v0 = vadd.f32 %v5388_v22, %v4968_v34 }
0x15c5   : > { %v6606_v30 = vpop.eup %6605 }
0x15c6   : > { %v4970_v43 = vmul.f32 %v5387_v54, %v4958_v26  ;;  %v4959_v23 = vmul.f32 %v6606_v30, %v8577_v4  ;;  %v4981_v7 = vadd.f32 %v5388_v22, %v4969_v20 }
0x15c7   : > { %v6608_v25 = vpop.eup %6607 }
0x15c8   : > { %v4971_v59 = vmul.f32 %v5387_v54, %v4959_v23  ;;  %v4960_v8 = vmul.f32 %v6608_v25, %v8582_v21  ;;  %v4988_v46 = vpack.c.bf16 %v4981_v7, %v4980_v0  ;;  %v4982_v2 = vadd.f32 %v5388_v22, %v4970_v43 }
0x15c9   : > { %v6610_v52 = vpop.eup %6609 }
0x15ca   : > { %v4983_v9 = vadd.f32 %v5388_v22, %v4971_v59  ;;  %v4961_v56 = vmul.f32 %v6610_v52, %v8587_v29  ;;  %6085 = vmatprep.mubr.msk.bf16.mxu1 %vm737_vm9, %v4988_v46  ;;  %v4972_v38 = vmul.f32 %v5387_v54, %v4960_v8 }
0x15cb   : > { %v6612_v16 = vpop.eup %6611 }
0x15cc   : > { %v4962_v18 = vmul.f32 %v6612_v16, %v8592_v39  ;;  %v4989_v4 = vpack.c.bf16 %v4983_v9, %v4982_v2  ;;  %v4973_v63 = vmul.f32 %v5387_v54, %v4961_v56  ;;  %v4984_v21 = vadd.f32 %v5388_v22, %v4972_v38 }
0x15cd   : > { %v6614_v28 = vpop.eup %6613 }
0x15ce   : > { %v4963_v15 = vmul.f32 %v6614_v28, %v8597_v45  ;;  %6086 = vmatmul.mubr.msk.bf16.vlgmr.msra.gmra.mrb[128].mxu1 %vm737_vm9, %v4989_v4  ;;  %v4985_v35 = vadd.f32 %v5388_v22, %v4973_v63  ;;  %v4974_v33 = vmul.f32 %v5387_v54, %v4962_v18 }
0x15d0   : > { %v4990_v53 = vpack.c.bf16 %v4985_v35, %v4984_v21  ;;  %v4975_v3 = vmul.f32 %v5387_v54, %v4963_v15  ;;  %v4986_v29 = vadd.f32 %v5388_v22, %v4974_v33 }
0x15d2   : > { %6089 = vmatprep.mubr.msk.bf16.mxu1 %vm737_vm9, %v4990_v53  ;;  %v4987_v57 = vadd.f32 %v5388_v22, %v4975_v3 }
0x15d4   : > { %v4991_v14 = vpack.c.bf16 %v4987_v57, %v4986_v29 }
0x15d6   : > { %6090 = vmatmul.mubr.msk.bf16.gmra.mrb[132].mxu1 %vm737_vm9, %v4991_v14 }
0x16a1   : > { %v6087_v39 = vpop.f32.mrb[128].mxu1 }
0x16a2   : > { %5077 = vst [vmem:[%s229_s9 + $0x10] sm:$0xff] %v6087_v39  ;;  %v5044_v45 = vpop.f32.mrb[129].mxu1 }
0x16a3   : > { %5075 = vst [vmem:[%s229_s9] sm:$0xff] %v5044_v45  ;;  %v6088_v41 = vpop.f32.mrb[130].mxu1 }
0x16a4   : > { %5078 = vst [vmem:[%s229_s9 + $0x18] sm:$0xff] %v6088_v41  ;;  %v5047_v61 = vpop.f32.mrb[131].mxu1 }
0x16a5   : > { %5076 = vst [vmem:[%s229_s9 + $0x8] sm:$0xff] %v5047_v61 }
0x16a9   : > { %v6091_v1 = vpop.f32.mrb[132].mxu1 }
0x16aa   : > { %5081 = vst [vmem:[%s229_s9 + $0x30] sm:$0xff] %v6091_v1  ;;  %v5060_v32 = vpop.f32.mrb[133].mxu1 }
0x16ab   : > { %5079 = vst [vmem:[%s229_s9 + $0x20] sm:$0xff] %v5060_v32  ;;  %v6092_v11 = vpop.f32.mrb[134].mxu1 }
0x16ac   : > { %5082 = vst [vmem:[%s229_s9 + $0x38] sm:$0xff] %v6092_v11  ;;  %v5063_v58 = vpop.f32.mrb[135].mxu1 }
0x16ad   : > { %5080 = vst [vmem:[%s229_s9 + $0x28] sm:$0xff] %v5063_v58 }
0x16ae PF: > { %s16_s15 = sadd.s32 1, %s6701_s15  }
0x16af   : > { %p13_p2 = scmp.ge.s32.totalorder %s16_s15, 4  }
0x16b1   :  { %15 = sbr.rel (!%p13_p2) target bundleno = 2 (0x2), region = 77 }
0x16b8   :  { %5105 = vsyncpa [#allocation3], 1 }
0x16b9   :  { %5107 = vsyncpa [#allocation3 + $0x1], 1 }
0x16ba   :  { %5108 = vsyncpa [#allocation5], 1 }

</bundles_post_ra>
